<compile_context>
chip_gen: v6e
topology: v6e:2x2x1
jax: 0.10.0
libtpu: 0.0.40
codegen_flags: <defaults>
</compile_context>

<pallas_src>
import math

import jax
import jax.numpy as jnp
from jax.experimental import pallas as pl
from jax.experimental.pallas import tpu as pltpu

LN_EPS = 1e-5  # PyTorch nn.LayerNorm default


def _layernorm(v, w, b):
    mu = jnp.mean(v, axis=-1, keepdims=True)
    c = v - mu
    var = jnp.mean(c * c, axis=-1, keepdims=True)
    return c * jax.lax.rsqrt(var + LN_EPS) * w + b


def _tensorcores_per_chip():
    """v7x has 2 TensorCores per chip; v5e/v6e have 1 (perf heuristic only)."""
    try:
        kind = jax.devices()[0].device_kind.lower().replace(" ", "")
        if "v7" in kind or kind.startswith("tpu7"):
            return 2
    except Exception:
        pass
    return 1


def _make_kernel(S, D, H, Bg, batched_heads):
    HD = D // H

    def _attend(q, k, v):
        """Self-attention for one sequence. q/k/v: (S, D) f32 (q pre-scaled)."""
        if batched_heads:
            # Single relayout to head-major, then head-batched matmuls.
            qh = jnp.transpose(q.reshape(S, H, HD), (1, 0, 2))   # (H, S, HD)
            kh = jnp.transpose(k.reshape(S, H, HD), (1, 0, 2))
            vh = jnp.transpose(v.reshape(S, H, HD), (1, 0, 2))
            s = jnp.einsum("hqd,hkd->hqk", qh, kh,
                           preferred_element_type=jnp.float32)   # (H, S, S)
            s = s - jnp.max(s, axis=-1, keepdims=True)
            p = jnp.exp(s)
            p = p * pl.reciprocal(jnp.sum(p, axis=-1, keepdims=True), approx=True)
            ctx = jnp.einsum("hqk,hkd->hqd", p, vh,
                             preferred_element_type=jnp.float32)  # (H, S, HD)
            return jnp.transpose(ctx, (1, 0, 2)).reshape(S, D)
        # Fallback: statically unrolled per-head loop (known-good lowering).
        heads = []
        for h in range(H):
            qh = q[:, h * HD:(h + 1) * HD]
            kh = k[:, h * HD:(h + 1) * HD]
            vh = v[:, h * HD:(h + 1) * HD]
            s = jnp.dot(qh, kh.T, preferred_element_type=jnp.float32)
            s = s - jnp.max(s, axis=-1, keepdims=True)
            p = jnp.exp(s)
            p = p * pl.reciprocal(jnp.sum(p, axis=-1, keepdims=True), approx=True)
            heads.append(jnp.dot(p, vh, preferred_element_type=jnp.float32))
        return jnp.concatenate(heads, axis=-1)

    def kernel(x_ref, ln1w_ref, ln1b_ref, ln2w_ref, ln2b_ref,
               wqkv_ref, bqkv_ref, wo_ref, bo_ref, wl_ref, bl_ref, o_ref):
        x = x_ref[...].astype(jnp.float32)                # (Bg*S, D) rows
        # Hoist parameter loads (no per-iteration broadcast_in_dim).
        ln1w, ln1b = ln1w_ref[...], ln1b_ref[...]
        ln2w, ln2b = ln2w_ref[...], ln2b_ref[...]
        bqkv, bo, bl = bqkv_ref[...], bo_ref[...], bl_ref[...]

        def mm(a, w_ref, bias):
            # MXU operands in the weight dtype (f32 or bf16), f32 accumulation.
            return jnp.dot(a.astype(w_ref.dtype), w_ref[...],
                           preferred_element_type=jnp.float32) + bias

        # ---- norm1 + fused QKV projection over all rows at once ----
        xn = _layernorm(x, ln1w, ln1b)
        qkv = mm(xn, wqkv_ref, bqkv)                      # (Bg*S, 3D)
        q = qkv[:, 0 * D:1 * D]                           # scale folded in weights
        k = qkv[:, 1 * D:2 * D]
        v = qkv[:, 2 * D:3 * D]

        # ---- per-sequence self-attention (heads batched per sequence) ----
        outs = []
        for b in range(Bg):                               # static; Bg is 1 or 2
            r = slice(b * S, (b + 1) * S)                 # sublane-aligned rows
            outs.append(_attend(q[r], k[r], v[r]))
        attn = outs[0] if Bg == 1 else jnp.concatenate(outs, axis=0)

        attn = mm(attn, wo_ref, bo)                       # out_proj
        x1 = x + attn                                     # residual 1
        x1n = _layernorm(x1, ln2w, ln2b)
        y = mm(x1n, wl_ref, bl)                           # final linear
        o_ref[...] = (x1 + y).astype(o_ref.dtype)         # residual 2

    return kernel


def _build_call(B, S, D, H, G, out_dtype, batched_heads, single_buffer_weights):
    Bg = B // G
    Rg = Bg * S
    kernel = _make_kernel(S, D, H, Bg, batched_heads)

    # Weights/biases have a constant block index across the grid: with
    # Buffered(1) they are single-buffered (halves their VMEM footprint at
    # realistic DiT widths; free at D=32).
    wkw = {"pipeline_mode": pl.Buffered(1)} if single_buffer_weights else {}

    def wspec(shape):
        nd = len(shape)
        return pl.BlockSpec(shape, lambda i, _nd=nd: (0,) * _nd, **wkw)

    return pl.pallas_call(
        kernel,
        out_shape=jax.ShapeDtypeStruct((B * S, D), out_dtype),
        grid_spec=pltpu.PrefetchScalarGridSpec(
            num_scalar_prefetch=0,
            grid=(G,),
            in_specs=[
                pl.BlockSpec((Rg, D), lambda i: (i, 0)),   # x rows (batch folded)
                wspec((1, D)), wspec((1, D)),              # ln1 w, b
                wspec((1, D)), wspec((1, D)),              # ln2 w, b
                wspec((D, 3 * D)), wspec((1, 3 * D)),      # in_proj W^T (q pre-scaled), b
                wspec((D, D)), wspec((1, D)),              # out_proj W^T, b
                wspec((D, D)), wspec((1, D)),              # linear  W^T, b
            ],
            out_specs=pl.BlockSpec((Rg, D), lambda i: (i, 0)),
        ),
        compiler_params=pltpu.CompilerParams(
            dimension_semantics=("parallel",)),
    )


_VARIANT_CACHE = {}


def dit_block_pallas(x, params, num_heads=4, mxu_dtype=None):
    """Fused DiT block. x: (B, S, D). mxu_dtype=jnp.bfloat16 feeds the MXU bf16
    operands with f32 accumulation (recommended for v6e/v7x at real widths)."""
    B, S, D = x.shape
    H = num_heads
    assert D % H == 0
    HD = D // H
    scale = 1.0 / math.sqrt(HD)

    ln1w, ln1b, ln2w, ln2b, wqkv, bqkv, wo, bo, wl, bl = params

    wdtype = jnp.float32 if mxu_dtype is None else mxu_dtype
    wq, wk, wv = wqkv[:D], wqkv[D:2 * D], wqkv[2 * D:]
    bq, bk, bv = bqkv[:D], bqkv[D:2 * D], bqkv[2 * D:]
    # Fold the 1/sqrt(head_dim) query scale into the in_proj weights/bias and
    # pre-transpose all weights so the kernel computes x @ W^T.
    wqkv_t = jnp.concatenate([wq.T * scale, wk.T, wv.T], axis=1).astype(wdtype)  # (D, 3D)
    bqkv_f = jnp.concatenate([bq * scale, bk, bv])[None, :].astype(jnp.float32)  # (1, 3D)
    wo_t = wo.T.astype(wdtype)
    wl_t = wl.T.astype(wdtype)

    f32 = jnp.float32
    ln1w2, ln1b2 = ln1w[None, :].astype(f32), ln1b[None, :].astype(f32)
    ln2w2, ln2b2 = ln2w[None, :].astype(f32), ln2b[None, :].astype(f32)
    bo2, bl2 = bo[None, :].astype(f32), bl[None, :].astype(f32)

    # Fold the batch into the row axis -> dense (B*S, D) blocks.
    x2 = x.reshape(B * S, D)
    args = (x2, ln1w2, ln1b2, ln2w2, ln2b2, wqkv_t, bqkv_f, wo_t, bo2, wl_t, bl2)

    # One grid step on 1-TC chips (v5e/v6e); split the batch across both
    # TensorCores on v7x.
    G = 2 if (_tensorcores_per_chip() >= 2 and B % 2 == 0) else 1

    key = (B, S, D, H, str(x.dtype), str(jnp.dtype(wdtype)), G)
    tol = 2e-3 if mxu_dtype is None else 5e-2
    configs = ([_VARIANT_CACHE[key]] if key in _VARIANT_CACHE else
               [(True, True), (True, False), (False, True), (False, False)])

    ref = None
    last_err = None
    for batched_heads, single_buf in configs:
        try:
            fn = _build_call(B, S, D, H, G, x.dtype, batched_heads, single_buf)
            out2 = jax.block_until_ready(fn(*args))
            out = out2.reshape(B, S, D)
            if key not in _VARIANT_CACHE:
                # Validate the selected variant once before committing to it.
                if ref is None:
                    ref = dit_block_ref(x, params, H)
                if not bool(jnp.allclose(out, ref, atol=tol, rtol=tol)):
                    raise RuntimeError("variant produced out-of-tolerance result")
                _VARIANT_CACHE[key] = (batched_heads, single_buf)
            return out
        except Exception as e:  # lowering/compile failure -> try a safer variant
            last_err = e
    raise last_err


def dit_block_ref(x, params, num_heads=4):
    """Pure-JAX reference matching the PyTorch module semantics."""
    ln1w, ln1b, ln2w, ln2b, wqkv, bqkv, wo, bo, wl, bl = params
    B, S, D = x.shape
    HD = D // num_heads

    def ln(v, w, b):
        mu = jnp.mean(v, -1, keepdims=True)
        var = jnp.mean((v - mu) ** 2, -1, keepdims=True)
        return (v - mu) / jnp.sqrt(var + LN_EPS) * w + b

    res = x
    xn = ln(x, ln1w, ln1b)
    qkv = xn @ wqkv.T + bqkv
    q, k, v = qkv[..., :D], qkv[..., D:2 * D], qkv[..., 2 * D:]

    def split(t):  # (B,S,D) -> (B,H,S,HD)
        return t.reshape(B, S, num_heads, HD).transpose(0, 2, 1, 3)

    qh, kh, vh = split(q) / math.sqrt(HD), split(k), split(v)
    s = jnp.einsum("bhqd,bhkd->bhqk", qh, kh)
    p = jax.nn.softmax(s, axis=-1)
    o = jnp.einsum("bhqk,bhkd->bhqd", p, vh)
    o = o.transpose(0, 2, 1, 3).reshape(B, S, D)
    attn = o @ wo.T + bo
    x1 = res + attn
    y = ln(x1, ln2w, ln2b) @ wl.T + bl
    return x1 + y


def init_params(key, D):
    ks = jax.random.split(key, 8)
    s = 0.1
    ln1w = jnp.ones((D,), jnp.float32)
    ln1b = jnp.zeros((D,), jnp.float32)
    ln2w = jnp.ones((D,), jnp.float32)
    ln2b = jnp.zeros((D,), jnp.float32)
    wqkv = s * jax.random.normal(ks[0], (3 * D, D), jnp.float32)
    bqkv = s * jax.random.normal(ks[1], (3 * D,), jnp.float32)
    wo = s * jax.random.normal(ks[2], (D, D), jnp.float32)
    bo = s * jax.random.normal(ks[3], (D,), jnp.float32)
    wl = s * jax.random.normal(ks[4], (D, D), jnp.float32)
    bl = s * jax.random.normal(ks[5], (D,), jnp.float32)
    return (ln1w, ln1b, ln2w, ln2b, wqkv, bqkv, wo, bo, wl, bl)


if __name__ == "__main__":
    B, S, D = 2, 8, 32   # dims=32, 4 heads -> head_dim=8
    key = jax.random.PRNGKey(0)
    kx, kp = jax.random.split(key)
    x = jax.random.normal(kx, (B, S, D), jnp.float32)
    params = init_params(kp, D)

    out = dit_block_pallas(x, params, num_heads=4)
    out = jax.block_until_ready(out)

    ref = dit_block_ref(x, params, num_heads=4)
    assert out.shape == (B, S, D)
    max_err = float(jnp.max(jnp.abs(out - ref)))
    assert jnp.allclose(out, ref, atol=2e-3, rtol=2e-3), f"max err {max_err}"

    print("KERNEL_OK")
</pallas_src>

<mosaic_0001>
module attributes {stable_mosaic.version = 11 : i64} {
  func.func @kernel(%arg0: i32, %arg1: memref<16x32xf32, #tpu.memory_space<vmem>>, %arg2: memref<1x32xf32, #tpu.memory_space<vmem>>, %arg3: memref<1x32xf32, #tpu.memory_space<vmem>>, %arg4: memref<1x32xf32, #tpu.memory_space<vmem>>, %arg5: memref<1x32xf32, #tpu.memory_space<vmem>>, %arg6: memref<32x96xf32, #tpu.memory_space<vmem>>, %arg7: memref<1x96xf32, #tpu.memory_space<vmem>>, %arg8: memref<32x32xf32, #tpu.memory_space<vmem>>, %arg9: memref<1x32xf32, #tpu.memory_space<vmem>>, %arg10: memref<32x32xf32, #tpu.memory_space<vmem>>, %arg11: memref<1x32xf32, #tpu.memory_space<vmem>>, %arg12: memref<16x32xf32, #tpu.memory_space<vmem>>) attributes {dimension_semantics = [#tpu.dimension_semantics<parallel>], iteration_bounds = array<i64: 1>, scalar_prefetch = 0 : i64, scratch_operands = 0 : i64, tpu.core_type = #tpu.core_type<tc>, window_params = [{transform_indices = @transform_0, window_bounds = array<i64: 16, 32>}, {pipeline_mode = #tpu.pipeline_mode<synchronous>, transform_indices = @transform_1, window_bounds = array<i64: 1, 32>}, {pipeline_mode = #tpu.pipeline_mode<synchronous>, transform_indices = @transform_2, window_bounds = array<i64: 1, 32>}, {pipeline_mode = #tpu.pipeline_mode<synchronous>, transform_indices = @transform_3, window_bounds = array<i64: 1, 32>}, {pipeline_mode = #tpu.pipeline_mode<synchronous>, transform_indices = @transform_4, window_bounds = array<i64: 1, 32>}, {pipeline_mode = #tpu.pipeline_mode<synchronous>, transform_indices = @transform_5, window_bounds = array<i64: 32, 96>}, {pipeline_mode = #tpu.pipeline_mode<synchronous>, transform_indices = @transform_6, window_bounds = array<i64: 1, 96>}, {pipeline_mode = #tpu.pipeline_mode<synchronous>, transform_indices = @transform_7, window_bounds = array<i64: 32, 32>}, {pipeline_mode = #tpu.pipeline_mode<synchronous>, transform_indices = @transform_8, window_bounds = array<i64: 1, 32>}, {pipeline_mode = #tpu.pipeline_mode<synchronous>, transform_indices = @transform_9, window_bounds = array<i64: 32, 32>}, {pipeline_mode = #tpu.pipeline_mode<synchronous>, transform_indices = @transform_10, window_bounds = array<i64: 1, 32>}, {transform_indices = @transform_11, window_bounds = array<i64: 16, 32>}]} {
    %c0 = arith.constant 0 : index
    %c0_0 = arith.constant 0 : index
    %0 = vector.load %arg1[%c0, %c0_0] : memref<16x32xf32, #tpu.memory_space<vmem>>, vector<16x32xf32>
    %c0_1 = arith.constant 0 : index
    %c0_2 = arith.constant 0 : index
    %1 = vector.load %arg2[%c0_1, %c0_2] : memref<1x32xf32, #tpu.memory_space<vmem>>, vector<1x32xf32>
    %c0_3 = arith.constant 0 : index
    %c0_4 = arith.constant 0 : index
    %2 = vector.load %arg3[%c0_3, %c0_4] : memref<1x32xf32, #tpu.memory_space<vmem>>, vector<1x32xf32>
    %c0_5 = arith.constant 0 : index
    %c0_6 = arith.constant 0 : index
    %3 = vector.load %arg4[%c0_5, %c0_6] : memref<1x32xf32, #tpu.memory_space<vmem>>, vector<1x32xf32>
    %c0_7 = arith.constant 0 : index
    %c0_8 = arith.constant 0 : index
    %4 = vector.load %arg5[%c0_7, %c0_8] : memref<1x32xf32, #tpu.memory_space<vmem>>, vector<1x32xf32>
    %c0_9 = arith.constant 0 : index
    %c0_10 = arith.constant 0 : index
    %5 = vector.load %arg7[%c0_9, %c0_10] : memref<1x96xf32, #tpu.memory_space<vmem>>, vector<1x96xf32>
    %c0_11 = arith.constant 0 : index
    %c0_12 = arith.constant 0 : index
    %6 = vector.load %arg9[%c0_11, %c0_12] : memref<1x32xf32, #tpu.memory_space<vmem>>, vector<1x32xf32>
    %c0_13 = arith.constant 0 : index
    %c0_14 = arith.constant 0 : index
    %7 = vector.load %arg11[%c0_13, %c0_14] : memref<1x32xf32, #tpu.memory_space<vmem>>, vector<1x32xf32>
    %cst = arith.constant dense<0.000000e+00> : vector<16xf32>
    %8 = vector.multi_reduction <add>, %0, %cst [1] : vector<16x32xf32> to vector<16xf32>
    %9 = vector.shape_cast %8 : vector<16xf32> to vector<16x1xf32>
    %cst_15 = arith.constant 3.200000e+01 : f32
    %10 = vector.broadcast %cst_15 : f32 to vector<16x1xf32>
    %11 = arith.divf %9, %10 : vector<16x1xf32>
    %12 = vector.broadcast %11 : vector<16x1xf32> to vector<16x32xf32>
    %13 = arith.subf %0, %12 : vector<16x32xf32>
    %14 = arith.mulf %13, %13 : vector<16x32xf32>
    %cst_16 = arith.constant dense<0.000000e+00> : vector<16xf32>
    %15 = vector.multi_reduction <add>, %14, %cst_16 [1] : vector<16x32xf32> to vector<16xf32>
    %16 = vector.shape_cast %15 : vector<16xf32> to vector<16x1xf32>
    %cst_17 = arith.constant 3.200000e+01 : f32
    %17 = vector.broadcast %cst_17 : f32 to vector<16x1xf32>
    %18 = arith.divf %16, %17 : vector<16x1xf32>
    %cst_18 = arith.constant 9.99999974E-6 : f32
    %19 = vector.broadcast %cst_18 : f32 to vector<16x1xf32>
    %20 = arith.addf %18, %19 : vector<16x1xf32>
    %21 = math.rsqrt %20 : vector<16x1xf32>
    %22 = vector.broadcast %21 : vector<16x1xf32> to vector<16x32xf32>
    %23 = arith.mulf %13, %22 : vector<16x32xf32>
    %24 = vector.broadcast %1 : vector<1x32xf32> to vector<16x32xf32>
    %25 = arith.mulf %23, %24 : vector<16x32xf32>
    %26 = vector.broadcast %2 : vector<1x32xf32> to vector<16x32xf32>
    %27 = arith.addf %25, %26 : vector<16x32xf32>
    %c0_19 = arith.constant 0 : index
    %c0_20 = arith.constant 0 : index
    %28 = vector.load %arg6[%c0_19, %c0_20] : memref<32x96xf32, #tpu.memory_space<vmem>>, vector<32x96xf32>
    %cst_21 = arith.constant dense<0.000000e+00> : vector<16x96xf32>
    %29 = tpu.matmul %27, %28, %cst_21 {dimension_numbers = #tpu.dot_dimension_numbers<[1], [0], [0], [1], [0, 0, 1, 1], [], []>} : vector<16x32xf32>, vector<32x96xf32>, vector<16x96xf32> -> vector<16x96xf32>
    %30 = vector.broadcast %5 : vector<1x96xf32> to vector<16x96xf32>
    %31 = arith.addf %29, %30 : vector<16x96xf32>
    %32 = vector.extract_strided_slice %31 {offsets = [0, 0], sizes = [16, 32], strides = [1, 1]} : vector<16x96xf32> to vector<16x32xf32>
    %33 = vector.extract_strided_slice %31 {offsets = [0, 32], sizes = [16, 32], strides = [1, 1]} : vector<16x96xf32> to vector<16x32xf32>
    %34 = vector.extract_strided_slice %31 {offsets = [0, 64], sizes = [16, 32], strides = [1, 1]} : vector<16x96xf32> to vector<16x32xf32>
    %35 = vector.extract_strided_slice %32 {offsets = [0, 0], sizes = [8, 32], strides = [1, 1]} : vector<16x32xf32> to vector<8x32xf32>
    %36 = vector.extract_strided_slice %33 {offsets = [0, 0], sizes = [8, 32], strides = [1, 1]} : vector<16x32xf32> to vector<8x32xf32>
    %37 = vector.extract_strided_slice %34 {offsets = [0, 0], sizes = [8, 32], strides = [1, 1]} : vector<16x32xf32> to vector<8x32xf32>
    %38 = vector.shape_cast %35 : vector<8x32xf32> to vector<8x4x8xf32>
    %39 = tpu.transpose %38, [1, 0, 2] : vector<8x4x8xf32> -> vector<4x8x8xf32>
    %40 = vector.shape_cast %36 : vector<8x32xf32> to vector<8x4x8xf32>
    %41 = tpu.transpose %40, [1, 0, 2] : vector<8x4x8xf32> -> vector<4x8x8xf32>
    %42 = vector.shape_cast %37 : vector<8x32xf32> to vector<8x4x8xf32>
    %43 = tpu.transpose %42, [1, 0, 2] : vector<8x4x8xf32> -> vector<4x8x8xf32>
    "tpu.trace_start"() <{level = 10 : i32, message = "hqd,hkd->hqk"}> : () -> ()
    %cst_22 = arith.constant dense<0.000000e+00> : vector<4x8x8xf32>
    %44 = tpu.matmul %39, %41, %cst_22 {dimension_numbers = #tpu.dot_dimension_numbers<[2], [2], [1], [1], [0, 0, 0, 1, 1, 1], [0], [0]>} : vector<4x8x8xf32>, vector<4x8x8xf32>, vector<4x8x8xf32> -> vector<4x8x8xf32>
    "tpu.trace_stop"() : () -> ()
    %cst_23 = arith.constant dense<0xFF800000> : vector<4x8xf32>
    %45 = vector.multi_reduction <maximumf>, %44, %cst_23 [2] : vector<4x8x8xf32> to vector<4x8xf32>
    %46 = vector.shape_cast %45 : vector<4x8xf32> to vector<4x8x1xf32>
    %47 = vector.broadcast %46 : vector<4x8x1xf32> to vector<4x8x8xf32>
    %48 = arith.subf %44, %47 : vector<4x8x8xf32>
    %49 = math.exp %48 : vector<4x8x8xf32>
    %cst_24 = arith.constant dense<0.000000e+00> : vector<4x8xf32>
    %50 = vector.multi_reduction <add>, %49, %cst_24 [2] : vector<4x8x8xf32> to vector<4x8xf32>
    %51 = vector.shape_cast %50 : vector<4x8xf32> to vector<4x8x1xf32>
    %52 = tpu.reciprocal %51 {approx = true} : vector<4x8x1xf32> -> vector<4x8x1xf32>
    %53 = vector.broadcast %52 : vector<4x8x1xf32> to vector<4x8x8xf32>
    %54 = arith.mulf %49, %53 : vector<4x8x8xf32>
    "tpu.trace_start"() <{level = 10 : i32, message = "hqk,hkd->hqd"}> : () -> ()
    %cst_25 = arith.constant dense<0.000000e+00> : vector<4x8x8xf32>
    %55 = tpu.matmul %54, %43, %cst_25 {dimension_numbers = #tpu.dot_dimension_numbers<[2], [1], [1], [2], [0, 0, 0, 1, 1, 2], [0], [0]>} : vector<4x8x8xf32>, vector<4x8x8xf32>, vector<4x8x8xf32> -> vector<4x8x8xf32>
    "tpu.trace_stop"() : () -> ()
    %56 = tpu.transpose %55, [1, 0, 2] : vector<4x8x8xf32> -> vector<8x4x8xf32>
    %57 = vector.shape_cast %56 : vector<8x4x8xf32> to vector<8x32xf32>
    %58 = vector.extract_strided_slice %32 {offsets = [8, 0], sizes = [8, 32], strides = [1, 1]} : vector<16x32xf32> to vector<8x32xf32>
    %59 = vector.extract_strided_slice %33 {offsets = [8, 0], sizes = [8, 32], strides = [1, 1]} : vector<16x32xf32> to vector<8x32xf32>
    %60 = vector.extract_strided_slice %34 {offsets = [8, 0], sizes = [8, 32], strides = [1, 1]} : vector<16x32xf32> to vector<8x32xf32>
    %61 = vector.shape_cast %58 : vector<8x32xf32> to vector<8x4x8xf32>
    %62 = tpu.transpose %61, [1, 0, 2] : vector<8x4x8xf32> -> vector<4x8x8xf32>
    %63 = vector.shape_cast %59 : vector<8x32xf32> to vector<8x4x8xf32>
    %64 = tpu.transpose %63, [1, 0, 2] : vector<8x4x8xf32> -> vector<4x8x8xf32>
    %65 = vector.shape_cast %60 : vector<8x32xf32> to vector<8x4x8xf32>
    %66 = tpu.transpose %65, [1, 0, 2] : vector<8x4x8xf32> -> vector<4x8x8xf32>
    "tpu.trace_start"() <{level = 10 : i32, message = "hqd,hkd->hqk"}> : () -> ()
    %cst_26 = arith.constant dense<0.000000e+00> : vector<4x8x8xf32>
    %67 = tpu.matmul %62, %64, %cst_26 {dimension_numbers = #tpu.dot_dimension_numbers<[2], [2], [1], [1], [0, 0, 0, 1, 1, 1], [0], [0]>} : vector<4x8x8xf32>, vector<4x8x8xf32>, vector<4x8x8xf32> -> vector<4x8x8xf32>
    "tpu.trace_stop"() : () -> ()
    %cst_27 = arith.constant dense<0xFF800000> : vector<4x8xf32>
    %68 = vector.multi_reduction <maximumf>, %67, %cst_27 [2] : vector<4x8x8xf32> to vector<4x8xf32>
    %69 = vector.shape_cast %68 : vector<4x8xf32> to vector<4x8x1xf32>
    %70 = vector.broadcast %69 : vector<4x8x1xf32> to vector<4x8x8xf32>
    %71 = arith.subf %67, %70 : vector<4x8x8xf32>
    %72 = math.exp %71 : vector<4x8x8xf32>
    %cst_28 = arith.constant dense<0.000000e+00> : vector<4x8xf32>
    %73 = vector.multi_reduction <add>, %72, %cst_28 [2] : vector<4x8x8xf32> to vector<4x8xf32>
    %74 = vector.shape_cast %73 : vector<4x8xf32> to vector<4x8x1xf32>
    %75 = tpu.reciprocal %74 {approx = true} : vector<4x8x1xf32> -> vector<4x8x1xf32>
    %76 = vector.broadcast %75 : vector<4x8x1xf32> to vector<4x8x8xf32>
    %77 = arith.mulf %72, %76 : vector<4x8x8xf32>
    "tpu.trace_start"() <{level = 10 : i32, message = "hqk,hkd->hqd"}> : () -> ()
    %cst_29 = arith.constant dense<0.000000e+00> : vector<4x8x8xf32>
    %78 = tpu.matmul %77, %66, %cst_29 {dimension_numbers = #tpu.dot_dimension_numbers<[2], [1], [1], [2], [0, 0, 0, 1, 1, 2], [0], [0]>} : vector<4x8x8xf32>, vector<4x8x8xf32>, vector<4x8x8xf32> -> vector<4x8x8xf32>
    "tpu.trace_stop"() : () -> ()
    %79 = tpu.transpose %78, [1, 0, 2] : vector<4x8x8xf32> -> vector<8x4x8xf32>
    %80 = vector.shape_cast %79 : vector<8x4x8xf32> to vector<8x32xf32>
    %81 = tpu.concatenate %57, %80 in 0 : vector<8x32xf32>, vector<8x32xf32> -> vector<16x32xf32>
    %c0_30 = arith.constant 0 : index
    %c0_31 = arith.constant 0 : index
    %82 = vector.load %arg8[%c0_30, %c0_31] : memref<32x32xf32, #tpu.memory_space<vmem>>, vector<32x32xf32>
    %cst_32 = arith.constant dense<0.000000e+00> : vector<16x32xf32>
    %83 = tpu.matmul %81, %82, %cst_32 {dimension_numbers = #tpu.dot_dimension_numbers<[1], [0], [0], [1], [0, 0, 1, 1], [], []>} : vector<16x32xf32>, vector<32x32xf32>, vector<16x32xf32> -> vector<16x32xf32>
    %84 = vector.broadcast %6 : vector<1x32xf32> to vector<16x32xf32>
    %85 = arith.addf %83, %84 : vector<16x32xf32>
    %86 = arith.addf %0, %85 : vector<16x32xf32>
    %cst_33 = arith.constant dense<0.000000e+00> : vector<16xf32>
    %87 = vector.multi_reduction <add>, %86, %cst_33 [1] : vector<16x32xf32> to vector<16xf32>
    %88 = vector.shape_cast %87 : vector<16xf32> to vector<16x1xf32>
    %cst_34 = arith.constant 3.200000e+01 : f32
    %89 = vector.broadcast %cst_34 : f32 to vector<16x1xf32>
    %90 = arith.divf %88, %89 : vector<16x1xf32>
    %91 = vector.broadcast %90 : vector<16x1xf32> to vector<16x32xf32>
    %92 = arith.subf %86, %91 : vector<16x32xf32>
    %93 = arith.mulf %92, %92 : vector<16x32xf32>
    %cst_35 = arith.constant dense<0.000000e+00> : vector<16xf32>
    %94 = vector.multi_reduction <add>, %93, %cst_35 [1] : vector<16x32xf32> to vector<16xf32>
    %95 = vector.shape_cast %94 : vector<16xf32> to vector<16x1xf32>
    %cst_36 = arith.constant 3.200000e+01 : f32
    %96 = vector.broadcast %cst_36 : f32 to vector<16x1xf32>
    %97 = arith.divf %95, %96 : vector<16x1xf32>
    %cst_37 = arith.constant 9.99999974E-6 : f32
    %98 = vector.broadcast %cst_37 : f32 to vector<16x1xf32>
    %99 = arith.addf %97, %98 : vector<16x1xf32>
    %100 = math.rsqrt %99 : vector<16x1xf32>
    %101 = vector.broadcast %100 : vector<16x1xf32> to vector<16x32xf32>
    %102 = arith.mulf %92, %101 : vector<16x32xf32>
    %103 = vector.broadcast %3 : vector<1x32xf32> to vector<16x32xf32>
    %104 = arith.mulf %102, %103 : vector<16x32xf32>
    %105 = vector.broadcast %4 : vector<1x32xf32> to vector<16x32xf32>
    %106 = arith.addf %104, %105 : vector<16x32xf32>
    %c0_38 = arith.constant 0 : index
    %c0_39 = arith.constant 0 : index
    %107 = vector.load %arg10[%c0_38, %c0_39] : memref<32x32xf32, #tpu.memory_space<vmem>>, vector<32x32xf32>
    %cst_40 = arith.constant dense<0.000000e+00> : vector<16x32xf32>
    %108 = tpu.matmul %106, %107, %cst_40 {dimension_numbers = #tpu.dot_dimension_numbers<[1], [0], [0], [1], [0, 0, 1, 1], [], []>} : vector<16x32xf32>, vector<32x32xf32>, vector<16x32xf32> -> vector<16x32xf32>
    %109 = vector.broadcast %7 : vector<1x32xf32> to vector<16x32xf32>
    %110 = arith.addf %108, %109 : vector<16x32xf32>
    %111 = arith.addf %86, %110 : vector<16x32xf32>
    %c0_41 = arith.constant 0 : index
    %c0_42 = arith.constant 0 : index
    %112 = vector.load %arg12[%c0_41, %c0_42] : memref<16x32xf32, #tpu.memory_space<vmem>>, vector<16x32xf32>
    tpu.vector_store %arg12[%c0_41, %c0_42], %111 {strides = array<i32>} : memref<16x32xf32, #tpu.memory_space<vmem>>, vector<16x32xf32>,
    return
  }
  func.func @transform_0(%arg0: i32) -> (i32, i32) {
    %c0_i32 = arith.constant 0 : i32
    %c0_i32_0 = arith.constant 0 : i32
    return %arg0, %c0_i32 : i32, i32
  }
  func.func @transform_1(%arg0: i32) -> (i32, i32) {
    %c0_i32 = arith.constant 0 : i32
    %c0_i32_0 = arith.constant 0 : i32
    %c0_i32_1 = arith.constant 0 : i32
    return %c0_i32, %c0_i32_0 : i32, i32
  }
  func.func @transform_2(%arg0: i32) -> (i32, i32) {
    %c0_i32 = arith.constant 0 : i32
    %c0_i32_0 = arith.constant 0 : i32
    %c0_i32_1 = arith.constant 0 : i32
    return %c0_i32, %c0_i32_0 : i32, i32
  }
  func.func @transform_3(%arg0: i32) -> (i32, i32) {
    %c0_i32 = arith.constant 0 : i32
    %c0_i32_0 = arith.constant 0 : i32
    %c0_i32_1 = arith.constant 0 : i32
    return %c0_i32, %c0_i32_0 : i32, i32
  }
  func.func @transform_4(%arg0: i32) -> (i32, i32) {
    %c0_i32 = arith.constant 0 : i32
    %c0_i32_0 = arith.constant 0 : i32
    %c0_i32_1 = arith.constant 0 : i32
    return %c0_i32, %c0_i32_0 : i32, i32
  }
  func.func @transform_5(%arg0: i32) -> (i32, i32) {
    %c0_i32 = arith.constant 0 : i32
    %c0_i32_0 = arith.constant 0 : i32
    %c0_i32_1 = arith.constant 0 : i32
    return %c0_i32, %c0_i32_0 : i32, i32
  }
  func.func @transform_6(%arg0: i32) -> (i32, i32) {
    %c0_i32 = arith.constant 0 : i32
    %c0_i32_0 = arith.constant 0 : i32
    %c0_i32_1 = arith.constant 0 : i32
    return %c0_i32, %c0_i32_0 : i32, i32
  }
  func.func @transform_7(%arg0: i32) -> (i32, i32) {
    %c0_i32 = arith.constant 0 : i32
    %c0_i32_0 = arith.constant 0 : i32
    %c0_i32_1 = arith.constant 0 : i32
    return %c0_i32, %c0_i32_0 : i32, i32
  }
  func.func @transform_8(%arg0: i32) -> (i32, i32) {
    %c0_i32 = arith.constant 0 : i32
    %c0_i32_0 = arith.constant 0 : i32
    %c0_i32_1 = arith.constant 0 : i32
    return %c0_i32, %c0_i32_0 : i32, i32
  }
  func.func @transform_9(%arg0: i32) -> (i32, i32) {
    %c0_i32 = arith.constant 0 : i32
    %c0_i32_0 = arith.constant 0 : i32
    %c0_i32_1 = arith.constant 0 : i32
    return %c0_i32, %c0_i32_0 : i32, i32
  }
  func.func @transform_10(%arg0: i32) -> (i32, i32) {
    %c0_i32 = arith.constant 0 : i32
    %c0_i32_0 = arith.constant 0 : i32
    %c0_i32_1 = arith.constant 0 : i32
    return %c0_i32, %c0_i32_0 : i32, i32
  }
  func.func @transform_11(%arg0: i32) -> (i32, i32) {
    %c0_i32 = arith.constant 0 : i32
    %c0_i32_0 = arith.constant 0 : i32
    return %arg0, %c0_i32 : i32, i32
  }
}

module attributes {stable_mosaic.version = 11 : i64} {
  func.func @kernel(%arg0: i32, %arg1: memref<16x32xf32, #tpu.memory_space<vmem>>, %arg2: memref<1x32xf32, #tpu.memory_space<vmem>>, %arg3: memref<1x32xf32, #tpu.memory_space<vmem>>, %arg4: memref<1x32xf32, #tpu.memory_space<vmem>>, %arg5: memref<1x32xf32, #tpu.memory_space<vmem>>, %arg6: memref<32x96xf32, #tpu.memory_space<vmem>>, %arg7: memref<1x96xf32, #tpu.memory_space<vmem>>, %arg8: memref<32x32xf32, #tpu.memory_space<vmem>>, %arg9: memref<1x32xf32, #tpu.memory_space<vmem>>, %arg10: memref<32x32xf32, #tpu.memory_space<vmem>>, %arg11: memref<1x32xf32, #tpu.memory_space<vmem>>, %arg12: memref<16x32xf32, #tpu.memory_space<vmem>>) attributes {dimension_semantics = [#tpu.dimension_semantics<parallel>], iteration_bounds = array<i64: 1>, scalar_prefetch = 0 : i64, scratch_operands = 0 : i64, tpu.core_type = #tpu.core_type<tc>, window_params = [{transform_indices = @transform_0, window_bounds = array<i64: 16, 32>}, {pipeline_mode = #tpu.pipeline_mode<synchronous>, transform_indices = @transform_1, window_bounds = array<i64: 1, 32>}, {pipeline_mode = #tpu.pipeline_mode<synchronous>, transform_indices = @transform_2, window_bounds = array<i64: 1, 32>}, {pipeline_mode = #tpu.pipeline_mode<synchronous>, transform_indices = @transform_3, window_bounds = array<i64: 1, 32>}, {pipeline_mode = #tpu.pipeline_mode<synchronous>, transform_indices = @transform_4, window_bounds = array<i64: 1, 32>}, {pipeline_mode = #tpu.pipeline_mode<synchronous>, transform_indices = @transform_5, window_bounds = array<i64: 32, 96>}, {pipeline_mode = #tpu.pipeline_mode<synchronous>, transform_indices = @transform_6, window_bounds = array<i64: 1, 96>}, {pipeline_mode = #tpu.pipeline_mode<synchronous>, transform_indices = @transform_7, window_bounds = array<i64: 32, 32>}, {pipeline_mode = #tpu.pipeline_mode<synchronous>, transform_indices = @transform_8, window_bounds = array<i64: 1, 32>}, {pipeline_mode = #tpu.pipeline_mode<synchronous>, transform_indices = @transform_9, window_bounds = array<i64: 32, 32>}, {pipeline_mode = #tpu.pipeline_mode<synchronous>, transform_indices = @transform_10, window_bounds = array<i64: 1, 32>}, {transform_indices = @transform_11, window_bounds = array<i64: 16, 32>}]} {
    %c0 = arith.constant 0 : index
    %c0_0 = arith.constant 0 : index
    %0 = vector.load %arg1[%c0, %c0_0] : memref<16x32xf32, #tpu.memory_space<vmem>>, vector<16x32xf32>
    %c0_1 = arith.constant 0 : index
    %c0_2 = arith.constant 0 : index
    %1 = vector.load %arg2[%c0_1, %c0_2] : memref<1x32xf32, #tpu.memory_space<vmem>>, vector<1x32xf32>
    %c0_3 = arith.constant 0 : index
    %c0_4 = arith.constant 0 : index
    %2 = vector.load %arg3[%c0_3, %c0_4] : memref<1x32xf32, #tpu.memory_space<vmem>>, vector<1x32xf32>
    %c0_5 = arith.constant 0 : index
    %c0_6 = arith.constant 0 : index
    %3 = vector.load %arg4[%c0_5, %c0_6] : memref<1x32xf32, #tpu.memory_space<vmem>>, vector<1x32xf32>
    %c0_7 = arith.constant 0 : index
    %c0_8 = arith.constant 0 : index
    %4 = vector.load %arg5[%c0_7, %c0_8] : memref<1x32xf32, #tpu.memory_space<vmem>>, vector<1x32xf32>
    %c0_9 = arith.constant 0 : index
    %c0_10 = arith.constant 0 : index
    %5 = vector.load %arg7[%c0_9, %c0_10] : memref<1x96xf32, #tpu.memory_space<vmem>>, vector<1x96xf32>
    %c0_11 = arith.constant 0 : index
    %c0_12 = arith.constant 0 : index
    %6 = vector.load %arg9[%c0_11, %c0_12] : memref<1x32xf32, #tpu.memory_space<vmem>>, vector<1x32xf32>
    %c0_13 = arith.constant 0 : index
    %c0_14 = arith.constant 0 : index
    %7 = vector.load %arg11[%c0_13, %c0_14] : memref<1x32xf32, #tpu.memory_space<vmem>>, vector<1x32xf32>
    %cst = arith.constant dense<0.000000e+00> : vector<16xf32>
    %8 = vector.multi_reduction <add>, %0, %cst [1] : vector<16x32xf32> to vector<16xf32>
    %9 = vector.shape_cast %8 : vector<16xf32> to vector<16x1xf32>
    %cst_15 = arith.constant 3.200000e+01 : f32
    %10 = vector.broadcast %cst_15 : f32 to vector<16x1xf32>
    %11 = arith.divf %9, %10 : vector<16x1xf32>
    %12 = vector.broadcast %11 : vector<16x1xf32> to vector<16x32xf32>
    %13 = arith.subf %0, %12 : vector<16x32xf32>
    %14 = arith.mulf %13, %13 : vector<16x32xf32>
    %cst_16 = arith.constant dense<0.000000e+00> : vector<16xf32>
    %15 = vector.multi_reduction <add>, %14, %cst_16 [1] : vector<16x32xf32> to vector<16xf32>
    %16 = vector.shape_cast %15 : vector<16xf32> to vector<16x1xf32>
    %cst_17 = arith.constant 3.200000e+01 : f32
    %17 = vector.broadcast %cst_17 : f32 to vector<16x1xf32>
    %18 = arith.divf %16, %17 : vector<16x1xf32>
    %cst_18 = arith.constant 9.99999974E-6 : f32
    %19 = vector.broadcast %cst_18 : f32 to vector<16x1xf32>
    %20 = arith.addf %18, %19 : vector<16x1xf32>
    %21 = math.rsqrt %20 : vector<16x1xf32>
    %22 = vector.broadcast %21 : vector<16x1xf32> to vector<16x32xf32>
    %23 = arith.mulf %13, %22 : vector<16x32xf32>
    %24 = vector.broadcast %1 : vector<1x32xf32> to vector<16x32xf32>
    %25 = arith.mulf %23, %24 : vector<16x32xf32>
    %26 = vector.broadcast %2 : vector<1x32xf32> to vector<16x32xf32>
    %27 = arith.addf %25, %26 : vector<16x32xf32>
    %c0_19 = arith.constant 0 : index
    %c0_20 = arith.constant 0 : index
    %28 = vector.load %arg6[%c0_19, %c0_20] : memref<32x96xf32, #tpu.memory_space<vmem>>, vector<32x96xf32>
    %cst_21 = arith.constant dense<0.000000e+00> : vector<16x96xf32>
    %29 = tpu.matmul %27, %28, %cst_21 {dimension_numbers = #tpu.dot_dimension_numbers<[1], [0], [0], [1], [0, 0, 1, 1], [], []>} : vector<16x32xf32>, vector<32x96xf32>, vector<16x96xf32> -> vector<16x96xf32>
    %30 = vector.broadcast %5 : vector<1x96xf32> to vector<16x96xf32>
    %31 = arith.addf %29, %30 : vector<16x96xf32>
    %32 = vector.extract_strided_slice %31 {offsets = [0, 0], sizes = [16, 32], strides = [1, 1]} : vector<16x96xf32> to vector<16x32xf32>
    %33 = vector.extract_strided_slice %31 {offsets = [0, 32], sizes = [16, 32], strides = [1, 1]} : vector<16x96xf32> to vector<16x32xf32>
    %34 = vector.extract_strided_slice %31 {offsets = [0, 64], sizes = [16, 32], strides = [1, 1]} : vector<16x96xf32> to vector<16x32xf32>
    %35 = vector.extract_strided_slice %32 {offsets = [0, 0], sizes = [8, 32], strides = [1, 1]} : vector<16x32xf32> to vector<8x32xf32>
    %36 = vector.extract_strided_slice %33 {offsets = [0, 0], sizes = [8, 32], strides = [1, 1]} : vector<16x32xf32> to vector<8x32xf32>
    %37 = vector.extract_strided_slice %34 {offsets = [0, 0], sizes = [8, 32], strides = [1, 1]} : vector<16x32xf32> to vector<8x32xf32>
    %38 = vector.shape_cast %35 : vector<8x32xf32> to vector<8x4x8xf32>
    %39 = tpu.transpose %38, [1, 0, 2] : vector<8x4x8xf32> -> vector<4x8x8xf32>
    %40 = vector.shape_cast %36 : vector<8x32xf32> to vector<8x4x8xf32>
    %41 = tpu.transpose %40, [1, 0, 2] : vector<8x4x8xf32> -> vector<4x8x8xf32>
    %42 = vector.shape_cast %37 : vector<8x32xf32> to vector<8x4x8xf32>
    %43 = tpu.transpose %42, [1, 0, 2] : vector<8x4x8xf32> -> vector<4x8x8xf32>
    "tpu.trace_start"() <{level = 10 : i32, message = "hqd,hkd->hqk"}> : () -> ()
    %cst_22 = arith.constant dense<0.000000e+00> : vector<4x8x8xf32>
    %44 = tpu.matmul %39, %41, %cst_22 {dimension_numbers = #tpu.dot_dimension_numbers<[2], [2], [1], [1], [0, 0, 0, 1, 1, 1], [0], [0]>} : vector<4x8x8xf32>, vector<4x8x8xf32>, vector<4x8x8xf32> -> vector<4x8x8xf32>
    "tpu.trace_stop"() : () -> ()
    %cst_23 = arith.constant dense<0xFF800000> : vector<4x8xf32>
    %45 = vector.multi_reduction <maximumf>, %44, %cst_23 [2] : vector<4x8x8xf32> to vector<4x8xf32>
    %46 = vector.shape_cast %45 : vector<4x8xf32> to vector<4x8x1xf32>
    %47 = vector.broadcast %46 : vector<4x8x1xf32> to vector<4x8x8xf32>
    %48 = arith.subf %44, %47 : vector<4x8x8xf32>
    %49 = math.exp %48 : vector<4x8x8xf32>
    %cst_24 = arith.constant dense<0.000000e+00> : vector<4x8xf32>
    %50 = vector.multi_reduction <add>, %49, %cst_24 [2] : vector<4x8x8xf32> to vector<4x8xf32>
    %51 = vector.shape_cast %50 : vector<4x8xf32> to vector<4x8x1xf32>
    %52 = tpu.reciprocal %51 {approx = true} : vector<4x8x1xf32> -> vector<4x8x1xf32>
    %53 = vector.broadcast %52 : vector<4x8x1xf32> to vector<4x8x8xf32>
    %54 = arith.mulf %49, %53 : vector<4x8x8xf32>
    "tpu.trace_start"() <{level = 10 : i32, message = "hqk,hkd->hqd"}> : () -> ()
    %cst_25 = arith.constant dense<0.000000e+00> : vector<4x8x8xf32>
    %55 = tpu.matmul %54, %43, %cst_25 {dimension_numbers = #tpu.dot_dimension_numbers<[2], [1], [1], [2], [0, 0, 0, 1, 1, 2], [0], [0]>} : vector<4x8x8xf32>, vector<4x8x8xf32>, vector<4x8x8xf32> -> vector<4x8x8xf32>
    "tpu.trace_stop"() : () -> ()
    %56 = tpu.transpose %55, [1, 0, 2] : vector<4x8x8xf32> -> vector<8x4x8xf32>
    %57 = vector.shape_cast %56 : vector<8x4x8xf32> to vector<8x32xf32>
    %58 = vector.extract_strided_slice %32 {offsets = [8, 0], sizes = [8, 32], strides = [1, 1]} : vector<16x32xf32> to vector<8x32xf32>
    %59 = vector.extract_strided_slice %33 {offsets = [8, 0], sizes = [8, 32], strides = [1, 1]} : vector<16x32xf32> to vector<8x32xf32>
    %60 = vector.extract_strided_slice %34 {offsets = [8, 0], sizes = [8, 32], strides = [1, 1]} : vector<16x32xf32> to vector<8x32xf32>
    %61 = vector.shape_cast %58 : vector<8x32xf32> to vector<8x4x8xf32>
    %62 = tpu.transpose %61, [1, 0, 2] : vector<8x4x8xf32> -> vector<4x8x8xf32>
    %63 = vector.shape_cast %59 : vector<8x32xf32> to vector<8x4x8xf32>
    %64 = tpu.transpose %63, [1, 0, 2] : vector<8x4x8xf32> -> vector<4x8x8xf32>
    %65 = vector.shape_cast %60 : vector<8x32xf32> to vector<8x4x8xf32>
    %66 = tpu.transpose %65, [1, 0, 2] : vector<8x4x8xf32> -> vector<4x8x8xf32>
    "tpu.trace_start"() <{level = 10 : i32, message = "hqd,hkd->hqk"}> : () -> ()
    %cst_26 = arith.constant dense<0.000000e+00> : vector<4x8x8xf32>
    %67 = tpu.matmul %62, %64, %cst_26 {dimension_numbers = #tpu.dot_dimension_numbers<[2], [2], [1], [1], [0, 0, 0, 1, 1, 1], [0], [0]>} : vector<4x8x8xf32>, vector<4x8x8xf32>, vector<4x8x8xf32> -> vector<4x8x8xf32>
    "tpu.trace_stop"() : () -> ()
    %cst_27 = arith.constant dense<0xFF800000> : vector<4x8xf32>
    %68 = vector.multi_reduction <maximumf>, %67, %cst_27 [2] : vector<4x8x8xf32> to vector<4x8xf32>
    %69 = vector.shape_cast %68 : vector<4x8xf32> to vector<4x8x1xf32>
    %70 = vector.broadcast %69 : vector<4x8x1xf32> to vector<4x8x8xf32>
    %71 = arith.subf %67, %70 : vector<4x8x8xf32>
    %72 = math.exp %71 : vector<4x8x8xf32>
    %cst_28 = arith.constant dense<0.000000e+00> : vector<4x8xf32>
    %73 = vector.multi_reduction <add>, %72, %cst_28 [2] : vector<4x8x8xf32> to vector<4x8xf32>
    %74 = vector.shape_cast %73 : vector<4x8xf32> to vector<4x8x1xf32>
    %75 = tpu.reciprocal %74 {approx = true} : vector<4x8x1xf32> -> vector<4x8x1xf32>
    %76 = vector.broadcast %75 : vector<4x8x1xf32> to vector<4x8x8xf32>
    %77 = arith.mulf %72, %76 : vector<4x8x8xf32>
    "tpu.trace_start"() <{level = 10 : i32, message = "hqk,hkd->hqd"}> : () -> ()
    %cst_29 = arith.constant dense<0.000000e+00> : vector<4x8x8xf32>
    %78 = tpu.matmul %77, %66, %cst_29 {dimension_numbers = #tpu.dot_dimension_numbers<[2], [1], [1], [2], [0, 0, 0, 1, 1, 2], [0], [0]>} : vector<4x8x8xf32>, vector<4x8x8xf32>, vector<4x8x8xf32> -> vector<4x8x8xf32>
    "tpu.trace_stop"() : () -> ()
    %79 = tpu.transpose %78, [1, 0, 2] : vector<4x8x8xf32> -> vector<8x4x8xf32>
    %80 = vector.shape_cast %79 : vector<8x4x8xf32> to vector<8x32xf32>
    %81 = tpu.concatenate %57, %80 in 0 : vector<8x32xf32>, vector<8x32xf32> -> vector<16x32xf32>
    %c0_30 = arith.constant 0 : index
    %c0_31 = arith.constant 0 : index
    %82 = vector.load %arg8[%c0_30, %c0_31] : memref<32x32xf32, #tpu.memory_space<vmem>>, vector<32x32xf32>
    %cst_32 = arith.constant dense<0.000000e+00> : vector<16x32xf32>
    %83 = tpu.matmul %81, %82, %cst_32 {dimension_numbers = #tpu.dot_dimension_numbers<[1], [0], [0], [1], [0, 0, 1, 1], [], []>} : vector<16x32xf32>, vector<32x32xf32>, vector<16x32xf32> -> vector<16x32xf32>
    %84 = vector.broadcast %6 : vector<1x32xf32> to vector<16x32xf32>
    %85 = arith.addf %83, %84 : vector<16x32xf32>
    %86 = arith.addf %0, %85 : vector<16x32xf32>
    %cst_33 = arith.constant dense<0.000000e+00> : vector<16xf32>
    %87 = vector.multi_reduction <add>, %86, %cst_33 [1] : vector<16x32xf32> to vector<16xf32>
    %88 = vector.shape_cast %87 : vector<16xf32> to vector<16x1xf32>
    %cst_34 = arith.constant 3.200000e+01 : f32
    %89 = vector.broadcast %cst_34 : f32 to vector<16x1xf32>
    %90 = arith.divf %88, %89 : vector<16x1xf32>
    %91 = vector.broadcast %90 : vector<16x1xf32> to vector<16x32xf32>
    %92 = arith.subf %86, %91 : vector<16x32xf32>
    %93 = arith.mulf %92, %92 : vector<16x32xf32>
    %cst_35 = arith.constant dense<0.000000e+00> : vector<16xf32>
    %94 = vector.multi_reduction <add>, %93, %cst_35 [1] : vector<16x32xf32> to vector<16xf32>
    %95 = vector.shape_cast %94 : vector<16xf32> to vector<16x1xf32>
    %cst_36 = arith.constant 3.200000e+01 : f32
    %96 = vector.broadcast %cst_36 : f32 to vector<16x1xf32>
    %97 = arith.divf %95, %96 : vector<16x1xf32>
    %cst_37 = arith.constant 9.99999974E-6 : f32
    %98 = vector.broadcast %cst_37 : f32 to vector<16x1xf32>
    %99 = arith.addf %97, %98 : vector<16x1xf32>
    %100 = math.rsqrt %99 : vector<16x1xf32>
    %101 = vector.broadcast %100 : vector<16x1xf32> to vector<16x32xf32>
    %102 = arith.mulf %92, %101 : vector<16x32xf32>
    %103 = vector.broadcast %3 : vector<1x32xf32> to vector<16x32xf32>
    %104 = arith.mulf %102, %103 : vector<16x32xf32>
    %105 = vector.broadcast %4 : vector<1x32xf32> to vector<16x32xf32>
    %106 = arith.addf %104, %105 : vector<16x32xf32>
    %c0_38 = arith.constant 0 : index
    %c0_39 = arith.constant 0 : index
    %107 = vector.load %arg10[%c0_38, %c0_39] : memref<32x32xf32, #tpu.memory_space<vmem>>, vector<32x32xf32>
    %cst_40 = arith.constant dense<0.000000e+00> : vector<16x32xf32>
    %108 = tpu.matmul %106, %107, %cst_40 {dimension_numbers = #tpu.dot_dimension_numbers<[1], [0], [0], [1], [0, 0, 1, 1], [], []>} : vector<16x32xf32>, vector<32x32xf32>, vector<16x32xf32> -> vector<16x32xf32>
    %109 = vector.broadcast %7 : vector<1x32xf32> to vector<16x32xf32>
    %110 = arith.addf %108, %109 : vector<16x32xf32>
    %111 = arith.addf %86, %110 : vector<16x32xf32>
    %c0_41 = arith.constant 0 : index
    %c0_42 = arith.constant 0 : index
    %112 = vector.load %arg12[%c0_41, %c0_42] : memref<16x32xf32, #tpu.memory_space<vmem>>, vector<16x32xf32>
    tpu.vector_store %arg12[%c0_41, %c0_42], %111 {strides = array<i32>} : memref<16x32xf32, #tpu.memory_space<vmem>>, vector<16x32xf32>,
    return
  }
  func.func @transform_0(%arg0: i32) -> (i32, i32) {
    %c0_i32 = arith.constant 0 : i32
    %c0_i32_0 = arith.constant 0 : i32
    return %arg0, %c0_i32 : i32, i32
  }
  func.func @transform_1(%arg0: i32) -> (i32, i32) {
    %c0_i32 = arith.constant 0 : i32
    %c0_i32_0 = arith.constant 0 : i32
    %c0_i32_1 = arith.constant 0 : i32
    return %c0_i32, %c0_i32_0 : i32, i32
  }
  func.func @transform_2(%arg0: i32) -> (i32, i32) {
    %c0_i32 = arith.constant 0 : i32
    %c0_i32_0 = arith.constant 0 : i32
    %c0_i32_1 = arith.constant 0 : i32
    return %c0_i32, %c0_i32_0 : i32, i32
  }
  func.func @transform_3(%arg0: i32) -> (i32, i32) {
    %c0_i32 = arith.constant 0 : i32
    %c0_i32_0 = arith.constant 0 : i32
    %c0_i32_1 = arith.constant 0 : i32
    return %c0_i32, %c0_i32_0 : i32, i32
  }
  func.func @transform_4(%arg0: i32) -> (i32, i32) {
    %c0_i32 = arith.constant 0 : i32
    %c0_i32_0 = arith.constant 0 : i32
    %c0_i32_1 = arith.constant 0 : i32
    return %c0_i32, %c0_i32_0 : i32, i32
  }
  func.func @transform_5(%arg0: i32) -> (i32, i32) {
    %c0_i32 = arith.constant 0 : i32
    %c0_i32_0 = arith.constant 0 : i32
    %c0_i32_1 = arith.constant 0 : i32
    return %c0_i32, %c0_i32_0 : i32, i32
  }
  func.func @transform_6(%arg0: i32) -> (i32, i32) {
    %c0_i32 = arith.constant 0 : i32
    %c0_i32_0 = arith.constant 0 : i32
    %c0_i32_1 = arith.constant 0 : i32
    return %c0_i32, %c0_i32_0 : i32, i32
  }
  func.func @transform_7(%arg0: i32) -> (i32, i32) {
    %c0_i32 = arith.constant 0 : i32
    %c0_i32_0 = arith.constant 0 : i32
    %c0_i32_1 = arith.constant 0 : i32
    return %c0_i32, %c0_i32_0 : i32, i32
  }
  func.func @transform_8(%arg0: i32) -> (i32, i32) {
    %c0_i32 = arith.constant 0 : i32
    %c0_i32_0 = arith.constant 0 : i32
    %c0_i32_1 = arith.constant 0 : i32
    return %c0_i32, %c0_i32_0 : i32, i32
  }
  func.func @transform_9(%arg0: i32) -> (i32, i32) {
    %c0_i32 = arith.constant 0 : i32
    %c0_i32_0 = arith.constant 0 : i32
    %c0_i32_1 = arith.constant 0 : i32
    return %c0_i32, %c0_i32_0 : i32, i32
  }
  func.func @transform_10(%arg0: i32) -> (i32, i32) {
    %c0_i32 = arith.constant 0 : i32
    %c0_i32_0 = arith.constant 0 : i32
    %c0_i32_1 = arith.constant 0 : i32
    return %c0_i32, %c0_i32_0 : i32, i32
  }
  func.func @transform_11(%arg0: i32) -> (i32, i32) {
    %c0_i32 = arith.constant 0 : i32
    %c0_i32_0 = arith.constant 0 : i32
    return %arg0, %c0_i32 : i32, i32
  }
}

module attributes {stable_mosaic.version = 11 : i64} {
  func.func @kernel(%arg0: i32, %arg1: memref<16x32xf32, #tpu.memory_space<vmem>>, %arg2: memref<1x32xf32, #tpu.memory_space<vmem>>, %arg3: memref<1x32xf32, #tpu.memory_space<vmem>>, %arg4: memref<1x32xf32, #tpu.memory_space<vmem>>, %arg5: memref<1x32xf32, #tpu.memory_space<vmem>>, %arg6: memref<32x96xf32, #tpu.memory_space<vmem>>, %arg7: memref<1x96xf32, #tpu.memory_space<vmem>>, %arg8: memref<32x32xf32, #tpu.memory_space<vmem>>, %arg9: memref<1x32xf32, #tpu.memory_space<vmem>>, %arg10: memref<32x32xf32, #tpu.memory_space<vmem>>, %arg11: memref<1x32xf32, #tpu.memory_space<vmem>>, %arg12: memref<16x32xf32, #tpu.memory_space<vmem>>) attributes {dimension_semantics = [#tpu.dimension_semantics<parallel>], iteration_bounds = array<i64: 1>, scalar_prefetch = 0 : i64, scratch_operands = 0 : i64, tpu.core_type = #tpu.core_type<tc>, window_params = [{transform_indices = @transform_0, window_bounds = array<i64: 16, 32>}, {pipeline_mode = #tpu.pipeline_mode<synchronous>, transform_indices = @transform_1, window_bounds = array<i64: 1, 32>}, {pipeline_mode = #tpu.pipeline_mode<synchronous>, transform_indices = @transform_2, window_bounds = array<i64: 1, 32>}, {pipeline_mode = #tpu.pipeline_mode<synchronous>, transform_indices = @transform_3, window_bounds = array<i64: 1, 32>}, {pipeline_mode = #tpu.pipeline_mode<synchronous>, transform_indices = @transform_4, window_bounds = array<i64: 1, 32>}, {pipeline_mode = #tpu.pipeline_mode<synchronous>, transform_indices = @transform_5, window_bounds = array<i64: 32, 96>}, {pipeline_mode = #tpu.pipeline_mode<synchronous>, transform_indices = @transform_6, window_bounds = array<i64: 1, 96>}, {pipeline_mode = #tpu.pipeline_mode<synchronous>, transform_indices = @transform_7, window_bounds = array<i64: 32, 32>}, {pipeline_mode = #tpu.pipeline_mode<synchronous>, transform_indices = @transform_8, window_bounds = array<i64: 1, 32>}, {pipeline_mode = #tpu.pipeline_mode<synchronous>, transform_indices = @transform_9, window_bounds = array<i64: 32, 32>}, {pipeline_mode = #tpu.pipeline_mode<synchronous>, transform_indices = @transform_10, window_bounds = array<i64: 1, 32>}, {transform_indices = @transform_11, window_bounds = array<i64: 16, 32>}]} {
    %c0 = arith.constant 0 : index
    %c0_0 = arith.constant 0 : index
    %0 = vector.load %arg1[%c0, %c0_0] : memref<16x32xf32, #tpu.memory_space<vmem>>, vector<16x32xf32>
    %c0_1 = arith.constant 0 : index
    %c0_2 = arith.constant 0 : index
    %1 = vector.load %arg2[%c0_1, %c0_2] : memref<1x32xf32, #tpu.memory_space<vmem>>, vector<1x32xf32>
    %c0_3 = arith.constant 0 : index
    %c0_4 = arith.constant 0 : index
    %2 = vector.load %arg3[%c0_3, %c0_4] : memref<1x32xf32, #tpu.memory_space<vmem>>, vector<1x32xf32>
    %c0_5 = arith.constant 0 : index
    %c0_6 = arith.constant 0 : index
    %3 = vector.load %arg4[%c0_5, %c0_6] : memref<1x32xf32, #tpu.memory_space<vmem>>, vector<1x32xf32>
    %c0_7 = arith.constant 0 : index
    %c0_8 = arith.constant 0 : index
    %4 = vector.load %arg5[%c0_7, %c0_8] : memref<1x32xf32, #tpu.memory_space<vmem>>, vector<1x32xf32>
    %c0_9 = arith.constant 0 : index
    %c0_10 = arith.constant 0 : index
    %5 = vector.load %arg7[%c0_9, %c0_10] : memref<1x96xf32, #tpu.memory_space<vmem>>, vector<1x96xf32>
    %c0_11 = arith.constant 0 : index
    %c0_12 = arith.constant 0 : index
    %6 = vector.load %arg9[%c0_11, %c0_12] : memref<1x32xf32, #tpu.memory_space<vmem>>, vector<1x32xf32>
    %c0_13 = arith.constant 0 : index
    %c0_14 = arith.constant 0 : index
    %7 = vector.load %arg11[%c0_13, %c0_14] : memref<1x32xf32, #tpu.memory_space<vmem>>, vector<1x32xf32>
    %cst = arith.constant dense<0.000000e+00> : vector<16xf32>
    %8 = vector.multi_reduction <add>, %0, %cst [1] : vector<16x32xf32> to vector<16xf32>
    %9 = vector.shape_cast %8 : vector<16xf32> to vector<16x1xf32>
    %cst_15 = arith.constant 3.200000e+01 : f32
    %10 = vector.broadcast %cst_15 : f32 to vector<16x1xf32>
    %11 = arith.divf %9, %10 : vector<16x1xf32>
    %12 = vector.broadcast %11 : vector<16x1xf32> to vector<16x32xf32>
    %13 = arith.subf %0, %12 : vector<16x32xf32>
    %14 = arith.mulf %13, %13 : vector<16x32xf32>
    %cst_16 = arith.constant dense<0.000000e+00> : vector<16xf32>
    %15 = vector.multi_reduction <add>, %14, %cst_16 [1] : vector<16x32xf32> to vector<16xf32>
    %16 = vector.shape_cast %15 : vector<16xf32> to vector<16x1xf32>
    %cst_17 = arith.constant 3.200000e+01 : f32
    %17 = vector.broadcast %cst_17 : f32 to vector<16x1xf32>
    %18 = arith.divf %16, %17 : vector<16x1xf32>
    %cst_18 = arith.constant 9.99999974E-6 : f32
    %19 = vector.broadcast %cst_18 : f32 to vector<16x1xf32>
    %20 = arith.addf %18, %19 : vector<16x1xf32>
    %21 = math.rsqrt %20 : vector<16x1xf32>
    %22 = vector.broadcast %21 : vector<16x1xf32> to vector<16x32xf32>
    %23 = arith.mulf %13, %22 : vector<16x32xf32>
    %24 = vector.broadcast %1 : vector<1x32xf32> to vector<16x32xf32>
    %25 = arith.mulf %23, %24 : vector<16x32xf32>
    %26 = vector.broadcast %2 : vector<1x32xf32> to vector<16x32xf32>
    %27 = arith.addf %25, %26 : vector<16x32xf32>
    %c0_19 = arith.constant 0 : index
    %c0_20 = arith.constant 0 : index
    %28 = vector.load %arg6[%c0_19, %c0_20] : memref<32x96xf32, #tpu.memory_space<vmem>>, vector<32x96xf32>
    %cst_21 = arith.constant dense<0.000000e+00> : vector<16x96xf32>
    %29 = tpu.matmul %27, %28, %cst_21 {dimension_numbers = #tpu.dot_dimension_numbers<[1], [0], [0], [1], [0, 0, 1, 1], [], []>} : vector<16x32xf32>, vector<32x96xf32>, vector<16x96xf32> -> vector<16x96xf32>
    %30 = vector.broadcast %5 : vector<1x96xf32> to vector<16x96xf32>
    %31 = arith.addf %29, %30 : vector<16x96xf32>
    %32 = vector.extract_strided_slice %31 {offsets = [0, 0], sizes = [16, 32], strides = [1, 1]} : vector<16x96xf32> to vector<16x32xf32>
    %33 = vector.extract_strided_slice %31 {offsets = [0, 32], sizes = [16, 32], strides = [1, 1]} : vector<16x96xf32> to vector<16x32xf32>
    %34 = vector.extract_strided_slice %31 {offsets = [0, 64], sizes = [16, 32], strides = [1, 1]} : vector<16x96xf32> to vector<16x32xf32>
    %35 = vector.extract_strided_slice %32 {offsets = [0, 0], sizes = [8, 32], strides = [1, 1]} : vector<16x32xf32> to vector<8x32xf32>
    %36 = vector.extract_strided_slice %33 {offsets = [0, 0], sizes = [8, 32], strides = [1, 1]} : vector<16x32xf32> to vector<8x32xf32>
    %37 = vector.extract_strided_slice %34 {offsets = [0, 0], sizes = [8, 32], strides = [1, 1]} : vector<16x32xf32> to vector<8x32xf32>
    %38 = vector.extract_strided_slice %35 {offsets = [0, 0], sizes = [8, 8], strides = [1, 1]} : vector<8x32xf32> to vector<8x8xf32>
    %39 = vector.extract_strided_slice %36 {offsets = [0, 0], sizes = [8, 8], strides = [1, 1]} : vector<8x32xf32> to vector<8x8xf32>
    %40 = vector.extract_strided_slice %37 {offsets = [0, 0], sizes = [8, 8], strides = [1, 1]} : vector<8x32xf32> to vector<8x8xf32>
    %41 = tpu.transpose %39, [1, 0] : vector<8x8xf32> -> vector<8x8xf32>
    %cst_22 = arith.constant dense<0.000000e+00> : vector<8x8xf32>
    %42 = tpu.matmul %38, %41, %cst_22 {dimension_numbers = #tpu.dot_dimension_numbers<[1], [0], [0], [1], [0, 0, 1, 1], [], []>} : vector<8x8xf32>, vector<8x8xf32>, vector<8x8xf32> -> vector<8x8xf32>
    %cst_23 = arith.constant dense<0xFF800000> : vector<8xf32>
    %43 = vector.multi_reduction <maximumf>, %42, %cst_23 [1] : vector<8x8xf32> to vector<8xf32>
    %44 = vector.shape_cast %43 : vector<8xf32> to vector<8x1xf32>
    %45 = vector.broadcast %44 : vector<8x1xf32> to vector<8x8xf32>
    %46 = arith.subf %42, %45 : vector<8x8xf32>
    %47 = math.exp %46 : vector<8x8xf32>
    %cst_24 = arith.constant dense<0.000000e+00> : vector<8xf32>
    %48 = vector.multi_reduction <add>, %47, %cst_24 [1] : vector<8x8xf32> to vector<8xf32>
    %49 = vector.shape_cast %48 : vector<8xf32> to vector<8x1xf32>
    %50 = tpu.reciprocal %49 {approx = true} : vector<8x1xf32> -> vector<8x1xf32>
    %51 = vector.broadcast %50 : vector<8x1xf32> to vector<8x8xf32>
    %52 = arith.mulf %47, %51 : vector<8x8xf32>
    %cst_25 = arith.constant dense<0.000000e+00> : vector<8x8xf32>
    %53 = tpu.matmul %52, %40, %cst_25 {dimension_numbers = #tpu.dot_dimension_numbers<[1], [0], [0], [1], [0, 0, 1, 1], [], []>} : vector<8x8xf32>, vector<8x8xf32>, vector<8x8xf32> -> vector<8x8xf32>
    %54 = vector.extract_strided_slice %35 {offsets = [0, 8], sizes = [8, 8], strides = [1, 1]} : vector<8x32xf32> to vector<8x8xf32>
    %55 = vector.extract_strided_slice %36 {offsets = [0, 8], sizes = [8, 8], strides = [1, 1]} : vector<8x32xf32> to vector<8x8xf32>
    %56 = vector.extract_strided_slice %37 {offsets = [0, 8], sizes = [8, 8], strides = [1, 1]} : vector<8x32xf32> to vector<8x8xf32>
    %57 = tpu.transpose %55, [1, 0] : vector<8x8xf32> -> vector<8x8xf32>
    %cst_26 = arith.constant dense<0.000000e+00> : vector<8x8xf32>
    %58 = tpu.matmul %54, %57, %cst_26 {dimension_numbers = #tpu.dot_dimension_numbers<[1], [0], [0], [1], [0, 0, 1, 1], [], []>} : vector<8x8xf32>, vector<8x8xf32>, vector<8x8xf32> -> vector<8x8xf32>
    %cst_27 = arith.constant dense<0xFF800000> : vector<8xf32>
    %59 = vector.multi_reduction <maximumf>, %58, %cst_27 [1] : vector<8x8xf32> to vector<8xf32>
    %60 = vector.shape_cast %59 : vector<8xf32> to vector<8x1xf32>
    %61 = vector.broadcast %60 : vector<8x1xf32> to vector<8x8xf32>
    %62 = arith.subf %58, %61 : vector<8x8xf32>
    %63 = math.exp %62 : vector<8x8xf32>
    %cst_28 = arith.constant dense<0.000000e+00> : vector<8xf32>
    %64 = vector.multi_reduction <add>, %63, %cst_28 [1] : vector<8x8xf32> to vector<8xf32>
    %65 = vector.shape_cast %64 : vector<8xf32> to vector<8x1xf32>
    %66 = tpu.reciprocal %65 {approx = true} : vector<8x1xf32> -> vector<8x1xf32>
    %67 = vector.broadcast %66 : vector<8x1xf32> to vector<8x8xf32>
    %68 = arith.mulf %63, %67 : vector<8x8xf32>
    %cst_29 = arith.constant dense<0.000000e+00> : vector<8x8xf32>
    %69 = tpu.matmul %68, %56, %cst_29 {dimension_numbers = #tpu.dot_dimension_numbers<[1], [0], [0], [1], [0, 0, 1, 1], [], []>} : vector<8x8xf32>, vector<8x8xf32>, vector<8x8xf32> -> vector<8x8xf32>
    %70 = vector.extract_strided_slice %35 {offsets = [0, 16], sizes = [8, 8], strides = [1, 1]} : vector<8x32xf32> to vector<8x8xf32>
    %71 = vector.extract_strided_slice %36 {offsets = [0, 16], sizes = [8, 8], strides = [1, 1]} : vector<8x32xf32> to vector<8x8xf32>
    %72 = vector.extract_strided_slice %37 {offsets = [0, 16], sizes = [8, 8], strides = [1, 1]} : vector<8x32xf32> to vector<8x8xf32>
    %73 = tpu.transpose %71, [1, 0] : vector<8x8xf32> -> vector<8x8xf32>
    %cst_30 = arith.constant dense<0.000000e+00> : vector<8x8xf32>
    %74 = tpu.matmul %70, %73, %cst_30 {dimension_numbers = #tpu.dot_dimension_numbers<[1], [0], [0], [1], [0, 0, 1, 1], [], []>} : vector<8x8xf32>, vector<8x8xf32>, vector<8x8xf32> -> vector<8x8xf32>
    %cst_31 = arith.constant dense<0xFF800000> : vector<8xf32>
    %75 = vector.multi_reduction <maximumf>, %74, %cst_31 [1] : vector<8x8xf32> to vector<8xf32>
    %76 = vector.shape_cast %75 : vector<8xf32> to vector<8x1xf32>
    %77 = vector.broadcast %76 : vector<8x1xf32> to vector<8x8xf32>
    %78 = arith.subf %74, %77 : vector<8x8xf32>
    %79 = math.exp %78 : vector<8x8xf32>
    %cst_32 = arith.constant dense<0.000000e+00> : vector<8xf32>
    %80 = vector.multi_reduction <add>, %79, %cst_32 [1] : vector<8x8xf32> to vector<8xf32>
    %81 = vector.shape_cast %80 : vector<8xf32> to vector<8x1xf32>
    %82 = tpu.reciprocal %81 {approx = true} : vector<8x1xf32> -> vector<8x1xf32>
    %83 = vector.broadcast %82 : vector<8x1xf32> to vector<8x8xf32>
    %84 = arith.mulf %79, %83 : vector<8x8xf32>
    %cst_33 = arith.constant dense<0.000000e+00> : vector<8x8xf32>
    %85 = tpu.matmul %84, %72, %cst_33 {dimension_numbers = #tpu.dot_dimension_numbers<[1], [0], [0], [1], [0, 0, 1, 1], [], []>} : vector<8x8xf32>, vector<8x8xf32>, vector<8x8xf32> -> vector<8x8xf32>
    %86 = vector.extract_strided_slice %35 {offsets = [0, 24], sizes = [8, 8], strides = [1, 1]} : vector<8x32xf32> to vector<8x8xf32>
    %87 = vector.extract_strided_slice %36 {offsets = [0, 24], sizes = [8, 8], strides = [1, 1]} : vector<8x32xf32> to vector<8x8xf32>
    %88 = vector.extract_strided_slice %37 {offsets = [0, 24], sizes = [8, 8], strides = [1, 1]} : vector<8x32xf32> to vector<8x8xf32>
    %89 = tpu.transpose %87, [1, 0] : vector<8x8xf32> -> vector<8x8xf32>
    %cst_34 = arith.constant dense<0.000000e+00> : vector<8x8xf32>
    %90 = tpu.matmul %86, %89, %cst_34 {dimension_numbers = #tpu.dot_dimension_numbers<[1], [0], [0], [1], [0, 0, 1, 1], [], []>} : vector<8x8xf32>, vector<8x8xf32>, vector<8x8xf32> -> vector<8x8xf32>
    %cst_35 = arith.constant dense<0xFF800000> : vector<8xf32>
    %91 = vector.multi_reduction <maximumf>, %90, %cst_35 [1] : vector<8x8xf32> to vector<8xf32>
    %92 = vector.shape_cast %91 : vector<8xf32> to vector<8x1xf32>
    %93 = vector.broadcast %92 : vector<8x1xf32> to vector<8x8xf32>
    %94 = arith.subf %90, %93 : vector<8x8xf32>
    %95 = math.exp %94 : vector<8x8xf32>
    %cst_36 = arith.constant dense<0.000000e+00> : vector<8xf32>
    %96 = vector.multi_reduction <add>, %95, %cst_36 [1] : vector<8x8xf32> to vector<8xf32>
    %97 = vector.shape_cast %96 : vector<8xf32> to vector<8x1xf32>
    %98 = tpu.reciprocal %97 {approx = true} : vector<8x1xf32> -> vector<8x1xf32>
    %99 = vector.broadcast %98 : vector<8x1xf32> to vector<8x8xf32>
    %100 = arith.mulf %95, %99 : vector<8x8xf32>
    %cst_37 = arith.constant dense<0.000000e+00> : vector<8x8xf32>
    %101 = tpu.matmul %100, %88, %cst_37 {dimension_numbers = #tpu.dot_dimension_numbers<[1], [0], [0], [1], [0, 0, 1, 1], [], []>} : vector<8x8xf32>, vector<8x8xf32>, vector<8x8xf32> -> vector<8x8xf32>
    %102 = tpu.concatenate %53, %69, %85, %101 in 1 : vector<8x8xf32>, vector<8x8xf32>, vector<8x8xf32>, vector<8x8xf32> -> vector<8x32xf32>
    %103 = vector.extract_strided_slice %32 {offsets = [8, 0], sizes = [8, 32], strides = [1, 1]} : vector<16x32xf32> to vector<8x32xf32>
    %104 = vector.extract_strided_slice %33 {offsets = [8, 0], sizes = [8, 32], strides = [1, 1]} : vector<16x32xf32> to vector<8x32xf32>
    %105 = vector.extract_strided_slice %34 {offsets = [8, 0], sizes = [8, 32], strides = [1, 1]} : vector<16x32xf32> to vector<8x32xf32>
    %106 = vector.extract_strided_slice %103 {offsets = [0, 0], sizes = [8, 8], strides = [1, 1]} : vector<8x32xf32> to vector<8x8xf32>
    %107 = vector.extract_strided_slice %104 {offsets = [0, 0], sizes = [8, 8], strides = [1, 1]} : vector<8x32xf32> to vector<8x8xf32>
    %108 = vector.extract_strided_slice %105 {offsets = [0, 0], sizes = [8, 8], strides = [1, 1]} : vector<8x32xf32> to vector<8x8xf32>
    %109 = tpu.transpose %107, [1, 0] : vector<8x8xf32> -> vector<8x8xf32>
    %cst_38 = arith.constant dense<0.000000e+00> : vector<8x8xf32>
    %110 = tpu.matmul %106, %109, %cst_38 {dimension_numbers = #tpu.dot_dimension_numbers<[1], [0], [0], [1], [0, 0, 1, 1], [], []>} : vector<8x8xf32>, vector<8x8xf32>, vector<8x8xf32> -> vector<8x8xf32>
    %cst_39 = arith.constant dense<0xFF800000> : vector<8xf32>
    %111 = vector.multi_reduction <maximumf>, %110, %cst_39 [1] : vector<8x8xf32> to vector<8xf32>
    %112 = vector.shape_cast %111 : vector<8xf32> to vector<8x1xf32>
    %113 = vector.broadcast %112 : vector<8x1xf32> to vector<8x8xf32>
    %114 = arith.subf %110, %113 : vector<8x8xf32>
    %115 = math.exp %114 : vector<8x8xf32>
    %cst_40 = arith.constant dense<0.000000e+00> : vector<8xf32>
    %116 = vector.multi_reduction <add>, %115, %cst_40 [1] : vector<8x8xf32> to vector<8xf32>
    %117 = vector.shape_cast %116 : vector<8xf32> to vector<8x1xf32>
    %118 = tpu.reciprocal %117 {approx = true} : vector<8x1xf32> -> vector<8x1xf32>
    %119 = vector.broadcast %118 : vector<8x1xf32> to vector<8x8xf32>
    %120 = arith.mulf %115, %119 : vector<8x8xf32>
    %cst_41 = arith.constant dense<0.000000e+00> : vector<8x8xf32>
    %121 = tpu.matmul %120, %108, %cst_41 {dimension_numbers = #tpu.dot_dimension_numbers<[1], [0], [0], [1], [0, 0, 1, 1], [], []>} : vector<8x8xf32>, vector<8x8xf32>, vector<8x8xf32> -> vector<8x8xf32>
    %122 = vector.extract_strided_slice %103 {offsets = [0, 8], sizes = [8, 8], strides = [1, 1]} : vector<8x32xf32> to vector<8x8xf32>
    %123 = vector.extract_strided_slice %104 {offsets = [0, 8], sizes = [8, 8], strides = [1, 1]} : vector<8x32xf32> to vector<8x8xf32>
    %124 = vector.extract_strided_slice %105 {offsets = [0, 8], sizes = [8, 8], strides = [1, 1]} : vector<8x32xf32> to vector<8x8xf32>
    %125 = tpu.transpose %123, [1, 0] : vector<8x8xf32> -> vector<8x8xf32>
    %cst_42 = arith.constant dense<0.000000e+00> : vector<8x8xf32>
    %126 = tpu.matmul %122, %125, %cst_42 {dimension_numbers = #tpu.dot_dimension_numbers<[1], [0], [0], [1], [0, 0, 1, 1], [], []>} : vector<8x8xf32>, vector<8x8xf32>, vector<8x8xf32> -> vector<8x8xf32>
    %cst_43 = arith.constant dense<0xFF800000> : vector<8xf32>
    %127 = vector.multi_reduction <maximumf>, %126, %cst_43 [1] : vector<8x8xf32> to vector<8xf32>
    %128 = vector.shape_cast %127 : vector<8xf32> to vector<8x1xf32>
    %129 = vector.broadcast %128 : vector<8x1xf32> to vector<8x8xf32>
    %130 = arith.subf %126, %129 : vector<8x8xf32>
    %131 = math.exp %130 : vector<8x8xf32>
    %cst_44 = arith.constant dense<0.000000e+00> : vector<8xf32>
    %132 = vector.multi_reduction <add>, %131, %cst_44 [1] : vector<8x8xf32> to vector<8xf32>
    %133 = vector.shape_cast %132 : vector<8xf32> to vector<8x1xf32>
    %134 = tpu.reciprocal %133 {approx = true} : vector<8x1xf32> -> vector<8x1xf32>
    %135 = vector.broadcast %134 : vector<8x1xf32> to vector<8x8xf32>
    %136 = arith.mulf %131, %135 : vector<8x8xf32>
    %cst_45 = arith.constant dense<0.000000e+00> : vector<8x8xf32>
    %137 = tpu.matmul %136, %124, %cst_45 {dimension_numbers = #tpu.dot_dimension_numbers<[1], [0], [0], [1], [0, 0, 1, 1], [], []>} : vector<8x8xf32>, vector<8x8xf32>, vector<8x8xf32> -> vector<8x8xf32>
    %138 = vector.extract_strided_slice %103 {offsets = [0, 16], sizes = [8, 8], strides = [1, 1]} : vector<8x32xf32> to vector<8x8xf32>
    %139 = vector.extract_strided_slice %104 {offsets = [0, 16], sizes = [8, 8], strides = [1, 1]} : vector<8x32xf32> to vector<8x8xf32>
    %140 = vector.extract_strided_slice %105 {offsets = [0, 16], sizes = [8, 8], strides = [1, 1]} : vector<8x32xf32> to vector<8x8xf32>
    %141 = tpu.transpose %139, [1, 0] : vector<8x8xf32> -> vector<8x8xf32>
    %cst_46 = arith.constant dense<0.000000e+00> : vector<8x8xf32>
    %142 = tpu.matmul %138, %141, %cst_46 {dimension_numbers = #tpu.dot_dimension_numbers<[1], [0], [0], [1], [0, 0, 1, 1], [], []>} : vector<8x8xf32>, vector<8x8xf32>, vector<8x8xf32> -> vector<8x8xf32>
    %cst_47 = arith.constant dense<0xFF800000> : vector<8xf32>
    %143 = vector.multi_reduction <maximumf>, %142, %cst_47 [1] : vector<8x8xf32> to vector<8xf32>
    %144 = vector.shape_cast %143 : vector<8xf32> to vector<8x1xf32>
    %145 = vector.broadcast %144 : vector<8x1xf32> to vector<8x8xf32>
    %146 = arith.subf %142, %145 : vector<8x8xf32>
    %147 = math.exp %146 : vector<8x8xf32>
    %cst_48 = arith.constant dense<0.000000e+00> : vector<8xf32>
    %148 = vector.multi_reduction <add>, %147, %cst_48 [1] : vector<8x8xf32> to vector<8xf32>
    %149 = vector.shape_cast %148 : vector<8xf32> to vector<8x1xf32>
    %150 = tpu.reciprocal %149 {approx = true} : vector<8x1xf32> -> vector<8x1xf32>
    %151 = vector.broadcast %150 : vector<8x1xf32> to vector<8x8xf32>
    %152 = arith.mulf %147, %151 : vector<8x8xf32>
    %cst_49 = arith.constant dense<0.000000e+00> : vector<8x8xf32>
    %153 = tpu.matmul %152, %140, %cst_49 {dimension_numbers = #tpu.dot_dimension_numbers<[1], [0], [0], [1], [0, 0, 1, 1], [], []>} : vector<8x8xf32>, vector<8x8xf32>, vector<8x8xf32> -> vector<8x8xf32>
    %154 = vector.extract_strided_slice %103 {offsets = [0, 24], sizes = [8, 8], strides = [1, 1]} : vector<8x32xf32> to vector<8x8xf32>
    %155 = vector.extract_strided_slice %104 {offsets = [0, 24], sizes = [8, 8], strides = [1, 1]} : vector<8x32xf32> to vector<8x8xf32>
    %156 = vector.extract_strided_slice %105 {offsets = [0, 24], sizes = [8, 8], strides = [1, 1]} : vector<8x32xf32> to vector<8x8xf32>
    %157 = tpu.transpose %155, [1, 0] : vector<8x8xf32> -> vector<8x8xf32>
    %cst_50 = arith.constant dense<0.000000e+00> : vector<8x8xf32>
    %158 = tpu.matmul %154, %157, %cst_50 {dimension_numbers = #tpu.dot_dimension_numbers<[1], [0], [0], [1], [0, 0, 1, 1], [], []>} : vector<8x8xf32>, vector<8x8xf32>, vector<8x8xf32> -> vector<8x8xf32>
    %cst_51 = arith.constant dense<0xFF800000> : vector<8xf32>
    %159 = vector.multi_reduction <maximumf>, %158, %cst_51 [1] : vector<8x8xf32> to vector<8xf32>
    %160 = vector.shape_cast %159 : vector<8xf32> to vector<8x1xf32>
    %161 = vector.broadcast %160 : vector<8x1xf32> to vector<8x8xf32>
    %162 = arith.subf %158, %161 : vector<8x8xf32>
    %163 = math.exp %162 : vector<8x8xf32>
    %cst_52 = arith.constant dense<0.000000e+00> : vector<8xf32>
    %164 = vector.multi_reduction <add>, %163, %cst_52 [1] : vector<8x8xf32> to vector<8xf32>
    %165 = vector.shape_cast %164 : vector<8xf32> to vector<8x1xf32>
    %166 = tpu.reciprocal %165 {approx = true} : vector<8x1xf32> -> vector<8x1xf32>
    %167 = vector.broadcast %166 : vector<8x1xf32> to vector<8x8xf32>
    %168 = arith.mulf %163, %167 : vector<8x8xf32>
    %cst_53 = arith.constant dense<0.000000e+00> : vector<8x8xf32>
    %169 = tpu.matmul %168, %156, %cst_53 {dimension_numbers = #tpu.dot_dimension_numbers<[1], [0], [0], [1], [0, 0, 1, 1], [], []>} : vector<8x8xf32>, vector<8x8xf32>, vector<8x8xf32> -> vector<8x8xf32>
    %170 = tpu.concatenate %121, %137, %153, %169 in 1 : vector<8x8xf32>, vector<8x8xf32>, vector<8x8xf32>, vector<8x8xf32> -> vector<8x32xf32>
    %171 = tpu.concatenate %102, %170 in 0 : vector<8x32xf32>, vector<8x32xf32> -> vector<16x32xf32>
    %c0_54 = arith.constant 0 : index
    %c0_55 = arith.constant 0 : index
    %172 = vector.load %arg8[%c0_54, %c0_55] : memref<32x32xf32, #tpu.memory_space<vmem>>, vector<32x32xf32>
    %cst_56 = arith.constant dense<0.000000e+00> : vector<16x32xf32>
    %173 = tpu.matmul %171, %172, %cst_56 {dimension_numbers = #tpu.dot_dimension_numbers<[1], [0], [0], [1], [0, 0, 1, 1], [], []>} : vector<16x32xf32>, vector<32x32xf32>, vector<16x32xf32> -> vector<16x32xf32>
    %174 = vector.broadcast %6 : vector<1x32xf32> to vector<16x32xf32>
    %175 = arith.addf %173, %174 : vector<16x32xf32>
    %176 = arith.addf %0, %175 : vector<16x32xf32>
    %cst_57 = arith.constant dense<0.000000e+00> : vector<16xf32>
    %177 = vector.multi_reduction <add>, %176, %cst_57 [1] : vector<16x32xf32> to vector<16xf32>
    %178 = vector.shape_cast %177 : vector<16xf32> to vector<16x1xf32>
    %cst_58 = arith.constant 3.200000e+01 : f32
    %179 = vector.broadcast %cst_58 : f32 to vector<16x1xf32>
    %180 = arith.divf %178, %179 : vector<16x1xf32>
    %181 = vector.broadcast %180 : vector<16x1xf32> to vector<16x32xf32>
    %182 = arith.subf %176, %181 : vector<16x32xf32>
    %183 = arith.mulf %182, %182 : vector<16x32xf32>
    %cst_59 = arith.constant dense<0.000000e+00> : vector<16xf32>
    %184 = vector.multi_reduction <add>, %183, %cst_59 [1] : vector<16x32xf32> to vector<16xf32>
    %185 = vector.shape_cast %184 : vector<16xf32> to vector<16x1xf32>
    %cst_60 = arith.constant 3.200000e+01 : f32
    %186 = vector.broadcast %cst_60 : f32 to vector<16x1xf32>
    %187 = arith.divf %185, %186 : vector<16x1xf32>
    %cst_61 = arith.constant 9.99999974E-6 : f32
    %188 = vector.broadcast %cst_61 : f32 to vector<16x1xf32>
    %189 = arith.addf %187, %188 : vector<16x1xf32>
    %190 = math.rsqrt %189 : vector<16x1xf32>
    %191 = vector.broadcast %190 : vector<16x1xf32> to vector<16x32xf32>
    %192 = arith.mulf %182, %191 : vector<16x32xf32>
    %193 = vector.broadcast %3 : vector<1x32xf32> to vector<16x32xf32>
    %194 = arith.mulf %192, %193 : vector<16x32xf32>
    %195 = vector.broadcast %4 : vector<1x32xf32> to vector<16x32xf32>
    %196 = arith.addf %194, %195 : vector<16x32xf32>
    %c0_62 = arith.constant 0 : index
    %c0_63 = arith.constant 0 : index
    %197 = vector.load %arg10[%c0_62, %c0_63] : memref<32x32xf32, #tpu.memory_space<vmem>>, vector<32x32xf32>
    %cst_64 = arith.constant dense<0.000000e+00> : vector<16x32xf32>
    %198 = tpu.matmul %196, %197, %cst_64 {dimension_numbers = #tpu.dot_dimension_numbers<[1], [0], [0], [1], [0, 0, 1, 1], [], []>} : vector<16x32xf32>, vector<32x32xf32>, vector<16x32xf32> -> vector<16x32xf32>
    %199 = vector.broadcast %7 : vector<1x32xf32> to vector<16x32xf32>
    %200 = arith.addf %198, %199 : vector<16x32xf32>
    %201 = arith.addf %176, %200 : vector<16x32xf32>
    %c0_65 = arith.constant 0 : index
    %c0_66 = arith.constant 0 : index
    %202 = vector.load %arg12[%c0_65, %c0_66] : memref<16x32xf32, #tpu.memory_space<vmem>>, vector<16x32xf32>
    tpu.vector_store %arg12[%c0_65, %c0_66], %201 {strides = array<i32>} : memref<16x32xf32, #tpu.memory_space<vmem>>, vector<16x32xf32>,
    return
  }
  func.func @transform_0(%arg0: i32) -> (i32, i32) {
    %c0_i32 = arith.constant 0 : i32
    %c0_i32_0 = arith.constant 0 : i32
    return %arg0, %c0_i32 : i32, i32
  }
  func.func @transform_1(%arg0: i32) -> (i32, i32) {
    %c0_i32 = arith.constant 0 : i32
    %c0_i32_0 = arith.constant 0 : i32
    %c0_i32_1 = arith.constant 0 : i32
    return %c0_i32, %c0_i32_0 : i32, i32
  }
  func.func @transform_2(%arg0: i32) -> (i32, i32) {
    %c0_i32 = arith.constant 0 : i32
    %c0_i32_0 = arith.constant 0 : i32
    %c0_i32_1 = arith.constant 0 : i32
    return %c0_i32, %c0_i32_0 : i32, i32
  }
  func.func @transform_3(%arg0: i32) -> (i32, i32) {
    %c0_i32 = arith.constant 0 : i32
    %c0_i32_0 = arith.constant 0 : i32
    %c0_i32_1 = arith.constant 0 : i32
    return %c0_i32, %c0_i32_0 : i32, i32
  }
  func.func @transform_4(%arg0: i32) -> (i32, i32) {
    %c0_i32 = arith.constant 0 : i32
    %c0_i32_0 = arith.constant 0 : i32
    %c0_i32_1 = arith.constant 0 : i32
    return %c0_i32, %c0_i32_0 : i32, i32
  }
  func.func @transform_5(%arg0: i32) -> (i32, i32) {
    %c0_i32 = arith.constant 0 : i32
    %c0_i32_0 = arith.constant 0 : i32
    %c0_i32_1 = arith.constant 0 : i32
    return %c0_i32, %c0_i32_0 : i32, i32
  }
  func.func @transform_6(%arg0: i32) -> (i32, i32) {
    %c0_i32 = arith.constant 0 : i32
    %c0_i32_0 = arith.constant 0 : i32
    %c0_i32_1 = arith.constant 0 : i32
    return %c0_i32, %c0_i32_0 : i32, i32
  }
  func.func @transform_7(%arg0: i32) -> (i32, i32) {
    %c0_i32 = arith.constant 0 : i32
    %c0_i32_0 = arith.constant 0 : i32
    %c0_i32_1 = arith.constant 0 : i32
    return %c0_i32, %c0_i32_0 : i32, i32
  }
  func.func @transform_8(%arg0: i32) -> (i32, i32) {
    %c0_i32 = arith.constant 0 : i32
    %c0_i32_0 = arith.constant 0 : i32
    %c0_i32_1 = arith.constant 0 : i32
    return %c0_i32, %c0_i32_0 : i32, i32
  }
  func.func @transform_9(%arg0: i32) -> (i32, i32) {
    %c0_i32 = arith.constant 0 : i32
    %c0_i32_0 = arith.constant 0 : i32
    %c0_i32_1 = arith.constant 0 : i32
    return %c0_i32, %c0_i32_0 : i32, i32
  }
  func.func @transform_10(%arg0: i32) -> (i32, i32) {
    %c0_i32 = arith.constant 0 : i32
    %c0_i32_0 = arith.constant 0 : i32
    %c0_i32_1 = arith.constant 0 : i32
    return %c0_i32, %c0_i32_0 : i32, i32
  }
  func.func @transform_11(%arg0: i32) -> (i32, i32) {
    %c0_i32 = arith.constant 0 : i32
    %c0_i32_0 = arith.constant 0 : i32
    return %arg0, %c0_i32 : i32, i32
  }
}

module attributes {stable_mosaic.version = 11 : i64} {
  func.func @kernel(%arg0: i32, %arg1: memref<16x32xf32, #tpu.memory_space<vmem>>, %arg2: memref<1x32xf32, #tpu.memory_space<vmem>>, %arg3: memref<1x32xf32, #tpu.memory_space<vmem>>, %arg4: memref<1x32xf32, #tpu.memory_space<vmem>>, %arg5: memref<1x32xf32, #tpu.memory_space<vmem>>, %arg6: memref<32x96xf32, #tpu.memory_space<vmem>>, %arg7: memref<1x96xf32, #tpu.memory_space<vmem>>, %arg8: memref<32x32xf32, #tpu.memory_space<vmem>>, %arg9: memref<1x32xf32, #tpu.memory_space<vmem>>, %arg10: memref<32x32xf32, #tpu.memory_space<vmem>>, %arg11: memref<1x32xf32, #tpu.memory_space<vmem>>, %arg12: memref<16x32xf32, #tpu.memory_space<vmem>>) attributes {dimension_semantics = [#tpu.dimension_semantics<parallel>], iteration_bounds = array<i64: 1>, scalar_prefetch = 0 : i64, scratch_operands = 0 : i64, tpu.core_type = #tpu.core_type<tc>, window_params = [{transform_indices = @transform_0, window_bounds = array<i64: 16, 32>}, {pipeline_mode = #tpu.pipeline_mode<synchronous>, transform_indices = @transform_1, window_bounds = array<i64: 1, 32>}, {pipeline_mode = #tpu.pipeline_mode<synchronous>, transform_indices = @transform_2, window_bounds = array<i64: 1, 32>}, {pipeline_mode = #tpu.pipeline_mode<synchronous>, transform_indices = @transform_3, window_bounds = array<i64: 1, 32>}, {pipeline_mode = #tpu.pipeline_mode<synchronous>, transform_indices = @transform_4, window_bounds = array<i64: 1, 32>}, {pipeline_mode = #tpu.pipeline_mode<synchronous>, transform_indices = @transform_5, window_bounds = array<i64: 32, 96>}, {pipeline_mode = #tpu.pipeline_mode<synchronous>, transform_indices = @transform_6, window_bounds = array<i64: 1, 96>}, {pipeline_mode = #tpu.pipeline_mode<synchronous>, transform_indices = @transform_7, window_bounds = array<i64: 32, 32>}, {pipeline_mode = #tpu.pipeline_mode<synchronous>, transform_indices = @transform_8, window_bounds = array<i64: 1, 32>}, {pipeline_mode = #tpu.pipeline_mode<synchronous>, transform_indices = @transform_9, window_bounds = array<i64: 32, 32>}, {pipeline_mode = #tpu.pipeline_mode<synchronous>, transform_indices = @transform_10, window_bounds = array<i64: 1, 32>}, {transform_indices = @transform_11, window_bounds = array<i64: 16, 32>}]} {
    %c0 = arith.constant 0 : index
    %c0_0 = arith.constant 0 : index
    %0 = vector.load %arg1[%c0, %c0_0] : memref<16x32xf32, #tpu.memory_space<vmem>>, vector<16x32xf32>
    %c0_1 = arith.constant 0 : index
    %c0_2 = arith.constant 0 : index
    %1 = vector.load %arg2[%c0_1, %c0_2] : memref<1x32xf32, #tpu.memory_space<vmem>>, vector<1x32xf32>
    %c0_3 = arith.constant 0 : index
    %c0_4 = arith.constant 0 : index
    %2 = vector.load %arg3[%c0_3, %c0_4] : memref<1x32xf32, #tpu.memory_space<vmem>>, vector<1x32xf32>
    %c0_5 = arith.constant 0 : index
    %c0_6 = arith.constant 0 : index
    %3 = vector.load %arg4[%c0_5, %c0_6] : memref<1x32xf32, #tpu.memory_space<vmem>>, vector<1x32xf32>
    %c0_7 = arith.constant 0 : index
    %c0_8 = arith.constant 0 : index
    %4 = vector.load %arg5[%c0_7, %c0_8] : memref<1x32xf32, #tpu.memory_space<vmem>>, vector<1x32xf32>
    %c0_9 = arith.constant 0 : index
    %c0_10 = arith.constant 0 : index
    %5 = vector.load %arg7[%c0_9, %c0_10] : memref<1x96xf32, #tpu.memory_space<vmem>>, vector<1x96xf32>
    %c0_11 = arith.constant 0 : index
    %c0_12 = arith.constant 0 : index
    %6 = vector.load %arg9[%c0_11, %c0_12] : memref<1x32xf32, #tpu.memory_space<vmem>>, vector<1x32xf32>
    %c0_13 = arith.constant 0 : index
    %c0_14 = arith.constant 0 : index
    %7 = vector.load %arg11[%c0_13, %c0_14] : memref<1x32xf32, #tpu.memory_space<vmem>>, vector<1x32xf32>
    %cst = arith.constant dense<0.000000e+00> : vector<16xf32>
    %8 = vector.multi_reduction <add>, %0, %cst [1] : vector<16x32xf32> to vector<16xf32>
    %9 = vector.shape_cast %8 : vector<16xf32> to vector<16x1xf32>
    %cst_15 = arith.constant 3.200000e+01 : f32
    %10 = vector.broadcast %cst_15 : f32 to vector<16x1xf32>
    %11 = arith.divf %9, %10 : vector<16x1xf32>
    %12 = vector.broadcast %11 : vector<16x1xf32> to vector<16x32xf32>
    %13 = arith.subf %0, %12 : vector<16x32xf32>
    %14 = arith.mulf %13, %13 : vector<16x32xf32>
    %cst_16 = arith.constant dense<0.000000e+00> : vector<16xf32>
    %15 = vector.multi_reduction <add>, %14, %cst_16 [1] : vector<16x32xf32> to vector<16xf32>
    %16 = vector.shape_cast %15 : vector<16xf32> to vector<16x1xf32>
    %cst_17 = arith.constant 3.200000e+01 : f32
    %17 = vector.broadcast %cst_17 : f32 to vector<16x1xf32>
    %18 = arith.divf %16, %17 : vector<16x1xf32>
    %cst_18 = arith.constant 9.99999974E-6 : f32
    %19 = vector.broadcast %cst_18 : f32 to vector<16x1xf32>
    %20 = arith.addf %18, %19 : vector<16x1xf32>
    %21 = math.rsqrt %20 : vector<16x1xf32>
    %22 = vector.broadcast %21 : vector<16x1xf32> to vector<16x32xf32>
    %23 = arith.mulf %13, %22 : vector<16x32xf32>
    %24 = vector.broadcast %1 : vector<1x32xf32> to vector<16x32xf32>
    %25 = arith.mulf %23, %24 : vector<16x32xf32>
    %26 = vector.broadcast %2 : vector<1x32xf32> to vector<16x32xf32>
    %27 = arith.addf %25, %26 : vector<16x32xf32>
    %c0_19 = arith.constant 0 : index
    %c0_20 = arith.constant 0 : index
    %28 = vector.load %arg6[%c0_19, %c0_20] : memref<32x96xf32, #tpu.memory_space<vmem>>, vector<32x96xf32>
    %cst_21 = arith.constant dense<0.000000e+00> : vector<16x96xf32>
    %29 = tpu.matmul %27, %28, %cst_21 {dimension_numbers = #tpu.dot_dimension_numbers<[1], [0], [0], [1], [0, 0, 1, 1], [], []>} : vector<16x32xf32>, vector<32x96xf32>, vector<16x96xf32> -> vector<16x96xf32>
    %30 = vector.broadcast %5 : vector<1x96xf32> to vector<16x96xf32>
    %31 = arith.addf %29, %30 : vector<16x96xf32>
    %32 = vector.extract_strided_slice %31 {offsets = [0, 0], sizes = [16, 32], strides = [1, 1]} : vector<16x96xf32> to vector<16x32xf32>
    %33 = vector.extract_strided_slice %31 {offsets = [0, 32], sizes = [16, 32], strides = [1, 1]} : vector<16x96xf32> to vector<16x32xf32>
    %34 = vector.extract_strided_slice %31 {offsets = [0, 64], sizes = [16, 32], strides = [1, 1]} : vector<16x96xf32> to vector<16x32xf32>
    %35 = vector.extract_strided_slice %32 {offsets = [0, 0], sizes = [8, 32], strides = [1, 1]} : vector<16x32xf32> to vector<8x32xf32>
    %36 = vector.extract_strided_slice %33 {offsets = [0, 0], sizes = [8, 32], strides = [1, 1]} : vector<16x32xf32> to vector<8x32xf32>
    %37 = vector.extract_strided_slice %34 {offsets = [0, 0], sizes = [8, 32], strides = [1, 1]} : vector<16x32xf32> to vector<8x32xf32>
    %38 = vector.extract_strided_slice %35 {offsets = [0, 0], sizes = [8, 8], strides = [1, 1]} : vector<8x32xf32> to vector<8x8xf32>
    %39 = vector.extract_strided_slice %36 {offsets = [0, 0], sizes = [8, 8], strides = [1, 1]} : vector<8x32xf32> to vector<8x8xf32>
    %40 = vector.extract_strided_slice %37 {offsets = [0, 0], sizes = [8, 8], strides = [1, 1]} : vector<8x32xf32> to vector<8x8xf32>
    %41 = tpu.transpose %39, [1, 0] : vector<8x8xf32> -> vector<8x8xf32>
    %cst_22 = arith.constant dense<0.000000e+00> : vector<8x8xf32>
    %42 = tpu.matmul %38, %41, %cst_22 {dimension_numbers = #tpu.dot_dimension_numbers<[1], [0], [0], [1], [0, 0, 1, 1], [], []>} : vector<8x8xf32>, vector<8x8xf32>, vector<8x8xf32> -> vector<8x8xf32>
    %cst_23 = arith.constant dense<0xFF800000> : vector<8xf32>
    %43 = vector.multi_reduction <maximumf>, %42, %cst_23 [1] : vector<8x8xf32> to vector<8xf32>
    %44 = vector.shape_cast %43 : vector<8xf32> to vector<8x1xf32>
    %45 = vector.broadcast %44 : vector<8x1xf32> to vector<8x8xf32>
    %46 = arith.subf %42, %45 : vector<8x8xf32>
    %47 = math.exp %46 : vector<8x8xf32>
    %cst_24 = arith.constant dense<0.000000e+00> : vector<8xf32>
    %48 = vector.multi_reduction <add>, %47, %cst_24 [1] : vector<8x8xf32> to vector<8xf32>
    %49 = vector.shape_cast %48 : vector<8xf32> to vector<8x1xf32>
    %50 = tpu.reciprocal %49 {approx = true} : vector<8x1xf32> -> vector<8x1xf32>
    %51 = vector.broadcast %50 : vector<8x1xf32> to vector<8x8xf32>
    %52 = arith.mulf %47, %51 : vector<8x8xf32>
    %cst_25 = arith.constant dense<0.000000e+00> : vector<8x8xf32>
    %53 = tpu.matmul %52, %40, %cst_25 {dimension_numbers = #tpu.dot_dimension_numbers<[1], [0], [0], [1], [0, 0, 1, 1], [], []>} : vector<8x8xf32>, vector<8x8xf32>, vector<8x8xf32> -> vector<8x8xf32>
    %54 = vector.extract_strided_slice %35 {offsets = [0, 8], sizes = [8, 8], strides = [1, 1]} : vector<8x32xf32> to vector<8x8xf32>
    %55 = vector.extract_strided_slice %36 {offsets = [0, 8], sizes = [8, 8], strides = [1, 1]} : vector<8x32xf32> to vector<8x8xf32>
    %56 = vector.extract_strided_slice %37 {offsets = [0, 8], sizes = [8, 8], strides = [1, 1]} : vector<8x32xf32> to vector<8x8xf32>
    %57 = tpu.transpose %55, [1, 0] : vector<8x8xf32> -> vector<8x8xf32>
    %cst_26 = arith.constant dense<0.000000e+00> : vector<8x8xf32>
    %58 = tpu.matmul %54, %57, %cst_26 {dimension_numbers = #tpu.dot_dimension_numbers<[1], [0], [0], [1], [0, 0, 1, 1], [], []>} : vector<8x8xf32>, vector<8x8xf32>, vector<8x8xf32> -> vector<8x8xf32>
    %cst_27 = arith.constant dense<0xFF800000> : vector<8xf32>
    %59 = vector.multi_reduction <maximumf>, %58, %cst_27 [1] : vector<8x8xf32> to vector<8xf32>
    %60 = vector.shape_cast %59 : vector<8xf32> to vector<8x1xf32>
    %61 = vector.broadcast %60 : vector<8x1xf32> to vector<8x8xf32>
    %62 = arith.subf %58, %61 : vector<8x8xf32>
    %63 = math.exp %62 : vector<8x8xf32>
    %cst_28 = arith.constant dense<0.000000e+00> : vector<8xf32>
    %64 = vector.multi_reduction <add>, %63, %cst_28 [1] : vector<8x8xf32> to vector<8xf32>
    %65 = vector.shape_cast %64 : vector<8xf32> to vector<8x1xf32>
    %66 = tpu.reciprocal %65 {approx = true} : vector<8x1xf32> -> vector<8x1xf32>
    %67 = vector.broadcast %66 : vector<8x1xf32> to vector<8x8xf32>
    %68 = arith.mulf %63, %67 : vector<8x8xf32>
    %cst_29 = arith.constant dense<0.000000e+00> : vector<8x8xf32>
    %69 = tpu.matmul %68, %56, %cst_29 {dimension_numbers = #tpu.dot_dimension_numbers<[1], [0], [0], [1], [0, 0, 1, 1], [], []>} : vector<8x8xf32>, vector<8x8xf32>, vector<8x8xf32> -> vector<8x8xf32>
    %70 = vector.extract_strided_slice %35 {offsets = [0, 16], sizes = [8, 8], strides = [1, 1]} : vector<8x32xf32> to vector<8x8xf32>
    %71 = vector.extract_strided_slice %36 {offsets = [0, 16], sizes = [8, 8], strides = [1, 1]} : vector<8x32xf32> to vector<8x8xf32>
    %72 = vector.extract_strided_slice %37 {offsets = [0, 16], sizes = [8, 8], strides = [1, 1]} : vector<8x32xf32> to vector<8x8xf32>
    %73 = tpu.transpose %71, [1, 0] : vector<8x8xf32> -> vector<8x8xf32>
    %cst_30 = arith.constant dense<0.000000e+00> : vector<8x8xf32>
    %74 = tpu.matmul %70, %73, %cst_30 {dimension_numbers = #tpu.dot_dimension_numbers<[1], [0], [0], [1], [0, 0, 1, 1], [], []>} : vector<8x8xf32>, vector<8x8xf32>, vector<8x8xf32> -> vector<8x8xf32>
    %cst_31 = arith.constant dense<0xFF800000> : vector<8xf32>
    %75 = vector.multi_reduction <maximumf>, %74, %cst_31 [1] : vector<8x8xf32> to vector<8xf32>
    %76 = vector.shape_cast %75 : vector<8xf32> to vector<8x1xf32>
    %77 = vector.broadcast %76 : vector<8x1xf32> to vector<8x8xf32>
    %78 = arith.subf %74, %77 : vector<8x8xf32>
    %79 = math.exp %78 : vector<8x8xf32>
    %cst_32 = arith.constant dense<0.000000e+00> : vector<8xf32>
    %80 = vector.multi_reduction <add>, %79, %cst_32 [1] : vector<8x8xf32> to vector<8xf32>
    %81 = vector.shape_cast %80 : vector<8xf32> to vector<8x1xf32>
    %82 = tpu.reciprocal %81 {approx = true} : vector<8x1xf32> -> vector<8x1xf32>
    %83 = vector.broadcast %82 : vector<8x1xf32> to vector<8x8xf32>
    %84 = arith.mulf %79, %83 : vector<8x8xf32>
    %cst_33 = arith.constant dense<0.000000e+00> : vector<8x8xf32>
    %85 = tpu.matmul %84, %72, %cst_33 {dimension_numbers = #tpu.dot_dimension_numbers<[1], [0], [0], [1], [0, 0, 1, 1], [], []>} : vector<8x8xf32>, vector<8x8xf32>, vector<8x8xf32> -> vector<8x8xf32>
    %86 = vector.extract_strided_slice %35 {offsets = [0, 24], sizes = [8, 8], strides = [1, 1]} : vector<8x32xf32> to vector<8x8xf32>
    %87 = vector.extract_strided_slice %36 {offsets = [0, 24], sizes = [8, 8], strides = [1, 1]} : vector<8x32xf32> to vector<8x8xf32>
    %88 = vector.extract_strided_slice %37 {offsets = [0, 24], sizes = [8, 8], strides = [1, 1]} : vector<8x32xf32> to vector<8x8xf32>
    %89 = tpu.transpose %87, [1, 0] : vector<8x8xf32> -> vector<8x8xf32>
    %cst_34 = arith.constant dense<0.000000e+00> : vector<8x8xf32>
    %90 = tpu.matmul %86, %89, %cst_34 {dimension_numbers = #tpu.dot_dimension_numbers<[1], [0], [0], [1], [0, 0, 1, 1], [], []>} : vector<8x8xf32>, vector<8x8xf32>, vector<8x8xf32> -> vector<8x8xf32>
    %cst_35 = arith.constant dense<0xFF800000> : vector<8xf32>
    %91 = vector.multi_reduction <maximumf>, %90, %cst_35 [1] : vector<8x8xf32> to vector<8xf32>
    %92 = vector.shape_cast %91 : vector<8xf32> to vector<8x1xf32>
    %93 = vector.broadcast %92 : vector<8x1xf32> to vector<8x8xf32>
    %94 = arith.subf %90, %93 : vector<8x8xf32>
    %95 = math.exp %94 : vector<8x8xf32>
    %cst_36 = arith.constant dense<0.000000e+00> : vector<8xf32>
    %96 = vector.multi_reduction <add>, %95, %cst_36 [1] : vector<8x8xf32> to vector<8xf32>
    %97 = vector.shape_cast %96 : vector<8xf32> to vector<8x1xf32>
    %98 = tpu.reciprocal %97 {approx = true} : vector<8x1xf32> -> vector<8x1xf32>
    %99 = vector.broadcast %98 : vector<8x1xf32> to vector<8x8xf32>
    %100 = arith.mulf %95, %99 : vector<8x8xf32>
    %cst_37 = arith.constant dense<0.000000e+00> : vector<8x8xf32>
    %101 = tpu.matmul %100, %88, %cst_37 {dimension_numbers = #tpu.dot_dimension_numbers<[1], [0], [0], [1], [0, 0, 1, 1], [], []>} : vector<8x8xf32>, vector<8x8xf32>, vector<8x8xf32> -> vector<8x8xf32>
    %102 = tpu.concatenate %53, %69, %85, %101 in 1 : vector<8x8xf32>, vector<8x8xf32>, vector<8x8xf32>, vector<8x8xf32> -> vector<8x32xf32>
    %103 = vector.extract_strided_slice %32 {offsets = [8, 0], sizes = [8, 32], strides = [1, 1]} : vector<16x32xf32> to vector<8x32xf32>
    %104 = vector.extract_strided_slice %33 {offsets = [8, 0], sizes = [8, 32], strides = [1, 1]} : vector<16x32xf32> to vector<8x32xf32>
    %105 = vector.extract_strided_slice %34 {offsets = [8, 0], sizes = [8, 32], strides = [1, 1]} : vector<16x32xf32> to vector<8x32xf32>
    %106 = vector.extract_strided_slice %103 {offsets = [0, 0], sizes = [8, 8], strides = [1, 1]} : vector<8x32xf32> to vector<8x8xf32>
    %107 = vector.extract_strided_slice %104 {offsets = [0, 0], sizes = [8, 8], strides = [1, 1]} : vector<8x32xf32> to vector<8x8xf32>
    %108 = vector.extract_strided_slice %105 {offsets = [0, 0], sizes = [8, 8], strides = [1, 1]} : vector<8x32xf32> to vector<8x8xf32>
    %109 = tpu.transpose %107, [1, 0] : vector<8x8xf32> -> vector<8x8xf32>
    %cst_38 = arith.constant dense<0.000000e+00> : vector<8x8xf32>
    %110 = tpu.matmul %106, %109, %cst_38 {dimension_numbers = #tpu.dot_dimension_numbers<[1], [0], [0], [1], [0, 0, 1, 1], [], []>} : vector<8x8xf32>, vector<8x8xf32>, vector<8x8xf32> -> vector<8x8xf32>
    %cst_39 = arith.constant dense<0xFF800000> : vector<8xf32>
    %111 = vector.multi_reduction <maximumf>, %110, %cst_39 [1] : vector<8x8xf32> to vector<8xf32>
    %112 = vector.shape_cast %111 : vector<8xf32> to vector<8x1xf32>
    %113 = vector.broadcast %112 : vector<8x1xf32> to vector<8x8xf32>
    %114 = arith.subf %110, %113 : vector<8x8xf32>
    %115 = math.exp %114 : vector<8x8xf32>
    %cst_40 = arith.constant dense<0.000000e+00> : vector<8xf32>
    %116 = vector.multi_reduction <add>, %115, %cst_40 [1] : vector<8x8xf32> to vector<8xf32>
    %117 = vector.shape_cast %116 : vector<8xf32> to vector<8x1xf32>
    %118 = tpu.reciprocal %117 {approx = true} : vector<8x1xf32> -> vector<8x1xf32>
    %119 = vector.broadcast %118 : vector<8x1xf32> to vector<8x8xf32>
    %120 = arith.mulf %115, %119 : vector<8x8xf32>
    %cst_41 = arith.constant dense<0.000000e+00> : vector<8x8xf32>
    %121 = tpu.matmul %120, %108, %cst_41 {dimension_numbers = #tpu.dot_dimension_numbers<[1], [0], [0], [1], [0, 0, 1, 1], [], []>} : vector<8x8xf32>, vector<8x8xf32>, vector<8x8xf32> -> vector<8x8xf32>
    %122 = vector.extract_strided_slice %103 {offsets = [0, 8], sizes = [8, 8], strides = [1, 1]} : vector<8x32xf32> to vector<8x8xf32>
    %123 = vector.extract_strided_slice %104 {offsets = [0, 8], sizes = [8, 8], strides = [1, 1]} : vector<8x32xf32> to vector<8x8xf32>
    %124 = vector.extract_strided_slice %105 {offsets = [0, 8], sizes = [8, 8], strides = [1, 1]} : vector<8x32xf32> to vector<8x8xf32>
    %125 = tpu.transpose %123, [1, 0] : vector<8x8xf32> -> vector<8x8xf32>
    %cst_42 = arith.constant dense<0.000000e+00> : vector<8x8xf32>
    %126 = tpu.matmul %122, %125, %cst_42 {dimension_numbers = #tpu.dot_dimension_numbers<[1], [0], [0], [1], [0, 0, 1, 1], [], []>} : vector<8x8xf32>, vector<8x8xf32>, vector<8x8xf32> -> vector<8x8xf32>
    %cst_43 = arith.constant dense<0xFF800000> : vector<8xf32>
    %127 = vector.multi_reduction <maximumf>, %126, %cst_43 [1] : vector<8x8xf32> to vector<8xf32>
    %128 = vector.shape_cast %127 : vector<8xf32> to vector<8x1xf32>
    %129 = vector.broadcast %128 : vector<8x1xf32> to vector<8x8xf32>
    %130 = arith.subf %126, %129 : vector<8x8xf32>
    %131 = math.exp %130 : vector<8x8xf32>
    %cst_44 = arith.constant dense<0.000000e+00> : vector<8xf32>
    %132 = vector.multi_reduction <add>, %131, %cst_44 [1] : vector<8x8xf32> to vector<8xf32>
    %133 = vector.shape_cast %132 : vector<8xf32> to vector<8x1xf32>
    %134 = tpu.reciprocal %133 {approx = true} : vector<8x1xf32> -> vector<8x1xf32>
    %135 = vector.broadcast %134 : vector<8x1xf32> to vector<8x8xf32>
    %136 = arith.mulf %131, %135 : vector<8x8xf32>
    %cst_45 = arith.constant dense<0.000000e+00> : vector<8x8xf32>
    %137 = tpu.matmul %136, %124, %cst_45 {dimension_numbers = #tpu.dot_dimension_numbers<[1], [0], [0], [1], [0, 0, 1, 1], [], []>} : vector<8x8xf32>, vector<8x8xf32>, vector<8x8xf32> -> vector<8x8xf32>
    %138 = vector.extract_strided_slice %103 {offsets = [0, 16], sizes = [8, 8], strides = [1, 1]} : vector<8x32xf32> to vector<8x8xf32>
    %139 = vector.extract_strided_slice %104 {offsets = [0, 16], sizes = [8, 8], strides = [1, 1]} : vector<8x32xf32> to vector<8x8xf32>
    %140 = vector.extract_strided_slice %105 {offsets = [0, 16], sizes = [8, 8], strides = [1, 1]} : vector<8x32xf32> to vector<8x8xf32>
    %141 = tpu.transpose %139, [1, 0] : vector<8x8xf32> -> vector<8x8xf32>
    %cst_46 = arith.constant dense<0.000000e+00> : vector<8x8xf32>
    %142 = tpu.matmul %138, %141, %cst_46 {dimension_numbers = #tpu.dot_dimension_numbers<[1], [0], [0], [1], [0, 0, 1, 1], [], []>} : vector<8x8xf32>, vector<8x8xf32>, vector<8x8xf32> -> vector<8x8xf32>
    %cst_47 = arith.constant dense<0xFF800000> : vector<8xf32>
    %143 = vector.multi_reduction <maximumf>, %142, %cst_47 [1] : vector<8x8xf32> to vector<8xf32>
    %144 = vector.shape_cast %143 : vector<8xf32> to vector<8x1xf32>
    %145 = vector.broadcast %144 : vector<8x1xf32> to vector<8x8xf32>
    %146 = arith.subf %142, %145 : vector<8x8xf32>
    %147 = math.exp %146 : vector<8x8xf32>
    %cst_48 = arith.constant dense<0.000000e+00> : vector<8xf32>
    %148 = vector.multi_reduction <add>, %147, %cst_48 [1] : vector<8x8xf32> to vector<8xf32>
    %149 = vector.shape_cast %148 : vector<8xf32> to vector<8x1xf32>
    %150 = tpu.reciprocal %149 {approx = true} : vector<8x1xf32> -> vector<8x1xf32>
    %151 = vector.broadcast %150 : vector<8x1xf32> to vector<8x8xf32>
    %152 = arith.mulf %147, %151 : vector<8x8xf32>
    %cst_49 = arith.constant dense<0.000000e+00> : vector<8x8xf32>
    %153 = tpu.matmul %152, %140, %cst_49 {dimension_numbers = #tpu.dot_dimension_numbers<[1], [0], [0], [1], [0, 0, 1, 1], [], []>} : vector<8x8xf32>, vector<8x8xf32>, vector<8x8xf32> -> vector<8x8xf32>
    %154 = vector.extract_strided_slice %103 {offsets = [0, 24], sizes = [8, 8], strides = [1, 1]} : vector<8x32xf32> to vector<8x8xf32>
    %155 = vector.extract_strided_slice %104 {offsets = [0, 24], sizes = [8, 8], strides = [1, 1]} : vector<8x32xf32> to vector<8x8xf32>
    %156 = vector.extract_strided_slice %105 {offsets = [0, 24], sizes = [8, 8], strides = [1, 1]} : vector<8x32xf32> to vector<8x8xf32>
    %157 = tpu.transpose %155, [1, 0] : vector<8x8xf32> -> vector<8x8xf32>
    %cst_50 = arith.constant dense<0.000000e+00> : vector<8x8xf32>
    %158 = tpu.matmul %154, %157, %cst_50 {dimension_numbers = #tpu.dot_dimension_numbers<[1], [0], [0], [1], [0, 0, 1, 1], [], []>} : vector<8x8xf32>, vector<8x8xf32>, vector<8x8xf32> -> vector<8x8xf32>
    %cst_51 = arith.constant dense<0xFF800000> : vector<8xf32>
    %159 = vector.multi_reduction <maximumf>, %158, %cst_51 [1] : vector<8x8xf32> to vector<8xf32>
    %160 = vector.shape_cast %159 : vector<8xf32> to vector<8x1xf32>
    %161 = vector.broadcast %160 : vector<8x1xf32> to vector<8x8xf32>
    %162 = arith.subf %158, %161 : vector<8x8xf32>
    %163 = math.exp %162 : vector<8x8xf32>
    %cst_52 = arith.constant dense<0.000000e+00> : vector<8xf32>
    %164 = vector.multi_reduction <add>, %163, %cst_52 [1] : vector<8x8xf32> to vector<8xf32>
    %165 = vector.shape_cast %164 : vector<8xf32> to vector<8x1xf32>
    %166 = tpu.reciprocal %165 {approx = true} : vector<8x1xf32> -> vector<8x1xf32>
    %167 = vector.broadcast %166 : vector<8x1xf32> to vector<8x8xf32>
    %168 = arith.mulf %163, %167 : vector<8x8xf32>
    %cst_53 = arith.constant dense<0.000000e+00> : vector<8x8xf32>
    %169 = tpu.matmul %168, %156, %cst_53 {dimension_numbers = #tpu.dot_dimension_numbers<[1], [0], [0], [1], [0, 0, 1, 1], [], []>} : vector<8x8xf32>, vector<8x8xf32>, vector<8x8xf32> -> vector<8x8xf32>
    %170 = tpu.concatenate %121, %137, %153, %169 in 1 : vector<8x8xf32>, vector<8x8xf32>, vector<8x8xf32>, vector<8x8xf32> -> vector<8x32xf32>
    %171 = tpu.concatenate %102, %170 in 0 : vector<8x32xf32>, vector<8x32xf32> -> vector<16x32xf32>
    %c0_54 = arith.constant 0 : index
    %c0_55 = arith.constant 0 : index
    %172 = vector.load %arg8[%c0_54, %c0_55] : memref<32x32xf32, #tpu.memory_space<vmem>>, vector<32x32xf32>
    %cst_56 = arith.constant dense<0.000000e+00> : vector<16x32xf32>
    %173 = tpu.matmul %171, %172, %cst_56 {dimension_numbers = #tpu.dot_dimension_numbers<[1], [0], [0], [1], [0, 0, 1, 1], [], []>} : vector<16x32xf32>, vector<32x32xf32>, vector<16x32xf32> -> vector<16x32xf32>
    %174 = vector.broadcast %6 : vector<1x32xf32> to vector<16x32xf32>
    %175 = arith.addf %173, %174 : vector<16x32xf32>
    %176 = arith.addf %0, %175 : vector<16x32xf32>
    %cst_57 = arith.constant dense<0.000000e+00> : vector<16xf32>
    %177 = vector.multi_reduction <add>, %176, %cst_57 [1] : vector<16x32xf32> to vector<16xf32>
    %178 = vector.shape_cast %177 : vector<16xf32> to vector<16x1xf32>
    %cst_58 = arith.constant 3.200000e+01 : f32
    %179 = vector.broadcast %cst_58 : f32 to vector<16x1xf32>
    %180 = arith.divf %178, %179 : vector<16x1xf32>
    %181 = vector.broadcast %180 : vector<16x1xf32> to vector<16x32xf32>
    %182 = arith.subf %176, %181 : vector<16x32xf32>
    %183 = arith.mulf %182, %182 : vector<16x32xf32>
    %cst_59 = arith.constant dense<0.000000e+00> : vector<16xf32>
    %184 = vector.multi_reduction <add>, %183, %cst_59 [1] : vector<16x32xf32> to vector<16xf32>
    %185 = vector.shape_cast %184 : vector<16xf32> to vector<16x1xf32>
    %cst_60 = arith.constant 3.200000e+01 : f32
    %186 = vector.broadcast %cst_60 : f32 to vector<16x1xf32>
    %187 = arith.divf %185, %186 : vector<16x1xf32>
    %cst_61 = arith.constant 9.99999974E-6 : f32
    %188 = vector.broadcast %cst_61 : f32 to vector<16x1xf32>
    %189 = arith.addf %187, %188 : vector<16x1xf32>
    %190 = math.rsqrt %189 : vector<16x1xf32>
    %191 = vector.broadcast %190 : vector<16x1xf32> to vector<16x32xf32>
    %192 = arith.mulf %182, %191 : vector<16x32xf32>
    %193 = vector.broadcast %3 : vector<1x32xf32> to vector<16x32xf32>
    %194 = arith.mulf %192, %193 : vector<16x32xf32>
    %195 = vector.broadcast %4 : vector<1x32xf32> to vector<16x32xf32>
    %196 = arith.addf %194, %195 : vector<16x32xf32>
    %c0_62 = arith.constant 0 : index
    %c0_63 = arith.constant 0 : index
    %197 = vector.load %arg10[%c0_62, %c0_63] : memref<32x32xf32, #tpu.memory_space<vmem>>, vector<32x32xf32>
    %cst_64 = arith.constant dense<0.000000e+00> : vector<16x32xf32>
    %198 = tpu.matmul %196, %197, %cst_64 {dimension_numbers = #tpu.dot_dimension_numbers<[1], [0], [0], [1], [0, 0, 1, 1], [], []>} : vector<16x32xf32>, vector<32x32xf32>, vector<16x32xf32> -> vector<16x32xf32>
    %199 = vector.broadcast %7 : vector<1x32xf32> to vector<16x32xf32>
    %200 = arith.addf %198, %199 : vector<16x32xf32>
    %201 = arith.addf %176, %200 : vector<16x32xf32>
    %c0_65 = arith.constant 0 : index
    %c0_66 = arith.constant 0 : index
    %202 = vector.load %arg12[%c0_65, %c0_66] : memref<16x32xf32, #tpu.memory_space<vmem>>, vector<16x32xf32>
    tpu.vector_store %arg12[%c0_65, %c0_66], %201 {strides = array<i32>} : memref<16x32xf32, #tpu.memory_space<vmem>>, vector<16x32xf32>,
    return
  }
  func.func @transform_0(%arg0: i32) -> (i32, i32) {
    %c0_i32 = arith.constant 0 : i32
    %c0_i32_0 = arith.constant 0 : i32
    return %arg0, %c0_i32 : i32, i32
  }
  func.func @transform_1(%arg0: i32) -> (i32, i32) {
    %c0_i32 = arith.constant 0 : i32
    %c0_i32_0 = arith.constant 0 : i32
    %c0_i32_1 = arith.constant 0 : i32
    return %c0_i32, %c0_i32_0 : i32, i32
  }
  func.func @transform_2(%arg0: i32) -> (i32, i32) {
    %c0_i32 = arith.constant 0 : i32
    %c0_i32_0 = arith.constant 0 : i32
    %c0_i32_1 = arith.constant 0 : i32
    return %c0_i32, %c0_i32_0 : i32, i32
  }
  func.func @transform_3(%arg0: i32) -> (i32, i32) {
    %c0_i32 = arith.constant 0 : i32
    %c0_i32_0 = arith.constant 0 : i32
    %c0_i32_1 = arith.constant 0 : i32
    return %c0_i32, %c0_i32_0 : i32, i32
  }
  func.func @transform_4(%arg0: i32) -> (i32, i32) {
    %c0_i32 = arith.constant 0 : i32
    %c0_i32_0 = arith.constant 0 : i32
    %c0_i32_1 = arith.constant 0 : i32
    return %c0_i32, %c0_i32_0 : i32, i32
  }
  func.func @transform_5(%arg0: i32) -> (i32, i32) {
    %c0_i32 = arith.constant 0 : i32
    %c0_i32_0 = arith.constant 0 : i32
    %c0_i32_1 = arith.constant 0 : i32
    return %c0_i32, %c0_i32_0 : i32, i32
  }
  func.func @transform_6(%arg0: i32) -> (i32, i32) {
    %c0_i32 = arith.constant 0 : i32
    %c0_i32_0 = arith.constant 0 : i32
    %c0_i32_1 = arith.constant 0 : i32
    return %c0_i32, %c0_i32_0 : i32, i32
  }
  func.func @transform_7(%arg0: i32) -> (i32, i32) {
    %c0_i32 = arith.constant 0 : i32
    %c0_i32_0 = arith.constant 0 : i32
    %c0_i32_1 = arith.constant 0 : i32
    return %c0_i32, %c0_i32_0 : i32, i32
  }
  func.func @transform_8(%arg0: i32) -> (i32, i32) {
    %c0_i32 = arith.constant 0 : i32
    %c0_i32_0 = arith.constant 0 : i32
    %c0_i32_1 = arith.constant 0 : i32
    return %c0_i32, %c0_i32_0 : i32, i32
  }
  func.func @transform_9(%arg0: i32) -> (i32, i32) {
    %c0_i32 = arith.constant 0 : i32
    %c0_i32_0 = arith.constant 0 : i32
    %c0_i32_1 = arith.constant 0 : i32
    return %c0_i32, %c0_i32_0 : i32, i32
  }
  func.func @transform_10(%arg0: i32) -> (i32, i32) {
    %c0_i32 = arith.constant 0 : i32
    %c0_i32_0 = arith.constant 0 : i32
    %c0_i32_1 = arith.constant 0 : i32
    return %c0_i32, %c0_i32_0 : i32, i32
  }
  func.func @transform_11(%arg0: i32) -> (i32, i32) {
    %c0_i32 = arith.constant 0 : i32
    %c0_i32_0 = arith.constant 0 : i32
    return %arg0, %c0_i32 : i32, i32
  }
}

</mosaic_0001>

<bundles_post_ra>
// kernel: tpu_custom_call.1
= control target key start
LH: loop header
LB: loop body
LE: loop exit
PB: predicated region body
PF: predicated region fallthrough
CT: control target
= control target key end

     0   :  { %16 = vsyncpa [#allocation3], 0  ;;  %s3847_s0 = inlined_call_operand.hbm [shape: f32[16,32], index: 0, kind: input, shape index: {}]   ;;  %s3848_s1 = inlined_call_operand.vmem [shape: f32[1,32], index: 1, kind: input, shape index: {}]   ;;  %s3849_s2 = inlined_call_operand.vmem [shape: f32[1,32], index: 2, kind: input, shape index: {}]   ;;  %s3850_s3 = inlined_call_operand.vmem [shape: f32[1,32], index: 3, kind: input, shape index: {}]   ;;  %s3851_s4 = inlined_call_operand.vmem [shape: f32[1,32], index: 4, kind: input, shape index: {}]   ;;  %s3852_s5 = inlined_call_operand.hbm [shape: f32[32,96], index: 5, kind: input, shape index: {}]   ;;  %s3853_s6 = inlined_call_operand.vmem [shape: f32[1,96], index: 6, kind: input, shape index: {}]   ;;  %s3854_s7 = inlined_call_operand.hbm [shape: f32[32,32], index: 7, kind: input, shape index: {}]   ;;  %s3855_s8 = inlined_call_operand.vmem [shape: f32[1,32], index: 8, kind: input, shape index: {}]   ;;  %s3856_s9 = inlined_call_operand.hbm [shape: f32[32,32], index: 9, kind: input, shape index: {}]   ;;  %s3857_s10 = inlined_call_operand.vmem [shape: f32[1,32], index: 10, kind: input, shape index: {}]   ;;  %s3858_s11 = inlined_call_operand.hbm [shape: f32[16,32], index: 11, kind: output, shape index: {}]  }
   0x1   :  { %17 = vsyncpa [#allocation6], 0 }
   0x2   :  { %18 = vsyncpa [#allocation9], 0 }
   0x3   :  { %19 = vsyncpa [#allocation4], 0  ;;  %s3340_s17 = smov [#allocation5]   ;;  %s3341_s19 = smov [#allocation2]  }
   0x4   :  { %s45_s18 = sshll.u32 %s3340_s17, 4  ;;  %s25_s20 = sshll.u32 %s3341_s19, 4  ;;  %s46_s18 = int_to_ptr.vmem [resolvable:$true] %s45_s18  ;;  %s26_s20 = int_to_ptr.vmem [resolvable:$true] %s25_s20 }
   0x5   :  { %s3240_s21 = scalar_lea.vmem %s46_s18, 512  ;;  %p3245_p1 = scmp.lt.s32.totalorder %s46_s18, %s46_s18 }
   0x6   :  { %p3241_p0 = scmp.ne.s32.totalorder %s46_s18, %s3240_s21  ;;  %p3246_p2 = scmp.lt.s32.totalorder %s3240_s21, %s3240_s21 }
   0x8   :  { %p3247_p3 = por %p3246_p2, %p3245_p1 }
   0xa   :  { %p3248_p4 = pnand %p3247_p3, %p3241_p0 }
   0xc   :  { %3251 = shalt.err (!%p3248_p4)
}
   0xd   :  { %s3342_s22 = smov 128   ;;  %s3343_s23 = smov 8  }
   0xe   :  { %51 = dma.hbm_to_vmem [thread:$0]  %s3852_s5, 512, %s46_s18, [#allocation6], %s3342_s22, %s3342_s22, %s3343_s23  }
   0xf   :  { %s3260_s26 = scalar_lea.vmem %s26_s20, 256  ;;  %p3265_p6 = scmp.lt.s32.totalorder %s26_s20, %s26_s20 }
  0x10   :  { %p3261_p5 = scmp.ne.s32.totalorder %s26_s20, %s3260_s26  ;;  %p3266_p7 = scmp.lt.s32.totalorder %s3260_s26, %s3260_s26 }
  0x12   :  { %p3267_p8 = por %p3266_p7, %p3265_p6 }
  0x14   :  { %p3268_p9 = pnand %p3267_p8, %p3261_p5 }
  0x16   :  { %3271 = shalt.err (!%p3268_p9)
}
  0x17   :  { %31 = dma.hbm_to_vmem [thread:$0]  %s3847_s0, 256, %s26_s20, [#allocation3], %s3342_s22, %s3342_s22, %s3343_s23  }
  0x18   :  { %s3344_s29 = smov [#allocation7]   ;;  %s3345_s12 = smov [#allocation8]  }
  0x19   :  { %s59_s30 = sshll.u32 %s3344_s29, 4  ;;  %s73_s13 = sshll.u32 %s3345_s12, 4  ;;  %s60_s30 = int_to_ptr.vmem [resolvable:$true] %s59_s30  ;;  %s74_s13 = int_to_ptr.vmem [resolvable:$true] %s73_s13 }
  0x1a   :  { %s3280_s5 = scalar_lea.vmem %s60_s30, 512  ;;  %p3285_p11 = scmp.lt.s32.totalorder %s60_s30, %s60_s30 }
  0x1b   :  { %p3281_p10 = scmp.ne.s32.totalorder %s60_s30, %s3280_s5  ;;  %p3286_p12 = scmp.lt.s32.totalorder %s3280_s5, %s3280_s5 }
  0x1d   :  { %p3287_p13 = por %p3286_p12, %p3285_p11 }
  0x1f   :  { %p3288_p0 = pnand %p3287_p13, %p3281_p10 }
  0x21   :  { %3291 = shalt.err (!%p3288_p0)
}
  0x22   :  { %65 = dma.hbm_to_vmem [thread:$0]  %s3854_s7, 512, %s60_s30, [#allocation6], %s3342_s22, %s3342_s22, %s3343_s23  }
  0x23   :  { %s3300_s0 = scalar_lea.vmem %s74_s13, 512  ;;  %p3305_p2 = scmp.lt.s32.totalorder %s74_s13, %s74_s13 }
  0x24   :  { %p3301_p1 = scmp.ne.s32.totalorder %s74_s13, %s3300_s0  ;;  %p3306_p3 = scmp.lt.s32.totalorder %s3300_s0, %s3300_s0 }
  0x26   :  { %p3307_p4 = por %p3306_p3, %p3305_p2 }
  0x28   :  { %p3308_p5 = pnand %p3307_p4, %p3301_p1 }
  0x2a   :  { %3311 = shalt.err (!%p3308_p5)
}
  0x2b   :  { %79 = dma.hbm_to_vmem [thread:$0]  %s3856_s9, 512, %s74_s13, [#allocation9], %s3342_s22, %s3342_s22, %s3343_s23  }
  0x2c   :  { %3332 = dma.done.wait [#allocation3], 256  }
  0x2d   :  { %3333 = vsyncadd [#allocation3], 4294967040 }
  0x2e   :  { %3334 = dma.done.wait [#allocation6], 1024  }
  0x2f   :  { %3335 = vsyncadd [#allocation6], 4294966272 }
  0x30   :  { %3336 = dma.done.wait [#allocation9], 512  }
  0x31   :  { %3337 = vsyncadd [#allocation9], 4294966784  ;;  %vm103_vm0 = vcmask 261120   ;;  %v94_v0 = vld [vmem:[#allocation2] sm:$0xff]  ;;  %v95_v1 = vld [vmem:[#allocation2 + $0x8] sm:$0xff]  ;;  %s3348_s24 = smov 104   ;;  %v253_v45 = vlaneseq }
  0x32   :  { %v104_v2 = vsel %vm103_vm0, %v94_v0, 0.0  ;;  %v107_v3 = vsel %vm103_vm0, %v95_v1, 0.0  ;;  %v150_v14 = vld [vmem:[#allocation5 + $0x18] sm:$0xff]  ;;  %v149_v15 = vld [vmem:[#allocation5 + $0x10] sm:$0xff]  ;;  %v148_v16 = vld [vmem:[#allocation5 + $0x8] sm:$0xff]  ;;  %s3349_s25 = smov 96  }
  0x33   :  { %105 = vadd.xlane.f32.xlu0 %v104_v2  ;;  %3059 = vmatprep.subr.mxu0 %v150_v14  ;;  %v147_v17 = vld [vmem:[#allocation5] sm:$0xff]  ;;  %v2956_v25 = vld [vmem:[%s3848_s1] ss:$0 sm:$0xff]  ;;  %s3346_s1 = smov 112   ;;  %v3350_v41 = vmov 0.0   ;;  %vm3351_vm1 = vmmov 0  }
  0x34   :  { %3060 = vmatpush3.msra.mxu0 %v150_v14  ;;  %v2957_v27 = vld [vmem:[%s3849_s2] ss:$0 sm:$0xff]  ;;  %s3347_s2 = smov 120   ;;  %3070 = vmatprep.subr.mxu1 %v3350_v41  ;;  %v3352_v43 = vmov 1983009808   ;;  %v254_v47 = vshrl.u32 %v253_v45, 7 }
  0x35   :  { %3061 = vmatprep.subr.mxu0 %v149_v15  ;;  %v2958_v34 = vld [vmem:[%s3853_s6] ss:$0 sm:$0xff]  ;;  %3072 = vmatprep.mubr.msk.f32.mxu1 %vm3351_vm1, %v3350_v41  ;;  %v251_v44 = vunpack.c.l.s4 %v3352_v43  ;;  %v3353_v48 = vmov 1934713408   ;;  %vm680_vm2 = vcmask 64512   ;;  %s3354_s6 = smov 64  }
  0x36   :  { %3062 = vmatpush3.msra.mxu0 %v149_v15  ;;  %v283_v49 = vunpack.c.l.s4 %v3353_v48  ;;  %s3355_s26 = smov 16   ;;  %s3356_s27 = smov 24   ;;  %vm1470_vm3 = vcmask 130048   ;;  %vm1472_vm4 = vcmask 195584  }
  0x37   :  { %108 = vadd.xlane.f32.xlu0 %v107_v3  ;;  %3063 = vmatprep.subr.mxu0 %v148_v16  ;;  %v252_v46 = vunpack.c.0.s8 %v251_v44 }
  0x38   :  { %3064 = vmatpush3.msra.mxu0 %v148_v16  ;;  %v284_v55 = vunpack.c.0.s8 %v283_v49 }
  0x39   :  { %3065 = vmatprep.subr.mxu0 %v147_v17  ;;  %v3491_v52 = vsub.s32 %v252_v46, %v254_v47 }
  0x3a   :  { %3066 = vmatpush3.msra.mxu0 %v147_v17  ;;  %v3501_v61 = vsub.s32 %v284_v55, %v254_v47 }
  0x3b   :  { %3080 = vmatprep.subr.mxu0 %v3350_v41 }
  0xbc   :  { %v106_v4 = vpop.xlane.xlu0 %105 }
  0xbd   :  { %v111_v5 = vmul.f32 0.03125, %v106_v4 }
  0xbf   :  { %v113_v6 = vsub.f32 %v94_v0, %v111_v5 }
  0xc0   :  { %v109_v7 = vpop.xlane.xlu0 %108 }
  0xc1   :  { %v112_v8 = vmul.f32 0.03125, %v109_v7  ;;  %v115_v9 = vmul.f32 %v113_v6, %v113_v6 }
  0xc3   :  { %v114_v10 = vsub.f32 %v95_v1, %v112_v8  ;;  %v117_v11 = vsel %vm103_vm0, %v115_v9, 0.0 }
  0xc4   :  { %118 = vadd.xlane.f32.xlu1 %v117_v11 }
  0xc5   :  { %v116_v12 = vmul.f32 %v114_v10, %v114_v10 }
  0xc7   :  { %v120_v13 = vsel %vm103_vm0, %v116_v12, 0.0 }
  0xc8   :  { %121 = vadd.xlane.f32.xlu1 %v120_v13 }
 0x14d   :  { %v119_v18 = vpop.xlane.xlu1 %118 }
 0x14e   :  { %v123_v19 = vmul.f32 0.03125, %v119_v18 }
 0x150   :  { %v125_v20 = vadd.f32 1e-05, %v123_v19 }
 0x151   :  { %v122_v21 = vpop.xlane.xlu1 %121 }
 0x152   :  { %3190 = vrsqrt.f32 %v125_v20  ;;  %v124_v22 = vmul.f32 0.03125, %v122_v21 }
 0x154   :  { %v126_v23 = vadd.f32 1e-05, %v124_v22 }
 0x156   :  { %3192 = vrsqrt.f32 %v126_v23 }
 0x15f   :  { %v3191_v24 = vpop.eup %3190 }
 0x160   :  { %v129_v26 = vmul.f32 %v3191_v24, %v113_v6 }
 0x162   :  { %v137_v28 = vmul.f32 %v2956_v25, %v129_v26 }
 0x163   :  { %v3193_v29 = vpop.eup %3192 }
 0x164   :  { %v130_v30 = vmul.f32 %v3193_v29, %v114_v10  ;;  %v145_v31 = vadd.f32 %v2957_v27, %v137_v28 }
 0x166   :  { %v138_v32 = vmul.f32 %v2956_v25, %v130_v30  ;;  %3067 = vmatprep.mubr.msk.f32.mxu0 %vm103_vm0, %v145_v31 }
 0x168   :  { %v146_v33 = vadd.f32 %v2957_v27, %v138_v32 }
 0x16a   :  { %3068 = vmatmul.mubr.msk.f32.vlgmr.msra.gmra.mxu0 %vm103_vm0, %v146_v33 }
 0x16b   :  { %3082 = vmatprep.mubr.msk.f32.mxu0 %vm3351_vm1, %v3350_v41 }
 0x22a   :  { %v3069_v35 = vpop.f32.mrf.mxu0 }
 0x22b   :  { %v3457_v36 = vadd.f32 %v3069_v35, %v2958_v34 }
 0x22c   :  { %v229_v37 = vpop.f32.mrf.mxu0 }
 0x22d   :  { %v3459_v38 = vadd.f32 %v2958_v34, %v229_v37 }
 0x22f   :  { %242 = vrot.lane.b32.xlu1 %v3459_v38, %s3346_s1  ;;  %239 = vrot.lane.b32.xlu0 %v3459_v38, %s3347_s2 }
 0x233   :  { %245 = vrot.lane.b32.xlu1 %v3459_v38, %s3348_s24 }
 0x237   :  { %384 = vrot.lane.b32.xlu1 %v3459_v38, %s3349_s25 }
 0x2a1   :  { %v3469_v39 = vpop.permute.xlu1 %242  ;;  %v3471_v40 = vpop.permute.xlu0 %239 }
 0x2a2   :  { %388 = vrot.lane.b32.xlu1 %v3469_v39, %s3349_s25  ;;  %386 = vrot.lane.b32.xlu0 %v3471_v40, %s3349_s25  ;;  %v248_v53 = vcombine.low %v3459_v38, %v3469_v39  ;;  %v249_v54 = vcombine.high %v3459_v38, %v3469_v39 }
 0x2a4   :  { %v256_v59 = vrot.slane %v248_v53, %v3491_v52  ;;  %v263_v60 = vrot.slane %v249_v54, %v3491_v52 }
 0x2a5   :  { %v3479_v42 = vpop.permute.xlu1 %245 }
 0x2a6   :  { %390 = vrot.lane.b32.xlu0 %v3479_v42, %s3349_s25  ;;  %v264_v50 = vcombine.low %v3471_v40, %v3479_v42  ;;  %v265_v51 = vcombine.high %v3471_v40, %v3479_v42 }
 0x2a8   :  { %v272_v56 = vrot.slane %v264_v50, %v3491_v52  ;;  %v279_v57 = vrot.slane %v265_v51, %v3491_v52 }
 0x2a9   :  { %v385_v58 = vpop.permute.xlu1 %384 }
 0x2aa   :  { %v280_v62 = vcombine.low %v256_v59, %v272_v56  ;;  %v281_v63 = vcombine.high %v256_v59, %v272_v56  ;;  %v296_v0 = vcombine.low %v263_v60, %v279_v57  ;;  %v297_v1 = vcombine.high %v263_v60, %v279_v57 }
 0x2ac   :  { %v288_v6 = vrot.slane %v280_v62, %v3501_v61  ;;  %v295_v7 = vrot.slane %v281_v63, %v3501_v61  ;;  %v304_v8 = vrot.slane %v296_v0, %v3501_v61  ;;  %v311_v9 = vrot.slane %v297_v1, %v3501_v61 }
 0x2ae   :  { %v316_v17 = vcombine.low %v288_v6, %v295_v7  ;;  %v2961_v18 = vcombine.high %v288_v6, %v295_v7  ;;  %v332_v19 = vcombine.low %v304_v8, %v311_v9  ;;  %v2962_v20 = vcombine.high %v304_v8, %v311_v9 }
 0x2b0   :  { %v323_v29 = vrot.slane %v316_v17, %v3491_v52  ;;  %v331_v30 = vrot.slane %v2961_v18, %v3491_v52  ;;  %v339_v31 = vrot.slane %v332_v19, %v3491_v52  ;;  %v347_v32 = vrot.slane %v2962_v20, %v3491_v52 }
 0x2b2   :  { %v348_v47 = vcombine.low %v323_v29, %v331_v30  ;;  %v349_v48 = vcombine.high %v323_v29, %v331_v30  ;;  %v364_v49 = vcombine.low %v339_v31, %v347_v32  ;;  %v365_v50 = vcombine.high %v339_v31, %v347_v32 }
 0x2b4   :  { %v356_v60 = vrot.slane %v348_v47, %v3501_v61  ;;  %v372_v62 = vrot.slane %v364_v49, %v3501_v61  ;;  %v363_v63 = vrot.slane %v349_v48, %v3501_v61  ;;  %v379_v0 = vrot.slane %v365_v50, %v3501_v61 }
 0x2b6   :  { %v381_v6 = vcombine.high %v356_v60, %v372_v62  ;;  %v383_v8 = vcombine.high %v363_v63, %v379_v0 }
 0x314   :  { %v389_v2 = vpop.permute.xlu1 %388  ;;  %v387_v3 = vpop.permute.xlu0 %386 }
 0x315   :  { %v396_v4 = vcombine.low %v385_v58, %v389_v2  ;;  %v397_v5 = vcombine.high %v385_v58, %v389_v2 }
 0x317   :  { %v404_v13 = vrot.slane %v396_v4, %v3491_v52  ;;  %v411_v14 = vrot.slane %v397_v5, %v3491_v52  ;;  %v382_v4 = vcombine.low %v363_v63, %v379_v0 }
 0x318   :  { %v391_v10 = vpop.permute.xlu0 %390 }
 0x319   :  { %v412_v11 = vcombine.low %v387_v3, %v391_v10  ;;  %v413_v12 = vcombine.high %v387_v3, %v391_v10  ;;  %v380_v3 = vcombine.low %v356_v60, %v372_v62 }
 0x31b   :  { %v420_v15 = vrot.slane %v412_v11, %v3491_v52  ;;  %v427_v16 = vrot.slane %v413_v12, %v3491_v52 }
 0x31d   :  { %v428_v21 = vcombine.low %v404_v13, %v420_v15  ;;  %v429_v22 = vcombine.high %v404_v13, %v420_v15  ;;  %v444_v23 = vcombine.low %v411_v14, %v427_v16  ;;  %v445_v24 = vcombine.high %v411_v14, %v427_v16 }
 0x31f   :  { %v436_v25 = vrot.slane %v428_v21, %v3501_v61  ;;  %v443_v26 = vrot.slane %v429_v22, %v3501_v61  ;;  %v452_v27 = vrot.slane %v444_v23, %v3501_v61  ;;  %v459_v28 = vrot.slane %v445_v24, %v3501_v61 }
 0x321   :  { %v464_v33 = vcombine.low %v436_v25, %v443_v26  ;;  %v2963_v34 = vcombine.high %v436_v25, %v443_v26  ;;  %v480_v35 = vcombine.low %v452_v27, %v459_v28  ;;  %v2964_v37 = vcombine.high %v452_v27, %v459_v28 }
 0x323   :  { %v471_v43 = vrot.slane %v464_v33, %v3491_v52  ;;  %v479_v44 = vrot.slane %v2963_v34, %v3491_v52  ;;  %v487_v45 = vrot.slane %v480_v35, %v3491_v52  ;;  %v495_v46 = vrot.slane %v2964_v37, %v3491_v52 }
 0x325   :  { %v496_v51 = vcombine.low %v471_v43, %v479_v44  ;;  %v497_v53 = vcombine.high %v471_v43, %v479_v44  ;;  %v512_v54 = vcombine.low %v487_v45, %v495_v46  ;;  %v513_v55 = vcombine.high %v487_v45, %v495_v46 }
 0x327   :  { %v504_v56 = vrot.slane %v496_v51, %v3501_v61  ;;  %v520_v57 = vrot.slane %v512_v54, %v3501_v61  ;;  %v511_v58 = vrot.slane %v497_v53, %v3501_v61  ;;  %v527_v59 = vrot.slane %v513_v55, %v3501_v61 }
 0x329   :  { %v528_v1 = vcombine.low %v504_v56, %v520_v57  ;;  %v530_v2 = vcombine.low %v511_v58, %v527_v59  ;;  %v529_v5 = vcombine.high %v504_v56, %v520_v57  ;;  %v531_v7 = vcombine.high %v511_v58, %v527_v59 }
 0x32b   :  { %3071 = vmatpush3.xpose.msk.msra.mxu1 %vm680_vm2, %v528_v1  ;;  %3081 = vmatpush3.xpose.msk.msra.mxu0 %vm680_vm2, %v530_v2 }
 0x32c   :  { %3075 = vmatprep.subr.mxu1 %v3350_v41  ;;  %3090 = vmatprep.subr.mxu0 %v3350_v41 }
 0x32e   :  { %3073 = vmatmul.mubr.msk.f32.vlgmr.msra.gmra.mxu1 %vm680_vm2, %v380_v3  ;;  %3083 = vmatmul.mubr.msk.f32.vlgmr.msra.gmra.mxu0 %vm680_vm2, %v382_v4 }
 0x32f   :  { %3076 = vmatpush3.xpose.msk.msra.mxu1 %vm680_vm2, %v529_v5  ;;  %3077 = vmatprep.mubr.msk.f32.mxu1 %vm3351_vm1, %v3350_v41 }
 0x330   :  { %3085 = vmatprep.subr.mxu1 %v3350_v41  ;;  %3092 = vmatprep.mubr.msk.f32.mxu0 %vm3351_vm1, %v3350_v41 }
 0x332   :  { %3078 = vmatmul.mubr.msk.f32.vlgmr.msra.gmra.mxu1 %vm680_vm2, %v381_v6 }
 0x333   :  { %3086 = vmatpush3.xpose.msk.msra.mxu1 %vm680_vm2, %v531_v7  ;;  %3087 = vmatprep.mubr.msk.f32.mxu1 %vm3351_vm1, %v3350_v41 }
 0x334   :  { %3095 = vmatprep.subr.mxu1 %v3350_v41 }
 0x336   :  { %3088 = vmatmul.mubr.msk.f32.vlgmr.msra.gmra.mxu1 %vm680_vm2, %v383_v8 }
 0x337   :  { %3097 = vmatprep.mubr.msk.f32.mxu1 %vm3351_vm1, %v3350_v41 }
 0x3ee   :  { %v753_v9 = vpop.f32.mrf.mxu1  ;;  %v905_v10 = vpop.f32.mrf.mxu0 }
 0x3ef   :  { %v991_v11 = vsel %vm680_vm2, %v905_v10, -inf  ;;  %v985_v12 = vsel %vm680_vm2, %v753_v9, -inf }
 0x3f0   :  { %992 = vmax.xlane.f32.xlu0 %v991_v11  ;;  %v3084_v13 = vpop.f32.mrf.mxu0  ;;  %986 = vmax.xlane.f32.xlu1 %v985_v12  ;;  %v3074_v14 = vpop.f32.mrf.mxu1 }
 0x3f2   :  { %v829_v15 = vpop.f32.mrf.mxu1 }
 0x3f3   :  { %v988_v16 = vsel %vm680_vm2, %v829_v15, -inf }
 0x3f4   :  { %989 = vmax.xlane.f32.xlu0 %v988_v16  ;;  %v3079_v17 = vpop.f32.mrf.mxu1 }
 0x3f6   :  { %v981_v18 = vpop.f32.mrf.mxu1 }
 0x3f7   :  { %v994_v19 = vsel %vm680_vm2, %v981_v18, -inf }
 0x3f8   :  { %995 = vmax.xlane.f32.xlu0 %v994_v19  ;;  %v3089_v20 = vpop.f32.mrf.mxu1 }
 0x401   :  { %1475 = vrot.lane.b32.xlu1 %v3457_v36, %s3347_s2 }
 0x405   :  { %1481 = vrot.lane.b32.xlu1 %v3457_v36, %s3348_s24 }
 0x409   :  { %534 = vrot.lane.b32.xlu1 %v3471_v40, %s3354_s6 }
 0x40d   :  { %536 = vrot.lane.b32.xlu1 %v3469_v39, %s3354_s6 }
 0x40e   :  { %1478 = vrot.lane.b32.xlu0 %v3457_v36, %s3346_s1 }
 0x411   :  { %538 = vrot.lane.b32.xlu1 %v3479_v42, %s3354_s6 }
 0x412   :  { %532 = vrot.lane.b32.xlu0 %v3459_v38, %s3354_s6 }
 0x416   :  { %1620 = vrot.lane.b32.xlu0 %v3457_v36, %s3349_s25 }
 0x479   :  { %v993_v21 = vpop.xlane.xlu0 %992  ;;  %v987_v22 = vpop.xlane.xlu1 %986 }
 0x47a   :  { %v999_v23 = vsub.f32 %v905_v10, %v993_v21  ;;  %v997_v29 = vsub.f32 %v753_v9, %v987_v22 }
 0x47c   :  { %v1005_v24 = vmul.f32 1.442695, %v999_v23  ;;  %v1001_v33 = vmul.f32 1.442695, %v997_v29 }
 0x47d   :  { %v3571_v40 = vpop.permute.xlu1 %1475  ;;  %v990_v25 = vpop.xlane.xlu0 %989 }
 0x47e   :  { %3194 = vpow2.f32 %v1005_v24  ;;  %v998_v39 = vsub.f32 %v829_v15, %v990_v25  ;;  %1622 = vrot.lane.b32.xlu1 %v3571_v40, %s3349_s25 }
 0x480   :  { %v1003_v26 = vmul.f32 1.442695, %v998_v39 }
 0x481   :  { %v3575_v42 = vpop.permute.xlu1 %1481  ;;  %v996_v27 = vpop.xlane.xlu0 %995 }
 0x482   :  { %3196 = vpow2.f32 %v1003_v26  ;;  %v1000_v34 = vsub.f32 %v981_v18, %v996_v27  ;;  %v1500_v27 = vcombine.low %v3571_v40, %v3575_v42 }
 0x483   :  { %3198 = vpow2.f32 %v1001_v33 }
 0x484   :  { %v1007_v48 = vmul.f32 1.442695, %v1000_v34 }
 0x485   :  { %v535_v38 = vpop.permute.xlu1 %534  ;;  %v3577_v28 = vpop.permute.xlu0 %1478 }
 0x486   :  { %3200 = vpow2.f32 %v1007_v48  ;;  %v1484_v26 = vcombine.low %v3457_v36, %v3577_v28 }
 0x488   :  { %v1492_v33 = vrot.slane %v1484_v26, %v3491_v52 }
 0x489   :  { %v537_v30 = vpop.permute.xlu1 %536  ;;  %v533_v31 = vpop.permute.xlu0 %532 }
 0x48a   :  { %v544_v35 = vcombine.low %v533_v31, %v537_v30  ;;  %v545_v37 = vcombine.high %v533_v31, %v537_v30  ;;  %v1501_v31 = vcombine.high %v3571_v40, %v3575_v42 }
 0x48b   :  { %v3579_v32 = vpop.eup %3194 }
 0x48c   :  { %v1015_v44 = vsel %vm680_vm2, %v3579_v32, 0.0  ;;  %v552_v49 = vrot.slane %v544_v35, %v3491_v52  ;;  %v559_v50 = vrot.slane %v545_v37, %v3491_v52  ;;  %v1508_v35 = vrot.slane %v1500_v27, %v3491_v52 }
 0x48d   :  { %v539_v43 = vpop.permute.xlu1 %538  ;;  %1016 = vadd.xlane.f32.xlu0 %v1015_v44  ;;  %v1621_v24 = vpop.permute.xlu0 %1620  ;;  %v1515_v44 = vrot.slane %v1501_v31, %v3491_v52 }
 0x48e   :  { %v560_v46 = vcombine.low %v535_v38, %v539_v43  ;;  %v561_v47 = vcombine.high %v535_v38, %v539_v43  ;;  %v1485_v38 = vcombine.high %v3457_v36, %v3577_v28 }
 0x48f   :  { %v3583_v45 = vpop.eup %3196 }
 0x490   :  { %v568_v51 = vrot.slane %v560_v46, %v3491_v52  ;;  %v575_v53 = vrot.slane %v561_v47, %v3491_v52  ;;  %v1012_v54 = vsel %vm680_vm2, %v3583_v45, 0.0  ;;  %v3599_v12 = vpop.eup %3198  ;;  %v1499_v37 = vrot.slane %v1485_v38, %v3491_v52 }
 0x491   :  { %1013 = vadd.xlane.f32.xlu0 %v1012_v54  ;;  %v1009_v22 = vsel %vm680_vm2, %v3599_v12, 0.0  ;;  %v1516_v46 = vcombine.low %v1492_v33, %v1508_v35  ;;  %v1517_v47 = vcombine.high %v1492_v33, %v1508_v35 }
 0x492   :  { %v576_v55 = vcombine.low %v552_v49, %v568_v51  ;;  %v577_v56 = vcombine.high %v552_v49, %v568_v51  ;;  %v592_v57 = vcombine.low %v559_v50, %v575_v53  ;;  %v593_v58 = vcombine.high %v559_v50, %v575_v53 }
 0x493   :  { %v3613_v21 = vpop.eup %3200  ;;  %v1532_v48 = vcombine.low %v1499_v37, %v1515_v44  ;;  %v1524_v51 = vrot.slane %v1516_v46, %v3501_v61  ;;  %v1531_v53 = vrot.slane %v1517_v47, %v3501_v61 }
 0x494   :  { %v584_v59 = vrot.slane %v576_v55, %v3501_v61  ;;  %v591_v60 = vrot.slane %v577_v56, %v3501_v61  ;;  %v600_v62 = vrot.slane %v592_v57, %v3501_v61  ;;  %v607_v63 = vrot.slane %v593_v58, %v3501_v61 }
 0x495   :  { %v1018_v23 = vsel %vm680_vm2, %v3613_v21, 0.0  ;;  %v1540_v56 = vrot.slane %v1532_v48, %v3501_v61 }
 0x496   :  { %v612_v0 = vcombine.low %v584_v59, %v591_v60  ;;  %v2965_v1 = vcombine.high %v584_v59, %v591_v60  ;;  %v628_v2 = vcombine.low %v600_v62, %v607_v63  ;;  %v2966_v3 = vcombine.high %v600_v62, %v607_v63 }
 0x497   :  { %v1552_v62 = vcombine.low %v1524_v51, %v1531_v53  ;;  %v2981_v63 = vcombine.high %v1524_v51, %v1531_v53 }
 0x498   :  { %v619_v4 = vrot.slane %v612_v0, %v3491_v52  ;;  %v627_v5 = vrot.slane %v2965_v1, %v3491_v52  ;;  %v635_v6 = vrot.slane %v628_v2, %v3491_v52  ;;  %v643_v7 = vrot.slane %v2966_v3, %v3491_v52 }
 0x49a   :  { %v644_v8 = vcombine.low %v619_v4, %v627_v5  ;;  %v660_v9 = vcombine.low %v635_v6, %v643_v7  ;;  %v645_v10 = vcombine.high %v619_v4, %v627_v5  ;;  %v661_v11 = vcombine.high %v635_v6, %v643_v7 }
 0x49c   :  { %v652_v13 = vrot.slane %v644_v8, %v3501_v61  ;;  %v668_v14 = vrot.slane %v660_v9, %v3501_v61  ;;  %v3604_v15 = vrot.slane %v645_v10, %v3501_v61  ;;  %v3607_v16 = vrot.slane %v661_v11, %v3501_v61 }
 0x49d   :  { %v1559_v11 = vrot.slane %v1552_v62, %v3491_v52 }
 0x49e   :  { %v676_v17 = vcombine.low %v652_v13, %v668_v14  ;;  %v677_v18 = vcombine.high %v652_v13, %v668_v14  ;;  %v679_v19 = vcombine.high %v3604_v15, %v3607_v16  ;;  %v678_v20 = vcombine.low %v3604_v15, %v3607_v16 }
 0x49f   :  { %v1567_v13 = vrot.slane %v2981_v63, %v3491_v52 }
 0x4a0   :  { %3091 = vmatpush3.msra.mxu0 %v676_v17  ;;  %3096 = vmatpush3.msra.mxu1 %v677_v18 }
 0x4a1   :  { %3105 = vmatprep.subr.mxu1 %v3350_v41  ;;  %3100 = vmatprep.subr.mxu0 %v3350_v41 }
 0x4a2   :  { %1010 = vadd.xlane.f32.xlu1 %v1009_v22 }
 0x4a6   :  { %1019 = vadd.xlane.f32.xlu1 %v1018_v23 }
 0x4a7   :  { %1624 = vrot.lane.b32.xlu0 %v3577_v28, %s3349_s25 }
 0x4b7   :  { %1626 = vrot.lane.b32.xlu1 %v3575_v42, %s3349_s25 }
 0x4f0   :  { %v1623_v29 = vpop.permute.xlu1 %1622 }
 0x516   :  { %v1017_v25 = vpop.xlane.xlu0 %1016 }
 0x51a   :  { %v1014_v39 = vpop.xlane.xlu0 %1013 }
 0x51b   :  { %3202 = vrcp.f32 %v1014_v39 }
 0x51e   :  { %v1625_v49 = vpop.permute.xlu0 %1624 }
 0x51f   :  { %v1632_v54 = vcombine.low %v1621_v24, %v1625_v49  ;;  %v1633_v55 = vcombine.high %v1621_v24, %v1625_v49 }
 0x521   :  { %v1640_v0 = vrot.slane %v1632_v54, %v3491_v52  ;;  %v1647_v1 = vrot.slane %v1633_v55, %v3491_v52 }
 0x528   :  { %v3203_v30 = vpop.eup %3202 }
 0x529   :  { %v1026_v34 = vmul.f32 %v3203_v30, %v3583_v45  ;;  %v1533_v45 = vcombine.high %v1499_v37, %v1515_v44  ;;  %v1584_v30 = vcombine.low %v1559_v11, %v1567_v13 }
 0x52b   :  { %v1011_v43 = vpop.xlane.xlu1 %1010  ;;  %3098 = vmatmul.mubr.msk.f32.vlgmr.msra.gmra.mxu1 %vm680_vm2, %v1026_v34  ;;  %v1547_v57 = vrot.slane %v1533_v45, %v3501_v61 }
 0x52c   :  { %3204 = vrcp.f32 %v1011_v43  ;;  %3106 = vmatpush3.msra.mxu1 %v679_v19  ;;  %3107 = vmatprep.mubr.msk.f32.mxu1 %vm3351_vm1, %v3350_v41 }
 0x52d   :  { %3115 = vmatprep.subr.mxu1 %v3350_v41  ;;  %3206 = vrcp.f32 %v1017_v25  ;;  %v1568_v4 = vcombine.low %v1540_v56, %v1547_v57  ;;  %v2982_v5 = vcombine.high %v1540_v56, %v1547_v57 }
 0x52f   :  { %v1020_v50 = vpop.xlane.xlu1 %1019  ;;  %v1575_v22 = vrot.slane %v1568_v4, %v3491_v52  ;;  %v1583_v23 = vrot.slane %v2982_v5, %v3491_v52 }
 0x530   :  { %3208 = vrcp.f32 %v1020_v50 }
 0x531   :  { %v1600_v43 = vcombine.low %v1575_v22, %v1583_v23  ;;  %v1601_v45 = vcombine.high %v1575_v22, %v1583_v23 }
 0x533   :  { %v1627_v58 = vpop.permute.xlu1 %1626  ;;  %v1615_v57 = vrot.slane %v1601_v45, %v3501_v61 }
 0x534   :  { %v1648_v59 = vcombine.low %v1623_v29, %v1627_v58  ;;  %v1649_v60 = vcombine.high %v1623_v29, %v1627_v58 }
 0x536   :  { %v1656_v2 = vrot.slane %v1648_v59, %v3491_v52  ;;  %v1663_v3 = vrot.slane %v1649_v60, %v3491_v52 }
 0x538   :  { %v1664_v6 = vcombine.low %v1640_v0, %v1656_v2  ;;  %v1665_v7 = vcombine.high %v1640_v0, %v1656_v2  ;;  %v1680_v8 = vcombine.low %v1647_v1, %v1663_v3  ;;  %v1681_v9 = vcombine.high %v1647_v1, %v1663_v3 }
 0x539   :  { %v3205_v10 = vpop.eup %3204 }
 0x53a   :  { %v1672_v14 = vrot.slane %v1664_v6, %v3501_v61  ;;  %v1679_v17 = vrot.slane %v1665_v7, %v3501_v61  ;;  %v1688_v18 = vrot.slane %v1680_v8, %v3501_v61  ;;  %v1695_v19 = vrot.slane %v1681_v9, %v3501_v61  ;;  %v3207_v25 = vpop.eup %3206 }
 0x53b   :  { %v1025_v24 = vmul.f32 %v3205_v10, %v3599_v12  ;;  %v1027_v12 = vmul.f32 %v3207_v25, %v3579_v32  ;;  %v1585_v32 = vcombine.high %v1559_v11, %v1567_v13 }
 0x53c   :  { %v1700_v39 = vcombine.low %v1672_v14, %v1679_v17  ;;  %v2983_v26 = vcombine.high %v1672_v14, %v1679_v17  ;;  %v1716_v27 = vcombine.low %v1688_v18, %v1695_v19  ;;  %v2984_v38 = vcombine.high %v1688_v18, %v1695_v19 }
 0x53d   :  { %v3209_v29 = vpop.eup %3208  ;;  %3093 = vmatmul.mubr.msk.f32.vlgmr.msra.gmra.mxu0 %vm680_vm2, %v1025_v24  ;;  %v1599_v54 = vrot.slane %v1585_v32, %v3501_v61 }
 0x53e   :  { %v1707_v31 = vrot.slane %v1700_v39, %v3491_v52  ;;  %v1715_v33 = vrot.slane %v2983_v26, %v3491_v52  ;;  %v1723_v34 = vrot.slane %v1716_v27, %v3491_v52  ;;  %v1731_v35 = vrot.slane %v2984_v38, %v3491_v52  ;;  %3101 = vmatpush3.msra.mxu0 %v678_v20 }
 0x53f   :  { %3102 = vmatprep.mubr.msk.f32.mxu0 %vm3351_vm1, %v3350_v41  ;;  %v1028_v37 = vmul.f32 %v3209_v29, %v3613_v21  ;;  %3110 = vmatprep.subr.mxu0 %v3350_v41  ;;  %v1592_v20 = vrot.slane %v1584_v30, %v3501_v61  ;;  %v1608_v21 = vrot.slane %v1600_v43, %v3501_v61 }
 0x540   :  { %v1732_v44 = vcombine.low %v1707_v31, %v1715_v33  ;;  %v1733_v46 = vcombine.high %v1707_v31, %v1715_v33  ;;  %v1748_v47 = vcombine.low %v1723_v34, %v1731_v35  ;;  %v1749_v48 = vcombine.high %v1723_v34, %v1731_v35 }
 0x541   :  { %3103 = vmatmul.mubr.msk.f32.vlgmr.msra.gmra.mxu0 %vm680_vm2, %v1027_v12  ;;  %3108 = vmatmul.mubr.msk.f32.vlgmr.msra.gmra.mxu1 %vm680_vm2, %v1028_v37  ;;  %v1616_v55 = vcombine.low %v1592_v20, %v1608_v21  ;;  %v1617_v56 = vcombine.high %v1592_v20, %v1608_v21  ;;  %v1618_v60 = vcombine.low %v1599_v54, %v1615_v57 }
 0x542   :  { %v1740_v15 = vrot.slane %v1732_v44, %v3501_v61  ;;  %v1756_v16 = vrot.slane %v1748_v47, %v3501_v61  ;;  %3112 = vmatprep.mubr.msk.f32.mxu0 %vm3351_vm1, %v3350_v41  ;;  %3117 = vmatprep.mubr.msk.f32.mxu1 %vm3351_vm1, %v3350_v41  ;;  %v1747_v51 = vrot.slane %v1733_v46, %v3501_v61 }
 0x543   :  { %v1763_v53 = vrot.slane %v1749_v48, %v3501_v61  ;;  %v1619_v62 = vcombine.high %v1599_v54, %v1615_v57 }
 0x544   :  { %v1764_v49 = vcombine.low %v1740_v15, %v1756_v16  ;;  %v1765_v50 = vcombine.high %v1740_v15, %v1756_v16 }
 0x545   :  { %v1766_v58 = vcombine.low %v1747_v51, %v1763_v53  ;;  %v1767_v59 = vcombine.high %v1747_v51, %v1763_v53 }
 0x546   :  { %3111 = vmatpush3.xpose.msk.msra.mxu0 %vm680_vm2, %v1764_v49  ;;  %3116 = vmatpush3.xpose.msk.msra.mxu1 %vm680_vm2, %v1765_v50 }
 0x547   :  { %3120 = vmatprep.subr.mxu0 %v3350_v41  ;;  %3125 = vmatprep.subr.mxu1 %v3350_v41 }
 0x549   :  { %3113 = vmatmul.mubr.msk.f32.vlgmr.msra.gmra.mxu0 %vm680_vm2, %v1616_v55  ;;  %3118 = vmatmul.mubr.msk.f32.vlgmr.msra.gmra.mxu1 %vm680_vm2, %v1617_v56 }
 0x54a   :  { %3121 = vmatpush3.xpose.msk.msra.mxu0 %vm680_vm2, %v1766_v58  ;;  %3126 = vmatpush3.xpose.msk.msra.mxu1 %vm680_vm2, %v1767_v59 }
 0x54b   :  { %3122 = vmatprep.mubr.msk.f32.mxu0 %vm3351_vm1, %v3350_v41  ;;  %3127 = vmatprep.mubr.msk.f32.mxu1 %vm3351_vm1, %v3350_v41 }
 0x54c   :  { %3130 = vmatprep.subr.mxu0 %v3350_v41  ;;  %3135 = vmatprep.subr.mxu1 %v3350_v41 }
 0x54d   :  { %3123 = vmatmul.mubr.msk.f32.vlgmr.msra.gmra.mxu0 %vm680_vm2, %v1618_v60  ;;  %3128 = vmatmul.mubr.msk.f32.vlgmr.msra.gmra.mxu1 %vm680_vm2, %v1619_v62 }
 0x54e   :  { %3132 = vmatprep.mubr.msk.f32.mxu0 %vm3351_vm1, %v3350_v41  ;;  %3137 = vmatprep.mubr.msk.f32.mxu1 %vm3351_vm1, %v3350_v41 }
 0x5eb   :  { %v1171_v63 = vpop.f32.mrf.mxu1 }
 0x5ed   :  { %v3099_v0 = vpop.f32.mrf.mxu1 }
 0x5fd   :  { %v1098_v1 = vpop.f32.mrf.mxu0 }
 0x5ff   :  { %v3094_v2 = vpop.f32.mrf.mxu0 }
 0x601   :  { %v1244_v3 = vpop.f32.mrf.mxu0  ;;  %v1317_v4 = vpop.f32.mrf.mxu1 }
 0x602   :  { %v1321_v5 = vcombine.low %v1098_v1, %v1244_v3  ;;  %v1322_v6 = vcombine.high %v1098_v1, %v1244_v3  ;;  %v1337_v7 = vcombine.low %v1171_v63, %v1317_v4  ;;  %v1338_v8 = vcombine.high %v1171_v63, %v1317_v4 }
 0x603   :  { %v3104_v9 = vpop.f32.mrf.mxu0  ;;  %v3109_v10 = vpop.f32.mrf.mxu1 }
 0x604   :  { %v1329_v11 = vrot.slane %v1321_v5, %v3491_v52  ;;  %v1336_v13 = vrot.slane %v1322_v6, %v3491_v52  ;;  %v1345_v14 = vrot.slane %v1337_v7, %v3491_v52  ;;  %v1352_v17 = vrot.slane %v1338_v8, %v3491_v52 }
 0x606   :  { %v1353_v18 = vcombine.low %v1329_v11, %v1345_v14  ;;  %v1354_v19 = vcombine.high %v1329_v11, %v1345_v14  ;;  %v1369_v22 = vcombine.low %v1336_v13, %v1352_v17  ;;  %v1370_v23 = vcombine.high %v1336_v13, %v1352_v17 }
 0x608   :  { %v1361_v24 = vrot.slane %v1353_v18, %v3501_v61  ;;  %v1368_v25 = vrot.slane %v1354_v19, %v3501_v61  ;;  %v1377_v39 = vrot.slane %v1369_v22, %v3501_v61  ;;  %v1384_v26 = vrot.slane %v1370_v23, %v3501_v61 }
 0x609   :  { %v1988_v27 = vpop.f32.mrf.mxu0  ;;  %v2064_v38 = vpop.f32.mrf.mxu1 }
 0x60a   :  { %v2220_v29 = vsel %vm680_vm2, %v1988_v27, -inf  ;;  %v2223_v30 = vsel %vm680_vm2, %v2064_v38, -inf  ;;  %v1389_v31 = vcombine.low %v1361_v24, %v1368_v25  ;;  %v2979_v33 = vcombine.high %v1361_v24, %v1368_v25 }
 0x60b   :  { %2221 = vmax.xlane.f32.xlu0 %v2220_v29  ;;  %v3114_v34 = vpop.f32.mrf.mxu0  ;;  %2224 = vmax.xlane.f32.xlu1 %v2223_v30  ;;  %v3119_v35 = vpop.f32.mrf.mxu1  ;;  %v1405_v12 = vcombine.low %v1377_v39, %v1384_v26  ;;  %v2980_v37 = vcombine.high %v1377_v39, %v1384_v26 }
 0x60c   :  { %v1396_v43 = vrot.slane %v1389_v31, %v3491_v52  ;;  %v1404_v44 = vrot.slane %v2979_v33, %v3491_v52 }
 0x60d   :  { %v2140_v46 = vpop.f32.mrf.mxu0  ;;  %v2216_v47 = vpop.f32.mrf.mxu1  ;;  %v1412_v48 = vrot.slane %v1405_v12, %v3491_v52  ;;  %v1420_v15 = vrot.slane %v2980_v37, %v3491_v52 }
 0x60e   :  { %v2226_v16 = vsel %vm680_vm2, %v2140_v46, -inf  ;;  %v1421_v32 = vcombine.low %v1396_v43, %v1404_v44  ;;  %v1422_v20 = vcombine.high %v1396_v43, %v1404_v44  ;;  %v2229_v56 = vsel %vm680_vm2, %v2216_v47, -inf }
 0x60f   :  { %2227 = vmax.xlane.f32.xlu0 %v2226_v16  ;;  %v3124_v21 = vpop.f32.mrf.mxu0  ;;  %v3129_v45 = vpop.f32.mrf.mxu1  ;;  %v1437_v49 = vcombine.low %v1412_v48, %v1420_v15  ;;  %v1438_v50 = vcombine.high %v1412_v48, %v1420_v15 }
 0x610   :  { %v3722_v51 = vrot.slane %v1421_v32, %v3501_v61  ;;  %v1436_v53 = vrot.slane %v1422_v20, %v3501_v61 }
 0x611   :  { %v3726_v54 = vrot.slane %v1437_v49, %v3501_v61  ;;  %v1452_v55 = vrot.slane %v1438_v50, %v3501_v61 }
 0x613   :  { %2230 = vmax.xlane.f32.xlu0 %v2229_v56  ;;  %v1453_v57 = vcombine.low %v3722_v51, %v3726_v54  ;;  %v1454_v58 = vcombine.high %v3722_v51, %v3726_v54  ;;  %v1455_v59 = vcombine.low %v1436_v53, %v1452_v55  ;;  %v1456_v60 = vcombine.high %v1436_v53, %v1452_v55  ;;  %v2710_v51 = vld [vmem:[#allocation7 + $0x18] sm:$0xff] }
 0x694   :  { %v2222_v62 = vpop.xlane.xlu0 %2221  ;;  %v2225_v63 = vpop.xlane.xlu1 %2224 }
 0x695   :  { %v2232_v0 = vsub.f32 %v1988_v27, %v2222_v62  ;;  %v2233_v1 = vsub.f32 %v2064_v38, %v2225_v63 }
 0x697   :  { %v2236_v2 = vmul.f32 1.442695, %v2232_v0  ;;  %v2238_v3 = vmul.f32 1.442695, %v2233_v1 }
 0x698   :  { %v2228_v4 = vpop.xlane.xlu0 %2227 }
 0x699   :  { %3210 = vpow2.f32 %v2236_v2  ;;  %v2234_v5 = vsub.f32 %v2140_v46, %v2228_v4 }
 0x69a   :  { %3212 = vpow2.f32 %v2238_v3 }
 0x69b   :  { %v2240_v6 = vmul.f32 1.442695, %v2234_v5 }
 0x69c   :  { %v2231_v14 = vpop.xlane.xlu0 %2230 }
 0x69d   :  { %3214 = vpow2.f32 %v2240_v6  ;;  %v2235_v17 = vsub.f32 %v2216_v47, %v2231_v14 }
 0x69f   :  { %v2242_v18 = vmul.f32 1.442695, %v2235_v17 }
 0x6a1   :  { %3216 = vpow2.f32 %v2242_v18 }
 0x6a6   :  { %v3734_v7 = vpop.eup %3210 }
 0x6a7   :  { %v3736_v8 = vpop.eup %3212  ;;  %v2244_v9 = vsel %vm680_vm2, %v3734_v7, 0.0 }
 0x6a8   :  { %v2247_v10 = vsel %vm680_vm2, %v3736_v8, 0.0  ;;  %2245 = vadd.xlane.f32.xlu0 %v2244_v9 }
 0x6a9   :  { %2248 = vadd.xlane.f32.xlu1 %v2247_v10 }
 0x6aa   :  { %v3742_v11 = vpop.eup %3214 }
 0x6ab   :  { %v2250_v13 = vsel %vm680_vm2, %v3742_v11, 0.0 }
 0x6ac   :  { %2251 = vadd.xlane.f32.xlu0 %v2250_v13 }
 0x6ae   :  { %v3753_v19 = vpop.eup %3216 }
 0x6af   :  { %v2253_v22 = vsel %vm680_vm2, %v3753_v19, 0.0 }
 0x6ba   :  { %1770 = vrot.lane.b32.xlu1 %v3571_v40, %s3354_s6 }
 0x6be   :  { %1772 = vrot.lane.b32.xlu1 %v3577_v28, %s3354_s6 }
 0x6c2   :  { %1768 = vrot.lane.b32.xlu0 %v3457_v36, %s3354_s6 }
 0x6c6   :  { %1458 = vrot.lane.b32.xlu0 %v1454_v58, %s3343_s23 }
 0x6e2   :  { %2254 = vadd.xlane.f32.xlu1 %v2253_v22 }
 0x6f3   :  { %1774 = vrot.lane.b32.xlu1 %v3575_v42, %s3354_s6 }
 0x6f7   :  { %1462 = vrot.lane.b32.xlu1 %v1455_v59, %s3355_s26 }
 0x6fb   :  { %1466 = vrot.lane.b32.xlu1 %v1456_v60, %s3356_s27 }
 0x731   :  { %v2246_v40 = vpop.xlane.xlu0 %2245 }
 0x732   :  { %v2249_v36 = vpop.xlane.xlu1 %2248  ;;  %3218 = vrcp.f32 %v2246_v40 }
 0x733   :  { %3220 = vrcp.f32 %v2249_v36 }
 0x735   :  { %v2252_v23 = vpop.xlane.xlu0 %2251 }
 0x736   :  { %v1771_v28 = vpop.permute.xlu1 %1770  ;;  %3222 = vrcp.f32 %v2252_v23 }
 0x739   :  { %v1769_v25 = vpop.permute.xlu0 %1768 }
 0x73a   :  { %v1773_v24 = vpop.permute.xlu1 %1772 }
 0x73b   :  { %v1780_v26 = vcombine.low %v1769_v25, %v1773_v24  ;;  %v1781_v27 = vcombine.high %v1769_v25, %v1773_v24 }
 0x73d   :  { %v1788_v42 = vrot.slane %v1780_v26, %v3491_v52  ;;  %v1795_v31 = vrot.slane %v1781_v27, %v3491_v52  ;;  %v1459_v13 = vpop.permute.xlu0 %1458 }
 0x73f   :  { %v3219_v59 = vpop.eup %3218 }
 0x740   :  { %v3221_v60 = vpop.eup %3220  ;;  %v2260_v6 = vmul.f32 %v3219_v59, %v3734_v7  ;;  %v1469_v7 = vsel %vm680_vm2, %v1453_v57, %v1459_v13 }
 0x741   :  { %v2261_v9 = vmul.f32 %v3221_v60, %v3736_v8 }
 0x743   :  { %v3223_v3 = vpop.eup %3222 }
 0x744   :  { %v2262_v8 = vmul.f32 %v3223_v3, %v3742_v11 }
 0x76b   :  { %v2255_v39 = vpop.xlane.xlu1 %2254 }
 0x76c   :  { %3224 = vrcp.f32 %v2255_v39 }
 0x76f   :  { %v1775_v38 = vpop.permute.xlu1 %1774 }
 0x770   :  { %v1796_v29 = vcombine.low %v1771_v28, %v1775_v38  ;;  %v1797_v30 = vcombine.high %v1771_v28, %v1775_v38 }
 0x772   :  { %v1804_v33 = vrot.slane %v1796_v29, %v3491_v52  ;;  %v1811_v34 = vrot.slane %v1797_v30, %v3491_v52 }
 0x773   :  { %v1463_v62 = vpop.permute.xlu1 %1462 }
 0x774   :  { %v1812_v35 = vcombine.low %v1788_v42, %v1804_v33  ;;  %v1813_v12 = vcombine.high %v1788_v42, %v1804_v33  ;;  %v1828_v37 = vcombine.low %v1795_v31, %v1811_v34  ;;  %v1829_v43 = vcombine.high %v1795_v31, %v1811_v34 }
 0x775   :  { %v1471_v36 = vsel %vm1470_vm3, %v1469_v7, %v1463_v62 }
 0x776   :  { %v1820_v44 = vrot.slane %v1812_v35, %v3501_v61  ;;  %v1827_v46 = vrot.slane %v1813_v12, %v3501_v61  ;;  %v1836_v47 = vrot.slane %v1828_v37, %v3501_v61  ;;  %v1843_v48 = vrot.slane %v1829_v43, %v3501_v61  ;;  %v2709_v12 = vld [vmem:[#allocation7 + $0x10] sm:$0xff]  ;;  %v2708_v37 = vld [vmem:[#allocation7 + $0x8] sm:$0xff] }
 0x777   :  { %v1467_v18 = vpop.permute.xlu1 %1466 }
 0x778   :  { %v1848_v15 = vcombine.low %v1820_v44, %v1827_v46  ;;  %v2985_v16 = vcombine.high %v1820_v44, %v1827_v46  ;;  %v1864_v32 = vcombine.low %v1836_v47, %v1843_v48  ;;  %v2986_v20 = vcombine.high %v1836_v47, %v1843_v48 }
 0x779   :  { %v3225_v10 = vpop.eup %3224  ;;  %v1473_v40 = vsel %vm1472_vm4, %v1471_v36, %v1467_v18  ;;  %v3230_v18 = vld [vmem:[#allocation2 + $0x8] sm:$0xff] }
 0x77a   :  { %v1855_v21 = vrot.slane %v1848_v15, %v3491_v52  ;;  %v1863_v45 = vrot.slane %v2985_v16, %v3491_v52  ;;  %v1871_v49 = vrot.slane %v1864_v32, %v3491_v52  ;;  %v1879_v50 = vrot.slane %v2986_v20, %v3491_v52  ;;  %v2707_v20 = vld [vmem:[#allocation7] sm:$0xff] }
 0x77b   :  { %v2263_v22 = vmul.f32 %v3225_v10, %v3753_v19 }
 0x77c   :  { %v1880_v53 = vcombine.low %v1855_v21, %v1863_v45  ;;  %v1896_v55 = vcombine.low %v1871_v49, %v1879_v50  ;;  %v1881_v56 = vcombine.high %v1855_v21, %v1863_v45  ;;  %v1897_v58 = vcombine.high %v1871_v49, %v1879_v50 }
 0x77e   :  { %v1888_v63 = vrot.slane %v1880_v53, %v3501_v61  ;;  %v1904_v0 = vrot.slane %v1896_v55, %v3501_v61  ;;  %v1895_v1 = vrot.slane %v1881_v56, %v3501_v61  ;;  %v1911_v2 = vrot.slane %v1897_v58, %v3501_v61 }
 0x780   :  { %v1912_v4 = vcombine.low %v1888_v63, %v1904_v0  ;;  %v1913_v5 = vcombine.high %v1888_v63, %v1904_v0  ;;  %v1914_v14 = vcombine.low %v1895_v1, %v1911_v2  ;;  %v1915_v17 = vcombine.high %v1895_v1, %v1911_v2 }
 0x782   :  { %3131 = vmatpush3.msra.mxu0 %v1912_v4  ;;  %3136 = vmatpush3.msra.mxu1 %v1913_v5 }
 0x783   :  { %3133 = vmatmul.mubr.msk.f32.vlgmr.msra.gmra.mxu0 %vm680_vm2, %v2260_v6  ;;  %3138 = vmatmul.mubr.msk.f32.vlgmr.msra.gmra.mxu1 %vm680_vm2, %v2261_v9 }
 0x784   :  { %3140 = vmatprep.subr.mxu0 %v3350_v41  ;;  %3145 = vmatprep.subr.mxu1 %v3350_v41 }
 0x785   :  { %3141 = vmatpush3.msra.mxu0 %v1914_v14  ;;  %3146 = vmatpush3.msra.mxu1 %v1915_v17 }
 0x786   :  { %3142 = vmatprep.mubr.msk.f32.mxu0 %vm3351_vm1, %v3350_v41  ;;  %3147 = vmatprep.mubr.msk.f32.mxu1 %vm3351_vm1, %v3350_v41 }
 0x787   :  { %3143 = vmatmul.mubr.msk.f32.vlgmr.msra.gmra.mxu0 %vm680_vm2, %v2262_v8  ;;  %3148 = vmatmul.mubr.msk.f32.vlgmr.msra.gmra.mxu1 %vm680_vm2, %v2263_v22  ;;  %v3231_v22 = vld [vmem:[#allocation2] sm:$0xff] }
 0x788   :  { %3158 = vmatprep.mubr.msk.f32.mxu0 %vm103_vm0, %v1473_v40  ;;  %3150 = vmatprep.subr.mxu0 %v2710_v51 }
 0x789   :  { %3151 = vmatpush3.msra.mxu0 %v2710_v51 }
 0x78a   :  { %3152 = vmatprep.subr.mxu0 %v2709_v12 }
 0x78b   :  { %3153 = vmatpush3.msra.mxu0 %v2709_v12 }
 0x78c   :  { %3154 = vmatprep.subr.mxu0 %v2708_v37 }
 0x78d   :  { %3155 = vmatpush3.msra.mxu0 %v2708_v37  ;;  %v3004_v37 = vld [vmem:[%s3850_s3] ss:$0 sm:$0xff]  ;;  %s3357_s3 = smov [#allocation10]  }
 0x78e   :  { %3156 = vmatprep.subr.mxu0 %v2707_v20  ;;  %s2942_s15 = sshll.u32 %s3357_s3, 4  ;;  %s2943_s15 = int_to_ptr.vmem [resolvable:$true] %s2942_s15 }
 0x78f   :  { %3157 = vmatpush3.msra.mxu0 %v2707_v20  ;;  %v3006_v20 = vld [vmem:[%s3857_s10] ss:$0 sm:$0xff]  ;;  %p3317_p7 = scmp.lt.s32.totalorder %s2943_s15, %s2943_s15 }
 0x843   :  { %v2333_v54 = vpop.f32.mrf.mxu0  ;;  %v2406_v57 = vpop.f32.mrf.mxu1 }
 0x845   :  { %v3134_v11 = vpop.f32.mrf.mxu0  ;;  %v3139_v19 = vpop.f32.mrf.mxu1 }
 0x847   :  { %v2479_v28 = vpop.f32.mrf.mxu0  ;;  %v2552_v23 = vpop.f32.mrf.mxu1 }
 0x848   :  { %v2556_v24 = vcombine.low %v2333_v54, %v2479_v28  ;;  %v2557_v25 = vcombine.high %v2333_v54, %v2479_v28  ;;  %v2572_v41 = vcombine.low %v2406_v57, %v2552_v23  ;;  %v2573_v39 = vcombine.high %v2406_v57, %v2552_v23 }
 0x849   :  { %v3144_v26 = vpop.f32.mrf.mxu0  ;;  %v3149_v27 = vpop.f32.mrf.mxu1 }
 0x84a   :  { %v2564_v38 = vrot.slane %v2556_v24, %v3491_v52  ;;  %v2571_v29 = vrot.slane %v2557_v25, %v3491_v52  ;;  %v2580_v30 = vrot.slane %v2572_v41, %v3491_v52  ;;  %v2587_v42 = vrot.slane %v2573_v39, %v3491_v52  ;;  %v2845_v26 = vld [vmem:[#allocation8 + $0x18] sm:$0xff]  ;;  %v2844_v27 = vld [vmem:[#allocation8 + $0x10] sm:$0xff] }
 0x84b   :  { %3161 = vmatprep.subr.mxu1 %v2845_v26 }
 0x84c   :  { %v2588_v31 = vcombine.low %v2564_v38, %v2580_v30  ;;  %v2589_v33 = vcombine.high %v2564_v38, %v2580_v30  ;;  %v2604_v34 = vcombine.low %v2571_v29, %v2587_v42  ;;  %v2605_v35 = vcombine.high %v2571_v29, %v2587_v42  ;;  %3162 = vmatpush3.msra.mxu1 %v2845_v26  ;;  %v2843_v38 = vld [vmem:[#allocation8 + $0x8] sm:$0xff]  ;;  %v2842_v29 = vld [vmem:[#allocation8] sm:$0xff] }
 0x84d   :  { %3163 = vmatprep.subr.mxu1 %v2844_v27 }
 0x84e   :  { %v2596_v43 = vrot.slane %v2588_v31, %v3501_v61  ;;  %v2603_v44 = vrot.slane %v2589_v33, %v3501_v61  ;;  %v2612_v46 = vrot.slane %v2604_v34, %v3501_v61  ;;  %v2619_v47 = vrot.slane %v2605_v35, %v3501_v61  ;;  %3164 = vmatpush3.msra.mxu1 %v2844_v27 }
 0x84f   :  { %3165 = vmatprep.subr.mxu1 %v2843_v38 }
 0x850   :  { %v2624_v48 = vcombine.low %v2596_v43, %v2603_v44  ;;  %v2999_v15 = vcombine.high %v2596_v43, %v2603_v44  ;;  %v2640_v16 = vcombine.low %v2612_v46, %v2619_v47  ;;  %v3000_v32 = vcombine.high %v2612_v46, %v2619_v47  ;;  %3166 = vmatpush3.msra.mxu1 %v2843_v38  ;;  %v3005_v44 = vld [vmem:[%s3851_s4] ss:$0 sm:$0xff]  ;;  %s3312_s4 = scalar_lea.vmem %s2943_s15, 256 }
 0x851   :  { %3167 = vmatprep.subr.mxu1 %v2842_v29  ;;  %p3313_p6 = scmp.ne.s32.totalorder %s2943_s15, %s3312_s4  ;;  %p3318_p8 = scmp.lt.s32.totalorder %s3312_s4, %s3312_s4 }
 0x852   :  { %v2631_v21 = vrot.slane %v2624_v48, %v3491_v52  ;;  %v2639_v45 = vrot.slane %v2999_v15, %v3491_v52  ;;  %v2647_v49 = vrot.slane %v2640_v16, %v3491_v52  ;;  %v2655_v50 = vrot.slane %v3000_v32, %v3491_v52  ;;  %3168 = vmatpush3.msra.mxu1 %v2842_v29 }
 0x853   :  { %p3319_p9 = por %p3318_p8, %p3317_p7 }
 0x854   :  { %v2657_v53 = vcombine.high %v2631_v21, %v2639_v45  ;;  %v2673_v55 = vcombine.high %v2647_v49, %v2655_v50  ;;  %v2656_v56 = vcombine.low %v2631_v21, %v2639_v45  ;;  %v2672_v58 = vcombine.low %v2647_v49, %v2655_v50 }
 0x855   :  { %p3320_p10 = pnand %p3319_p9, %p3313_p6 }
 0x856   :  { %v2671_v59 = vrot.slane %v2657_v53, %v3501_v61  ;;  %v2687_v60 = vrot.slane %v2673_v55, %v3501_v61  ;;  %v2664_v62 = vrot.slane %v2656_v56, %v3501_v61  ;;  %v2680_v63 = vrot.slane %v2672_v58, %v3501_v61  ;;  %v3001_v61 = vld [vmem:[%s3855_s8] ss:$0 sm:$0xff] }
 0x858   :  { %v2691_v0 = vcombine.high %v2671_v59, %v2687_v60  ;;  %v2689_v1 = vcombine.high %v2664_v62, %v2680_v63  ;;  %v2688_v2 = vcombine.low %v2664_v62, %v2680_v63  ;;  %v2690_v52 = vcombine.low %v2671_v59, %v2687_v60 }
 0x85a   :  { %2701 = vrot.lane.b32.xlu1 %v2691_v0, %s3356_s27  ;;  %2693 = vrot.lane.b32.xlu0 %v2689_v1, %s3343_s23 }
 0x85e   :  { %2697 = vrot.lane.b32.xlu0 %v2690_v52, %s3355_s26 }
 0x8cc   :  { %v2694_v3 = vpop.permute.xlu0 %2693  ;;  %v2702_v6 = vpop.permute.xlu1 %2701 }
 0x8cd   :  { %v2704_v4 = vsel %vm680_vm2, %v2688_v2, %v2694_v3 }
 0x8d0   :  { %v2698_v5 = vpop.permute.xlu0 %2697 }
 0x8d1   :  { %v2705_v9 = vsel %vm1470_vm3, %v2704_v4, %v2698_v5 }
 0x8d2   :  { %v2706_v10 = vsel %vm1472_vm4, %v2705_v9, %v2702_v6 }
 0x8d3   :  { %3159 = vmatmul.mubr.msk.f32.vlgmr.msra.gmra.mxu0 %vm103_vm0, %v2706_v10 }
 0x993   :  { %v3160_v13 = vpop.f32.mrf.mxu0 }
 0x994   :  { %v2795_v14 = vadd.f32 %v3160_v13, %v3001_v61 }
 0x995   :  { %v2789_v17 = vpop.f32.mrf.mxu0 }
 0x996   :  { %v2799_v7 = vadd.f32 %v3230_v18, %v2795_v14  ;;  %v2790_v8 = vadd.f32 %v3001_v61, %v2789_v17 }
 0x998   :  { %v2798_v36 = vadd.f32 %v3231_v22, %v2790_v8  ;;  %v2803_v40 = vsel %vm103_vm0, %v2799_v7, 0.0 }
 0x999   :  { %2804 = vadd.xlane.f32.xlu1 %v2803_v40 }
 0x99a   :  { %v2800_v51 = vsel %vm103_vm0, %v2798_v36, 0.0 }
 0x99b   :  { %2801 = vadd.xlane.f32.xlu0 %v2800_v51 }
 0xa22   :  { %v2805_v54 = vpop.xlane.xlu1 %2804 }
 0xa23   :  { %v2807_v57 = vmul.f32 0.03125, %v2805_v54 }
 0xa24   :  { %v2802_v11 = vpop.xlane.xlu0 %2801 }
 0xa25   :  { %v2806_v19 = vmul.f32 0.03125, %v2802_v11  ;;  %v2809_v28 = vsub.f32 %v2799_v7, %v2807_v57 }
 0xa27   :  { %v2808_v23 = vsub.f32 %v2798_v36, %v2806_v19  ;;  %v2811_v41 = vmul.f32 %v2809_v28, %v2809_v28 }
 0xa29   :  { %v2810_v24 = vmul.f32 %v2808_v23, %v2808_v23  ;;  %v2815_v39 = vsel %vm103_vm0, %v2811_v41, 0.0 }
 0xa2b   :  { %v2812_v25 = vsel %vm103_vm0, %v2810_v24, 0.0 }
 0xa2c   :  { %2813 = vadd.xlane.f32.xlu0 %v2812_v25 }
 0xa30   :  { %2816 = vadd.xlane.f32.xlu0 %v2815_v39 }
 0xab5   :  { %v2814_v30 = vpop.xlane.xlu0 %2813 }
 0xab6   :  { %v2818_v42 = vmul.f32 0.03125, %v2814_v30 }
 0xab8   :  { %v2820_v31 = vadd.f32 1e-05, %v2818_v42 }
 0xab9   :  { %v2817_v33 = vpop.xlane.xlu0 %2816 }
 0xaba   :  { %3226 = vrsqrt.f32 %v2820_v31  ;;  %v2819_v34 = vmul.f32 0.03125, %v2817_v33 }
 0xabc   :  { %v2821_v35 = vadd.f32 1e-05, %v2819_v34 }
 0xabe   :  { %3228 = vrsqrt.f32 %v2821_v35 }
 0xac7   :  { %v3227_v12 = vpop.eup %3226 }
 0xac8   :  { %v2824_v43 = vmul.f32 %v3227_v12, %v2808_v23 }
 0xaca   :  { %v2832_v46 = vmul.f32 %v3004_v37, %v2824_v43 }
 0xacb   :  { %v3229_v47 = vpop.eup %3228 }
 0xacc   :  { %v2825_v48 = vmul.f32 %v3229_v47, %v2809_v28  ;;  %v2840_v15 = vadd.f32 %v3005_v44, %v2832_v46 }
 0xace   :  { %v2833_v16 = vmul.f32 %v3004_v37, %v2825_v48  ;;  %3169 = vmatprep.mubr.msk.f32.mxu1 %vm103_vm0, %v2840_v15 }
 0xad0   :  { %v2841_v32 = vadd.f32 %v3005_v44, %v2833_v16 }
 0xad2   :  { %3170 = vmatmul.mubr.msk.f32.vlgmr.msra.gmra.mxu1 %vm103_vm0, %v2841_v32 }
 0xb92   :  { %v3171_v21 = vpop.f32.mrf.mxu1 }
 0xb93   :  { %v2930_v45 = vadd.f32 %v3171_v21, %v3006_v20 }
 0xb94   :  { %v2924_v49 = vpop.f32.mrf.mxu1 }
 0xb95   :  { %v2934_v50 = vadd.f32 %v2930_v45, %v2799_v7  ;;  %v2925_v53 = vadd.f32 %v3006_v20, %v2924_v49 }
 0xb97   :  { %2936 = vst.msk [vmem:[#allocation10 + $0x8] sm:$0xff] %vm103_vm0, %v2934_v50  ;;  %v2933_v55 = vadd.f32 %v2925_v53, %v2798_v36 }
 0xb99   :  { %2935 = vst.msk [vmem:[#allocation10] sm:$0xff] %vm103_vm0, %v2933_v55 }
 0xb9a   :  { %3323 = shalt.err (!%p3320_p10)
}
 0xb9b   :  { %2948 = dma.vmem_to_hbm [thread:$0]  %s2943_s15, 256, %s3858_s11, [#allocation4], %s3342_s22, %s3342_s22, %s3343_s23  }
 0xb9c   :  { %3338 = dma.done.wait [#allocation4], 256  }
 0xb9d   :  { %3339 = vsyncadd [#allocation4], 4294967040 }
 0xb9e   :  { %2952 = vsyncpa [#allocation3], 1 }
 0xb9f   :  { %2953 = vsyncpa [#allocation6], 1 }
 0xba0   :  { %2954 = vsyncpa [#allocation9], 1 }
 0xba1   :  { %2955 = vsyncpa [#allocation4], 1 }

// kernel: tpu_custom_call.1
= control target key start
LH: loop header
LB: loop body
LE: loop exit
PB: predicated region body
PF: predicated region fallthrough
CT: control target
= control target key end

     0   :  { %16 = vsyncpa [#allocation3], 0  ;;  %s3847_s0 = inlined_call_operand.hbm [shape: f32[16,32], index: 0, kind: input, shape index: {}]   ;;  %s3848_s1 = inlined_call_operand.vmem [shape: f32[1,32], index: 1, kind: input, shape index: {}]   ;;  %s3849_s2 = inlined_call_operand.vmem [shape: f32[1,32], index: 2, kind: input, shape index: {}]   ;;  %s3850_s3 = inlined_call_operand.vmem [shape: f32[1,32], index: 3, kind: input, shape index: {}]   ;;  %s3851_s4 = inlined_call_operand.vmem [shape: f32[1,32], index: 4, kind: input, shape index: {}]   ;;  %s3852_s5 = inlined_call_operand.hbm [shape: f32[32,96], index: 5, kind: input, shape index: {}]   ;;  %s3853_s6 = inlined_call_operand.vmem [shape: f32[1,96], index: 6, kind: input, shape index: {}]   ;;  %s3854_s7 = inlined_call_operand.hbm [shape: f32[32,32], index: 7, kind: input, shape index: {}]   ;;  %s3855_s8 = inlined_call_operand.vmem [shape: f32[1,32], index: 8, kind: input, shape index: {}]   ;;  %s3856_s9 = inlined_call_operand.hbm [shape: f32[32,32], index: 9, kind: input, shape index: {}]   ;;  %s3857_s10 = inlined_call_operand.vmem [shape: f32[1,32], index: 10, kind: input, shape index: {}]   ;;  %s3858_s11 = inlined_call_operand.hbm [shape: f32[16,32], index: 11, kind: output, shape index: {}]  }
   0x1   :  { %17 = vsyncpa [#allocation6], 0 }
   0x2   :  { %18 = vsyncpa [#allocation9], 0 }
   0x3   :  { %19 = vsyncpa [#allocation4], 0  ;;  %s3340_s17 = smov [#allocation5]   ;;  %s3341_s19 = smov [#allocation2]  }
   0x4   :  { %s45_s18 = sshll.u32 %s3340_s17, 4  ;;  %s25_s20 = sshll.u32 %s3341_s19, 4  ;;  %s46_s18 = int_to_ptr.vmem [resolvable:$true] %s45_s18  ;;  %s26_s20 = int_to_ptr.vmem [resolvable:$true] %s25_s20 }
   0x5   :  { %s3240_s21 = scalar_lea.vmem %s46_s18, 512  ;;  %p3245_p1 = scmp.lt.s32.totalorder %s46_s18, %s46_s18 }
   0x6   :  { %p3241_p0 = scmp.ne.s32.totalorder %s46_s18, %s3240_s21  ;;  %p3246_p2 = scmp.lt.s32.totalorder %s3240_s21, %s3240_s21 }
   0x8   :  { %p3247_p3 = por %p3246_p2, %p3245_p1 }
   0xa   :  { %p3248_p4 = pnand %p3247_p3, %p3241_p0 }
   0xc   :  { %3251 = shalt.err (!%p3248_p4)
}
   0xd   :  { %s3342_s22 = smov 128   ;;  %s3343_s23 = smov 8  }
   0xe   :  { %51 = dma.hbm_to_vmem [thread:$0]  %s3852_s5, 512, %s46_s18, [#allocation6], %s3342_s22, %s3342_s22, %s3343_s23  }
   0xf   :  { %s3260_s26 = scalar_lea.vmem %s26_s20, 256  ;;  %p3265_p6 = scmp.lt.s32.totalorder %s26_s20, %s26_s20 }
  0x10   :  { %p3261_p5 = scmp.ne.s32.totalorder %s26_s20, %s3260_s26  ;;  %p3266_p7 = scmp.lt.s32.totalorder %s3260_s26, %s3260_s26 }
  0x12   :  { %p3267_p8 = por %p3266_p7, %p3265_p6 }
  0x14   :  { %p3268_p9 = pnand %p3267_p8, %p3261_p5 }
  0x16   :  { %3271 = shalt.err (!%p3268_p9)
}
  0x17   :  { %31 = dma.hbm_to_vmem [thread:$0]  %s3847_s0, 256, %s26_s20, [#allocation3], %s3342_s22, %s3342_s22, %s3343_s23  }
  0x18   :  { %s3344_s29 = smov [#allocation7]   ;;  %s3345_s12 = smov [#allocation8]  }
  0x19   :  { %s59_s30 = sshll.u32 %s3344_s29, 4  ;;  %s73_s13 = sshll.u32 %s3345_s12, 4  ;;  %s60_s30 = int_to_ptr.vmem [resolvable:$true] %s59_s30  ;;  %s74_s13 = int_to_ptr.vmem [resolvable:$true] %s73_s13 }
  0x1a   :  { %s3280_s5 = scalar_lea.vmem %s60_s30, 512  ;;  %p3285_p11 = scmp.lt.s32.totalorder %s60_s30, %s60_s30 }
  0x1b   :  { %p3281_p10 = scmp.ne.s32.totalorder %s60_s30, %s3280_s5  ;;  %p3286_p12 = scmp.lt.s32.totalorder %s3280_s5, %s3280_s5 }
  0x1d   :  { %p3287_p13 = por %p3286_p12, %p3285_p11 }
  0x1f   :  { %p3288_p0 = pnand %p3287_p13, %p3281_p10 }
  0x21   :  { %3291 = shalt.err (!%p3288_p0)
}
  0x22   :  { %65 = dma.hbm_to_vmem [thread:$0]  %s3854_s7, 512, %s60_s30, [#allocation6], %s3342_s22, %s3342_s22, %s3343_s23  }
  0x23   :  { %s3300_s0 = scalar_lea.vmem %s74_s13, 512  ;;  %p3305_p2 = scmp.lt.s32.totalorder %s74_s13, %s74_s13 }
  0x24   :  { %p3301_p1 = scmp.ne.s32.totalorder %s74_s13, %s3300_s0  ;;  %p3306_p3 = scmp.lt.s32.totalorder %s3300_s0, %s3300_s0 }
  0x26   :  { %p3307_p4 = por %p3306_p3, %p3305_p2 }
  0x28   :  { %p3308_p5 = pnand %p3307_p4, %p3301_p1 }
  0x2a   :  { %3311 = shalt.err (!%p3308_p5)
}
  0x2b   :  { %79 = dma.hbm_to_vmem [thread:$0]  %s3856_s9, 512, %s74_s13, [#allocation9], %s3342_s22, %s3342_s22, %s3343_s23  }
  0x2c   :  { %3332 = dma.done.wait [#allocation3], 256  }
  0x2d   :  { %3333 = vsyncadd [#allocation3], 4294967040 }
  0x2e   :  { %3334 = dma.done.wait [#allocation6], 1024  }
  0x2f   :  { %3335 = vsyncadd [#allocation6], 4294966272 }
  0x30   :  { %3336 = dma.done.wait [#allocation9], 512  }
  0x31   :  { %3337 = vsyncadd [#allocation9], 4294966784  ;;  %vm103_vm0 = vcmask 261120   ;;  %v94_v0 = vld [vmem:[#allocation2] sm:$0xff]  ;;  %v95_v1 = vld [vmem:[#allocation2 + $0x8] sm:$0xff]  ;;  %s3348_s24 = smov 104   ;;  %v253_v45 = vlaneseq }
  0x32   :  { %v104_v2 = vsel %vm103_vm0, %v94_v0, 0.0  ;;  %v107_v3 = vsel %vm103_vm0, %v95_v1, 0.0  ;;  %v150_v14 = vld [vmem:[#allocation5 + $0x18] sm:$0xff]  ;;  %v149_v15 = vld [vmem:[#allocation5 + $0x10] sm:$0xff]  ;;  %v148_v16 = vld [vmem:[#allocation5 + $0x8] sm:$0xff]  ;;  %s3349_s25 = smov 96  }
  0x33   :  { %105 = vadd.xlane.f32.xlu0 %v104_v2  ;;  %3059 = vmatprep.subr.mxu0 %v150_v14  ;;  %v147_v17 = vld [vmem:[#allocation5] sm:$0xff]  ;;  %v2956_v25 = vld [vmem:[%s3848_s1] ss:$0 sm:$0xff]  ;;  %s3346_s1 = smov 112   ;;  %v3350_v41 = vmov 0.0   ;;  %vm3351_vm1 = vmmov 0  }
  0x34   :  { %3060 = vmatpush3.msra.mxu0 %v150_v14  ;;  %v2957_v27 = vld [vmem:[%s3849_s2] ss:$0 sm:$0xff]  ;;  %s3347_s2 = smov 120   ;;  %3070 = vmatprep.subr.mxu1 %v3350_v41  ;;  %v3352_v43 = vmov 1983009808   ;;  %v254_v47 = vshrl.u32 %v253_v45, 7 }
  0x35   :  { %3061 = vmatprep.subr.mxu0 %v149_v15  ;;  %v2958_v34 = vld [vmem:[%s3853_s6] ss:$0 sm:$0xff]  ;;  %3072 = vmatprep.mubr.msk.f32.mxu1 %vm3351_vm1, %v3350_v41  ;;  %v251_v44 = vunpack.c.l.s4 %v3352_v43  ;;  %v3353_v48 = vmov 1934713408   ;;  %vm680_vm2 = vcmask 64512   ;;  %s3354_s6 = smov 64  }
  0x36   :  { %3062 = vmatpush3.msra.mxu0 %v149_v15  ;;  %v283_v49 = vunpack.c.l.s4 %v3353_v48  ;;  %s3355_s26 = smov 16   ;;  %s3356_s27 = smov 24   ;;  %vm1470_vm3 = vcmask 130048   ;;  %vm1472_vm4 = vcmask 195584  }
  0x37   :  { %108 = vadd.xlane.f32.xlu0 %v107_v3  ;;  %3063 = vmatprep.subr.mxu0 %v148_v16  ;;  %v252_v46 = vunpack.c.0.s8 %v251_v44 }
  0x38   :  { %3064 = vmatpush3.msra.mxu0 %v148_v16  ;;  %v284_v55 = vunpack.c.0.s8 %v283_v49 }
  0x39   :  { %3065 = vmatprep.subr.mxu0 %v147_v17  ;;  %v3491_v52 = vsub.s32 %v252_v46, %v254_v47 }
  0x3a   :  { %3066 = vmatpush3.msra.mxu0 %v147_v17  ;;  %v3501_v61 = vsub.s32 %v284_v55, %v254_v47 }
  0x3b   :  { %3080 = vmatprep.subr.mxu0 %v3350_v41 }
  0xbc   :  { %v106_v4 = vpop.xlane.xlu0 %105 }
  0xbd   :  { %v111_v5 = vmul.f32 0.03125, %v106_v4 }
  0xbf   :  { %v113_v6 = vsub.f32 %v94_v0, %v111_v5 }
  0xc0   :  { %v109_v7 = vpop.xlane.xlu0 %108 }
  0xc1   :  { %v112_v8 = vmul.f32 0.03125, %v109_v7  ;;  %v115_v9 = vmul.f32 %v113_v6, %v113_v6 }
  0xc3   :  { %v114_v10 = vsub.f32 %v95_v1, %v112_v8  ;;  %v117_v11 = vsel %vm103_vm0, %v115_v9, 0.0 }
  0xc4   :  { %118 = vadd.xlane.f32.xlu1 %v117_v11 }
  0xc5   :  { %v116_v12 = vmul.f32 %v114_v10, %v114_v10 }
  0xc7   :  { %v120_v13 = vsel %vm103_vm0, %v116_v12, 0.0 }
  0xc8   :  { %121 = vadd.xlane.f32.xlu1 %v120_v13 }
 0x14d   :  { %v119_v18 = vpop.xlane.xlu1 %118 }
 0x14e   :  { %v123_v19 = vmul.f32 0.03125, %v119_v18 }
 0x150   :  { %v125_v20 = vadd.f32 1e-05, %v123_v19 }
 0x151   :  { %v122_v21 = vpop.xlane.xlu1 %121 }
 0x152   :  { %3190 = vrsqrt.f32 %v125_v20  ;;  %v124_v22 = vmul.f32 0.03125, %v122_v21 }
 0x154   :  { %v126_v23 = vadd.f32 1e-05, %v124_v22 }
 0x156   :  { %3192 = vrsqrt.f32 %v126_v23 }
 0x15f   :  { %v3191_v24 = vpop.eup %3190 }
 0x160   :  { %v129_v26 = vmul.f32 %v3191_v24, %v113_v6 }
 0x162   :  { %v137_v28 = vmul.f32 %v2956_v25, %v129_v26 }
 0x163   :  { %v3193_v29 = vpop.eup %3192 }
 0x164   :  { %v130_v30 = vmul.f32 %v3193_v29, %v114_v10  ;;  %v145_v31 = vadd.f32 %v2957_v27, %v137_v28 }
 0x166   :  { %v138_v32 = vmul.f32 %v2956_v25, %v130_v30  ;;  %3067 = vmatprep.mubr.msk.f32.mxu0 %vm103_vm0, %v145_v31 }
 0x168   :  { %v146_v33 = vadd.f32 %v2957_v27, %v138_v32 }
 0x16a   :  { %3068 = vmatmul.mubr.msk.f32.vlgmr.msra.gmra.mxu0 %vm103_vm0, %v146_v33 }
 0x16b   :  { %3082 = vmatprep.mubr.msk.f32.mxu0 %vm3351_vm1, %v3350_v41 }
 0x22a   :  { %v3069_v35 = vpop.f32.mrf.mxu0 }
 0x22b   :  { %v3457_v36 = vadd.f32 %v3069_v35, %v2958_v34 }
 0x22c   :  { %v229_v37 = vpop.f32.mrf.mxu0 }
 0x22d   :  { %v3459_v38 = vadd.f32 %v2958_v34, %v229_v37 }
 0x22f   :  { %242 = vrot.lane.b32.xlu1 %v3459_v38, %s3346_s1  ;;  %239 = vrot.lane.b32.xlu0 %v3459_v38, %s3347_s2 }
 0x233   :  { %245 = vrot.lane.b32.xlu1 %v3459_v38, %s3348_s24 }
 0x237   :  { %384 = vrot.lane.b32.xlu1 %v3459_v38, %s3349_s25 }
 0x2a1   :  { %v3469_v39 = vpop.permute.xlu1 %242  ;;  %v3471_v40 = vpop.permute.xlu0 %239 }
 0x2a2   :  { %388 = vrot.lane.b32.xlu1 %v3469_v39, %s3349_s25  ;;  %386 = vrot.lane.b32.xlu0 %v3471_v40, %s3349_s25  ;;  %v248_v53 = vcombine.low %v3459_v38, %v3469_v39  ;;  %v249_v54 = vcombine.high %v3459_v38, %v3469_v39 }
 0x2a4   :  { %v256_v59 = vrot.slane %v248_v53, %v3491_v52  ;;  %v263_v60 = vrot.slane %v249_v54, %v3491_v52 }
 0x2a5   :  { %v3479_v42 = vpop.permute.xlu1 %245 }
 0x2a6   :  { %390 = vrot.lane.b32.xlu0 %v3479_v42, %s3349_s25  ;;  %v264_v50 = vcombine.low %v3471_v40, %v3479_v42  ;;  %v265_v51 = vcombine.high %v3471_v40, %v3479_v42 }
 0x2a8   :  { %v272_v56 = vrot.slane %v264_v50, %v3491_v52  ;;  %v279_v57 = vrot.slane %v265_v51, %v3491_v52 }
 0x2a9   :  { %v385_v58 = vpop.permute.xlu1 %384 }
 0x2aa   :  { %v280_v62 = vcombine.low %v256_v59, %v272_v56  ;;  %v281_v63 = vcombine.high %v256_v59, %v272_v56  ;;  %v296_v0 = vcombine.low %v263_v60, %v279_v57  ;;  %v297_v1 = vcombine.high %v263_v60, %v279_v57 }
 0x2ac   :  { %v288_v6 = vrot.slane %v280_v62, %v3501_v61  ;;  %v295_v7 = vrot.slane %v281_v63, %v3501_v61  ;;  %v304_v8 = vrot.slane %v296_v0, %v3501_v61  ;;  %v311_v9 = vrot.slane %v297_v1, %v3501_v61 }
 0x2ae   :  { %v316_v17 = vcombine.low %v288_v6, %v295_v7  ;;  %v2961_v18 = vcombine.high %v288_v6, %v295_v7  ;;  %v332_v19 = vcombine.low %v304_v8, %v311_v9  ;;  %v2962_v20 = vcombine.high %v304_v8, %v311_v9 }
 0x2b0   :  { %v323_v29 = vrot.slane %v316_v17, %v3491_v52  ;;  %v331_v30 = vrot.slane %v2961_v18, %v3491_v52  ;;  %v339_v31 = vrot.slane %v332_v19, %v3491_v52  ;;  %v347_v32 = vrot.slane %v2962_v20, %v3491_v52 }
 0x2b2   :  { %v348_v47 = vcombine.low %v323_v29, %v331_v30  ;;  %v349_v48 = vcombine.high %v323_v29, %v331_v30  ;;  %v364_v49 = vcombine.low %v339_v31, %v347_v32  ;;  %v365_v50 = vcombine.high %v339_v31, %v347_v32 }
 0x2b4   :  { %v356_v60 = vrot.slane %v348_v47, %v3501_v61  ;;  %v372_v62 = vrot.slane %v364_v49, %v3501_v61  ;;  %v363_v63 = vrot.slane %v349_v48, %v3501_v61  ;;  %v379_v0 = vrot.slane %v365_v50, %v3501_v61 }
 0x2b6   :  { %v381_v6 = vcombine.high %v356_v60, %v372_v62  ;;  %v383_v8 = vcombine.high %v363_v63, %v379_v0 }
 0x314   :  { %v389_v2 = vpop.permute.xlu1 %388  ;;  %v387_v3 = vpop.permute.xlu0 %386 }
 0x315   :  { %v396_v4 = vcombine.low %v385_v58, %v389_v2  ;;  %v397_v5 = vcombine.high %v385_v58, %v389_v2 }
 0x317   :  { %v404_v13 = vrot.slane %v396_v4, %v3491_v52  ;;  %v411_v14 = vrot.slane %v397_v5, %v3491_v52  ;;  %v382_v4 = vcombine.low %v363_v63, %v379_v0 }
 0x318   :  { %v391_v10 = vpop.permute.xlu0 %390 }
 0x319   :  { %v412_v11 = vcombine.low %v387_v3, %v391_v10  ;;  %v413_v12 = vcombine.high %v387_v3, %v391_v10  ;;  %v380_v3 = vcombine.low %v356_v60, %v372_v62 }
 0x31b   :  { %v420_v15 = vrot.slane %v412_v11, %v3491_v52  ;;  %v427_v16 = vrot.slane %v413_v12, %v3491_v52 }
 0x31d   :  { %v428_v21 = vcombine.low %v404_v13, %v420_v15  ;;  %v429_v22 = vcombine.high %v404_v13, %v420_v15  ;;  %v444_v23 = vcombine.low %v411_v14, %v427_v16  ;;  %v445_v24 = vcombine.high %v411_v14, %v427_v16 }
 0x31f   :  { %v436_v25 = vrot.slane %v428_v21, %v3501_v61  ;;  %v443_v26 = vrot.slane %v429_v22, %v3501_v61  ;;  %v452_v27 = vrot.slane %v444_v23, %v3501_v61  ;;  %v459_v28 = vrot.slane %v445_v24, %v3501_v61 }
 0x321   :  { %v464_v33 = vcombine.low %v436_v25, %v443_v26  ;;  %v2963_v34 = vcombine.high %v436_v25, %v443_v26  ;;  %v480_v35 = vcombine.low %v452_v27, %v459_v28  ;;  %v2964_v37 = vcombine.high %v452_v27, %v459_v28 }
 0x323   :  { %v471_v43 = vrot.slane %v464_v33, %v3491_v52  ;;  %v479_v44 = vrot.slane %v2963_v34, %v3491_v52  ;;  %v487_v45 = vrot.slane %v480_v35, %v3491_v52  ;;  %v495_v46 = vrot.slane %v2964_v37, %v3491_v52 }
 0x325   :  { %v496_v51 = vcombine.low %v471_v43, %v479_v44  ;;  %v497_v53 = vcombine.high %v471_v43, %v479_v44  ;;  %v512_v54 = vcombine.low %v487_v45, %v495_v46  ;;  %v513_v55 = vcombine.high %v487_v45, %v495_v46 }
 0x327   :  { %v504_v56 = vrot.slane %v496_v51, %v3501_v61  ;;  %v520_v57 = vrot.slane %v512_v54, %v3501_v61  ;;  %v511_v58 = vrot.slane %v497_v53, %v3501_v61  ;;  %v527_v59 = vrot.slane %v513_v55, %v3501_v61 }
 0x329   :  { %v528_v1 = vcombine.low %v504_v56, %v520_v57  ;;  %v530_v2 = vcombine.low %v511_v58, %v527_v59  ;;  %v529_v5 = vcombine.high %v504_v56, %v520_v57  ;;  %v531_v7 = vcombine.high %v511_v58, %v527_v59 }
 0x32b   :  { %3071 = vmatpush3.xpose.msk.msra.mxu1 %vm680_vm2, %v528_v1  ;;  %3081 = vmatpush3.xpose.msk.msra.mxu0 %vm680_vm2, %v530_v2 }
 0x32c   :  { %3075 = vmatprep.subr.mxu1 %v3350_v41  ;;  %3090 = vmatprep.subr.mxu0 %v3350_v41 }
 0x32e   :  { %3073 = vmatmul.mubr.msk.f32.vlgmr.msra.gmra.mxu1 %vm680_vm2, %v380_v3  ;;  %3083 = vmatmul.mubr.msk.f32.vlgmr.msra.gmra.mxu0 %vm680_vm2, %v382_v4 }
 0x32f   :  { %3076 = vmatpush3.xpose.msk.msra.mxu1 %vm680_vm2, %v529_v5  ;;  %3077 = vmatprep.mubr.msk.f32.mxu1 %vm3351_vm1, %v3350_v41 }
 0x330   :  { %3085 = vmatprep.subr.mxu1 %v3350_v41  ;;  %3092 = vmatprep.mubr.msk.f32.mxu0 %vm3351_vm1, %v3350_v41 }
 0x332   :  { %3078 = vmatmul.mubr.msk.f32.vlgmr.msra.gmra.mxu1 %vm680_vm2, %v381_v6 }
 0x333   :  { %3086 = vmatpush3.xpose.msk.msra.mxu1 %vm680_vm2, %v531_v7  ;;  %3087 = vmatprep.mubr.msk.f32.mxu1 %vm3351_vm1, %v3350_v41 }
 0x334   :  { %3095 = vmatprep.subr.mxu1 %v3350_v41 }
 0x336   :  { %3088 = vmatmul.mubr.msk.f32.vlgmr.msra.gmra.mxu1 %vm680_vm2, %v383_v8 }
 0x337   :  { %3097 = vmatprep.mubr.msk.f32.mxu1 %vm3351_vm1, %v3350_v41 }
 0x3ee   :  { %v753_v9 = vpop.f32.mrf.mxu1  ;;  %v905_v10 = vpop.f32.mrf.mxu0 }
 0x3ef   :  { %v991_v11 = vsel %vm680_vm2, %v905_v10, -inf  ;;  %v985_v12 = vsel %vm680_vm2, %v753_v9, -inf }
 0x3f0   :  { %992 = vmax.xlane.f32.xlu0 %v991_v11  ;;  %v3084_v13 = vpop.f32.mrf.mxu0  ;;  %986 = vmax.xlane.f32.xlu1 %v985_v12  ;;  %v3074_v14 = vpop.f32.mrf.mxu1 }
 0x3f2   :  { %v829_v15 = vpop.f32.mrf.mxu1 }
 0x3f3   :  { %v988_v16 = vsel %vm680_vm2, %v829_v15, -inf }
 0x3f4   :  { %989 = vmax.xlane.f32.xlu0 %v988_v16  ;;  %v3079_v17 = vpop.f32.mrf.mxu1 }
 0x3f6   :  { %v981_v18 = vpop.f32.mrf.mxu1 }
 0x3f7   :  { %v994_v19 = vsel %vm680_vm2, %v981_v18, -inf }
 0x3f8   :  { %995 = vmax.xlane.f32.xlu0 %v994_v19  ;;  %v3089_v20 = vpop.f32.mrf.mxu1 }
 0x401   :  { %1475 = vrot.lane.b32.xlu1 %v3457_v36, %s3347_s2 }
 0x405   :  { %1481 = vrot.lane.b32.xlu1 %v3457_v36, %s3348_s24 }
 0x409   :  { %534 = vrot.lane.b32.xlu1 %v3471_v40, %s3354_s6 }
 0x40d   :  { %536 = vrot.lane.b32.xlu1 %v3469_v39, %s3354_s6 }
 0x40e   :  { %1478 = vrot.lane.b32.xlu0 %v3457_v36, %s3346_s1 }
 0x411   :  { %538 = vrot.lane.b32.xlu1 %v3479_v42, %s3354_s6 }
 0x412   :  { %532 = vrot.lane.b32.xlu0 %v3459_v38, %s3354_s6 }
 0x416   :  { %1620 = vrot.lane.b32.xlu0 %v3457_v36, %s3349_s25 }
 0x479   :  { %v993_v21 = vpop.xlane.xlu0 %992  ;;  %v987_v22 = vpop.xlane.xlu1 %986 }
 0x47a   :  { %v999_v23 = vsub.f32 %v905_v10, %v993_v21  ;;  %v997_v29 = vsub.f32 %v753_v9, %v987_v22 }
 0x47c   :  { %v1005_v24 = vmul.f32 1.442695, %v999_v23  ;;  %v1001_v33 = vmul.f32 1.442695, %v997_v29 }
 0x47d   :  { %v3571_v40 = vpop.permute.xlu1 %1475  ;;  %v990_v25 = vpop.xlane.xlu0 %989 }
 0x47e   :  { %3194 = vpow2.f32 %v1005_v24  ;;  %v998_v39 = vsub.f32 %v829_v15, %v990_v25  ;;  %1622 = vrot.lane.b32.xlu1 %v3571_v40, %s3349_s25 }
 0x480   :  { %v1003_v26 = vmul.f32 1.442695, %v998_v39 }
 0x481   :  { %v3575_v42 = vpop.permute.xlu1 %1481  ;;  %v996_v27 = vpop.xlane.xlu0 %995 }
 0x482   :  { %3196 = vpow2.f32 %v1003_v26  ;;  %v1000_v34 = vsub.f32 %v981_v18, %v996_v27  ;;  %v1500_v27 = vcombine.low %v3571_v40, %v3575_v42 }
 0x483   :  { %3198 = vpow2.f32 %v1001_v33 }
 0x484   :  { %v1007_v48 = vmul.f32 1.442695, %v1000_v34 }
 0x485   :  { %v535_v38 = vpop.permute.xlu1 %534  ;;  %v3577_v28 = vpop.permute.xlu0 %1478 }
 0x486   :  { %3200 = vpow2.f32 %v1007_v48  ;;  %v1484_v26 = vcombine.low %v3457_v36, %v3577_v28 }
 0x488   :  { %v1492_v33 = vrot.slane %v1484_v26, %v3491_v52 }
 0x489   :  { %v537_v30 = vpop.permute.xlu1 %536  ;;  %v533_v31 = vpop.permute.xlu0 %532 }
 0x48a   :  { %v544_v35 = vcombine.low %v533_v31, %v537_v30  ;;  %v545_v37 = vcombine.high %v533_v31, %v537_v30  ;;  %v1501_v31 = vcombine.high %v3571_v40, %v3575_v42 }
 0x48b   :  { %v3579_v32 = vpop.eup %3194 }
 0x48c   :  { %v1015_v44 = vsel %vm680_vm2, %v3579_v32, 0.0  ;;  %v552_v49 = vrot.slane %v544_v35, %v3491_v52  ;;  %v559_v50 = vrot.slane %v545_v37, %v3491_v52  ;;  %v1508_v35 = vrot.slane %v1500_v27, %v3491_v52 }
 0x48d   :  { %v539_v43 = vpop.permute.xlu1 %538  ;;  %1016 = vadd.xlane.f32.xlu0 %v1015_v44  ;;  %v1621_v24 = vpop.permute.xlu0 %1620  ;;  %v1515_v44 = vrot.slane %v1501_v31, %v3491_v52 }
 0x48e   :  { %v560_v46 = vcombine.low %v535_v38, %v539_v43  ;;  %v561_v47 = vcombine.high %v535_v38, %v539_v43  ;;  %v1485_v38 = vcombine.high %v3457_v36, %v3577_v28 }
 0x48f   :  { %v3583_v45 = vpop.eup %3196 }
 0x490   :  { %v568_v51 = vrot.slane %v560_v46, %v3491_v52  ;;  %v575_v53 = vrot.slane %v561_v47, %v3491_v52  ;;  %v1012_v54 = vsel %vm680_vm2, %v3583_v45, 0.0  ;;  %v3599_v12 = vpop.eup %3198  ;;  %v1499_v37 = vrot.slane %v1485_v38, %v3491_v52 }
 0x491   :  { %1013 = vadd.xlane.f32.xlu0 %v1012_v54  ;;  %v1009_v22 = vsel %vm680_vm2, %v3599_v12, 0.0  ;;  %v1516_v46 = vcombine.low %v1492_v33, %v1508_v35  ;;  %v1517_v47 = vcombine.high %v1492_v33, %v1508_v35 }
 0x492   :  { %v576_v55 = vcombine.low %v552_v49, %v568_v51  ;;  %v577_v56 = vcombine.high %v552_v49, %v568_v51  ;;  %v592_v57 = vcombine.low %v559_v50, %v575_v53  ;;  %v593_v58 = vcombine.high %v559_v50, %v575_v53 }
 0x493   :  { %v3613_v21 = vpop.eup %3200  ;;  %v1532_v48 = vcombine.low %v1499_v37, %v1515_v44  ;;  %v1524_v51 = vrot.slane %v1516_v46, %v3501_v61  ;;  %v1531_v53 = vrot.slane %v1517_v47, %v3501_v61 }
 0x494   :  { %v584_v59 = vrot.slane %v576_v55, %v3501_v61  ;;  %v591_v60 = vrot.slane %v577_v56, %v3501_v61  ;;  %v600_v62 = vrot.slane %v592_v57, %v3501_v61  ;;  %v607_v63 = vrot.slane %v593_v58, %v3501_v61 }
 0x495   :  { %v1018_v23 = vsel %vm680_vm2, %v3613_v21, 0.0  ;;  %v1540_v56 = vrot.slane %v1532_v48, %v3501_v61 }
 0x496   :  { %v612_v0 = vcombine.low %v584_v59, %v591_v60  ;;  %v2965_v1 = vcombine.high %v584_v59, %v591_v60  ;;  %v628_v2 = vcombine.low %v600_v62, %v607_v63  ;;  %v2966_v3 = vcombine.high %v600_v62, %v607_v63 }
 0x497   :  { %v1552_v62 = vcombine.low %v1524_v51, %v1531_v53  ;;  %v2981_v63 = vcombine.high %v1524_v51, %v1531_v53 }
 0x498   :  { %v619_v4 = vrot.slane %v612_v0, %v3491_v52  ;;  %v627_v5 = vrot.slane %v2965_v1, %v3491_v52  ;;  %v635_v6 = vrot.slane %v628_v2, %v3491_v52  ;;  %v643_v7 = vrot.slane %v2966_v3, %v3491_v52 }
 0x49a   :  { %v644_v8 = vcombine.low %v619_v4, %v627_v5  ;;  %v660_v9 = vcombine.low %v635_v6, %v643_v7  ;;  %v645_v10 = vcombine.high %v619_v4, %v627_v5  ;;  %v661_v11 = vcombine.high %v635_v6, %v643_v7 }
 0x49c   :  { %v652_v13 = vrot.slane %v644_v8, %v3501_v61  ;;  %v668_v14 = vrot.slane %v660_v9, %v3501_v61  ;;  %v3604_v15 = vrot.slane %v645_v10, %v3501_v61  ;;  %v3607_v16 = vrot.slane %v661_v11, %v3501_v61 }
 0x49d   :  { %v1559_v11 = vrot.slane %v1552_v62, %v3491_v52 }
 0x49e   :  { %v676_v17 = vcombine.low %v652_v13, %v668_v14  ;;  %v677_v18 = vcombine.high %v652_v13, %v668_v14  ;;  %v679_v19 = vcombine.high %v3604_v15, %v3607_v16  ;;  %v678_v20 = vcombine.low %v3604_v15, %v3607_v16 }
 0x49f   :  { %v1567_v13 = vrot.slane %v2981_v63, %v3491_v52 }
 0x4a0   :  { %3091 = vmatpush3.msra.mxu0 %v676_v17  ;;  %3096 = vmatpush3.msra.mxu1 %v677_v18 }
 0x4a1   :  { %3105 = vmatprep.subr.mxu1 %v3350_v41  ;;  %3100 = vmatprep.subr.mxu0 %v3350_v41 }
 0x4a2   :  { %1010 = vadd.xlane.f32.xlu1 %v1009_v22 }
 0x4a6   :  { %1019 = vadd.xlane.f32.xlu1 %v1018_v23 }
 0x4a7   :  { %1624 = vrot.lane.b32.xlu0 %v3577_v28, %s3349_s25 }
 0x4b7   :  { %1626 = vrot.lane.b32.xlu1 %v3575_v42, %s3349_s25 }
 0x4f0   :  { %v1623_v29 = vpop.permute.xlu1 %1622 }
 0x516   :  { %v1017_v25 = vpop.xlane.xlu0 %1016 }
 0x51a   :  { %v1014_v39 = vpop.xlane.xlu0 %1013 }
 0x51b   :  { %3202 = vrcp.f32 %v1014_v39 }
 0x51e   :  { %v1625_v49 = vpop.permute.xlu0 %1624 }
 0x51f   :  { %v1632_v54 = vcombine.low %v1621_v24, %v1625_v49  ;;  %v1633_v55 = vcombine.high %v1621_v24, %v1625_v49 }
 0x521   :  { %v1640_v0 = vrot.slane %v1632_v54, %v3491_v52  ;;  %v1647_v1 = vrot.slane %v1633_v55, %v3491_v52 }
 0x528   :  { %v3203_v30 = vpop.eup %3202 }
 0x529   :  { %v1026_v34 = vmul.f32 %v3203_v30, %v3583_v45  ;;  %v1533_v45 = vcombine.high %v1499_v37, %v1515_v44  ;;  %v1584_v30 = vcombine.low %v1559_v11, %v1567_v13 }
 0x52b   :  { %v1011_v43 = vpop.xlane.xlu1 %1010  ;;  %3098 = vmatmul.mubr.msk.f32.vlgmr.msra.gmra.mxu1 %vm680_vm2, %v1026_v34  ;;  %v1547_v57 = vrot.slane %v1533_v45, %v3501_v61 }
 0x52c   :  { %3204 = vrcp.f32 %v1011_v43  ;;  %3106 = vmatpush3.msra.mxu1 %v679_v19  ;;  %3107 = vmatprep.mubr.msk.f32.mxu1 %vm3351_vm1, %v3350_v41 }
 0x52d   :  { %3115 = vmatprep.subr.mxu1 %v3350_v41  ;;  %3206 = vrcp.f32 %v1017_v25  ;;  %v1568_v4 = vcombine.low %v1540_v56, %v1547_v57  ;;  %v2982_v5 = vcombine.high %v1540_v56, %v1547_v57 }
 0x52f   :  { %v1020_v50 = vpop.xlane.xlu1 %1019  ;;  %v1575_v22 = vrot.slane %v1568_v4, %v3491_v52  ;;  %v1583_v23 = vrot.slane %v2982_v5, %v3491_v52 }
 0x530   :  { %3208 = vrcp.f32 %v1020_v50 }
 0x531   :  { %v1600_v43 = vcombine.low %v1575_v22, %v1583_v23  ;;  %v1601_v45 = vcombine.high %v1575_v22, %v1583_v23 }
 0x533   :  { %v1627_v58 = vpop.permute.xlu1 %1626  ;;  %v1615_v57 = vrot.slane %v1601_v45, %v3501_v61 }
 0x534   :  { %v1648_v59 = vcombine.low %v1623_v29, %v1627_v58  ;;  %v1649_v60 = vcombine.high %v1623_v29, %v1627_v58 }
 0x536   :  { %v1656_v2 = vrot.slane %v1648_v59, %v3491_v52  ;;  %v1663_v3 = vrot.slane %v1649_v60, %v3491_v52 }
 0x538   :  { %v1664_v6 = vcombine.low %v1640_v0, %v1656_v2  ;;  %v1665_v7 = vcombine.high %v1640_v0, %v1656_v2  ;;  %v1680_v8 = vcombine.low %v1647_v1, %v1663_v3  ;;  %v1681_v9 = vcombine.high %v1647_v1, %v1663_v3 }
 0x539   :  { %v3205_v10 = vpop.eup %3204 }
 0x53a   :  { %v1672_v14 = vrot.slane %v1664_v6, %v3501_v61  ;;  %v1679_v17 = vrot.slane %v1665_v7, %v3501_v61  ;;  %v1688_v18 = vrot.slane %v1680_v8, %v3501_v61  ;;  %v1695_v19 = vrot.slane %v1681_v9, %v3501_v61  ;;  %v3207_v25 = vpop.eup %3206 }
 0x53b   :  { %v1025_v24 = vmul.f32 %v3205_v10, %v3599_v12  ;;  %v1027_v12 = vmul.f32 %v3207_v25, %v3579_v32  ;;  %v1585_v32 = vcombine.high %v1559_v11, %v1567_v13 }
 0x53c   :  { %v1700_v39 = vcombine.low %v1672_v14, %v1679_v17  ;;  %v2983_v26 = vcombine.high %v1672_v14, %v1679_v17  ;;  %v1716_v27 = vcombine.low %v1688_v18, %v1695_v19  ;;  %v2984_v38 = vcombine.high %v1688_v18, %v1695_v19 }
 0x53d   :  { %v3209_v29 = vpop.eup %3208  ;;  %3093 = vmatmul.mubr.msk.f32.vlgmr.msra.gmra.mxu0 %vm680_vm2, %v1025_v24  ;;  %v1599_v54 = vrot.slane %v1585_v32, %v3501_v61 }
 0x53e   :  { %v1707_v31 = vrot.slane %v1700_v39, %v3491_v52  ;;  %v1715_v33 = vrot.slane %v2983_v26, %v3491_v52  ;;  %v1723_v34 = vrot.slane %v1716_v27, %v3491_v52  ;;  %v1731_v35 = vrot.slane %v2984_v38, %v3491_v52  ;;  %3101 = vmatpush3.msra.mxu0 %v678_v20 }
 0x53f   :  { %3102 = vmatprep.mubr.msk.f32.mxu0 %vm3351_vm1, %v3350_v41  ;;  %v1028_v37 = vmul.f32 %v3209_v29, %v3613_v21  ;;  %3110 = vmatprep.subr.mxu0 %v3350_v41  ;;  %v1592_v20 = vrot.slane %v1584_v30, %v3501_v61  ;;  %v1608_v21 = vrot.slane %v1600_v43, %v3501_v61 }
 0x540   :  { %v1732_v44 = vcombine.low %v1707_v31, %v1715_v33  ;;  %v1733_v46 = vcombine.high %v1707_v31, %v1715_v33  ;;  %v1748_v47 = vcombine.low %v1723_v34, %v1731_v35  ;;  %v1749_v48 = vcombine.high %v1723_v34, %v1731_v35 }
 0x541   :  { %3103 = vmatmul.mubr.msk.f32.vlgmr.msra.gmra.mxu0 %vm680_vm2, %v1027_v12  ;;  %3108 = vmatmul.mubr.msk.f32.vlgmr.msra.gmra.mxu1 %vm680_vm2, %v1028_v37  ;;  %v1616_v55 = vcombine.low %v1592_v20, %v1608_v21  ;;  %v1617_v56 = vcombine.high %v1592_v20, %v1608_v21  ;;  %v1618_v60 = vcombine.low %v1599_v54, %v1615_v57 }
 0x542   :  { %v1740_v15 = vrot.slane %v1732_v44, %v3501_v61  ;;  %v1756_v16 = vrot.slane %v1748_v47, %v3501_v61  ;;  %3112 = vmatprep.mubr.msk.f32.mxu0 %vm3351_vm1, %v3350_v41  ;;  %3117 = vmatprep.mubr.msk.f32.mxu1 %vm3351_vm1, %v3350_v41  ;;  %v1747_v51 = vrot.slane %v1733_v46, %v3501_v61 }
 0x543   :  { %v1763_v53 = vrot.slane %v1749_v48, %v3501_v61  ;;  %v1619_v62 = vcombine.high %v1599_v54, %v1615_v57 }
 0x544   :  { %v1764_v49 = vcombine.low %v1740_v15, %v1756_v16  ;;  %v1765_v50 = vcombine.high %v1740_v15, %v1756_v16 }
 0x545   :  { %v1766_v58 = vcombine.low %v1747_v51, %v1763_v53  ;;  %v1767_v59 = vcombine.high %v1747_v51, %v1763_v53 }
 0x546   :  { %3111 = vmatpush3.xpose.msk.msra.mxu0 %vm680_vm2, %v1764_v49  ;;  %3116 = vmatpush3.xpose.msk.msra.mxu1 %vm680_vm2, %v1765_v50 }
 0x547   :  { %3120 = vmatprep.subr.mxu0 %v3350_v41  ;;  %3125 = vmatprep.subr.mxu1 %v3350_v41 }
 0x549   :  { %3113 = vmatmul.mubr.msk.f32.vlgmr.msra.gmra.mxu0 %vm680_vm2, %v1616_v55  ;;  %3118 = vmatmul.mubr.msk.f32.vlgmr.msra.gmra.mxu1 %vm680_vm2, %v1617_v56 }
 0x54a   :  { %3121 = vmatpush3.xpose.msk.msra.mxu0 %vm680_vm2, %v1766_v58  ;;  %3126 = vmatpush3.xpose.msk.msra.mxu1 %vm680_vm2, %v1767_v59 }
 0x54b   :  { %3122 = vmatprep.mubr.msk.f32.mxu0 %vm3351_vm1, %v3350_v41  ;;  %3127 = vmatprep.mubr.msk.f32.mxu1 %vm3351_vm1, %v3350_v41 }
 0x54c   :  { %3130 = vmatprep.subr.mxu0 %v3350_v41  ;;  %3135 = vmatprep.subr.mxu1 %v3350_v41 }
 0x54d   :  { %3123 = vmatmul.mubr.msk.f32.vlgmr.msra.gmra.mxu0 %vm680_vm2, %v1618_v60  ;;  %3128 = vmatmul.mubr.msk.f32.vlgmr.msra.gmra.mxu1 %vm680_vm2, %v1619_v62 }
 0x54e   :  { %3132 = vmatprep.mubr.msk.f32.mxu0 %vm3351_vm1, %v3350_v41  ;;  %3137 = vmatprep.mubr.msk.f32.mxu1 %vm3351_vm1, %v3350_v41 }
 0x5eb   :  { %v1171_v63 = vpop.f32.mrf.mxu1 }
 0x5ed   :  { %v3099_v0 = vpop.f32.mrf.mxu1 }
 0x5fd   :  { %v1098_v1 = vpop.f32.mrf.mxu0 }
 0x5ff   :  { %v3094_v2 = vpop.f32.mrf.mxu0 }
 0x601   :  { %v1244_v3 = vpop.f32.mrf.mxu0  ;;  %v1317_v4 = vpop.f32.mrf.mxu1 }
 0x602   :  { %v1321_v5 = vcombine.low %v1098_v1, %v1244_v3  ;;  %v1322_v6 = vcombine.high %v1098_v1, %v1244_v3  ;;  %v1337_v7 = vcombine.low %v1171_v63, %v1317_v4  ;;  %v1338_v8 = vcombine.high %v1171_v63, %v1317_v4 }
 0x603   :  { %v3104_v9 = vpop.f32.mrf.mxu0  ;;  %v3109_v10 = vpop.f32.mrf.mxu1 }
 0x604   :  { %v1329_v11 = vrot.slane %v1321_v5, %v3491_v52  ;;  %v1336_v13 = vrot.slane %v1322_v6, %v3491_v52  ;;  %v1345_v14 = vrot.slane %v1337_v7, %v3491_v52  ;;  %v1352_v17 = vrot.slane %v1338_v8, %v3491_v52 }
 0x606   :  { %v1353_v18 = vcombine.low %v1329_v11, %v1345_v14  ;;  %v1354_v19 = vcombine.high %v1329_v11, %v1345_v14  ;;  %v1369_v22 = vcombine.low %v1336_v13, %v1352_v17  ;;  %v1370_v23 = vcombine.high %v1336_v13, %v1352_v17 }
 0x608   :  { %v1361_v24 = vrot.slane %v1353_v18, %v3501_v61  ;;  %v1368_v25 = vrot.slane %v1354_v19, %v3501_v61  ;;  %v1377_v39 = vrot.slane %v1369_v22, %v3501_v61  ;;  %v1384_v26 = vrot.slane %v1370_v23, %v3501_v61 }
 0x609   :  { %v1988_v27 = vpop.f32.mrf.mxu0  ;;  %v2064_v38 = vpop.f32.mrf.mxu1 }
 0x60a   :  { %v2220_v29 = vsel %vm680_vm2, %v1988_v27, -inf  ;;  %v2223_v30 = vsel %vm680_vm2, %v2064_v38, -inf  ;;  %v1389_v31 = vcombine.low %v1361_v24, %v1368_v25  ;;  %v2979_v33 = vcombine.high %v1361_v24, %v1368_v25 }
 0x60b   :  { %2221 = vmax.xlane.f32.xlu0 %v2220_v29  ;;  %v3114_v34 = vpop.f32.mrf.mxu0  ;;  %2224 = vmax.xlane.f32.xlu1 %v2223_v30  ;;  %v3119_v35 = vpop.f32.mrf.mxu1  ;;  %v1405_v12 = vcombine.low %v1377_v39, %v1384_v26  ;;  %v2980_v37 = vcombine.high %v1377_v39, %v1384_v26 }
 0x60c   :  { %v1396_v43 = vrot.slane %v1389_v31, %v3491_v52  ;;  %v1404_v44 = vrot.slane %v2979_v33, %v3491_v52 }
 0x60d   :  { %v2140_v46 = vpop.f32.mrf.mxu0  ;;  %v2216_v47 = vpop.f32.mrf.mxu1  ;;  %v1412_v48 = vrot.slane %v1405_v12, %v3491_v52  ;;  %v1420_v15 = vrot.slane %v2980_v37, %v3491_v52 }
 0x60e   :  { %v2226_v16 = vsel %vm680_vm2, %v2140_v46, -inf  ;;  %v1421_v32 = vcombine.low %v1396_v43, %v1404_v44  ;;  %v1422_v20 = vcombine.high %v1396_v43, %v1404_v44  ;;  %v2229_v56 = vsel %vm680_vm2, %v2216_v47, -inf }
 0x60f   :  { %2227 = vmax.xlane.f32.xlu0 %v2226_v16  ;;  %v3124_v21 = vpop.f32.mrf.mxu0  ;;  %v3129_v45 = vpop.f32.mrf.mxu1  ;;  %v1437_v49 = vcombine.low %v1412_v48, %v1420_v15  ;;  %v1438_v50 = vcombine.high %v1412_v48, %v1420_v15 }
 0x610   :  { %v3722_v51 = vrot.slane %v1421_v32, %v3501_v61  ;;  %v1436_v53 = vrot.slane %v1422_v20, %v3501_v61 }
 0x611   :  { %v3726_v54 = vrot.slane %v1437_v49, %v3501_v61  ;;  %v1452_v55 = vrot.slane %v1438_v50, %v3501_v61 }
 0x613   :  { %2230 = vmax.xlane.f32.xlu0 %v2229_v56  ;;  %v1453_v57 = vcombine.low %v3722_v51, %v3726_v54  ;;  %v1454_v58 = vcombine.high %v3722_v51, %v3726_v54  ;;  %v1455_v59 = vcombine.low %v1436_v53, %v1452_v55  ;;  %v1456_v60 = vcombine.high %v1436_v53, %v1452_v55  ;;  %v2710_v51 = vld [vmem:[#allocation7 + $0x18] sm:$0xff] }
 0x694   :  { %v2222_v62 = vpop.xlane.xlu0 %2221  ;;  %v2225_v63 = vpop.xlane.xlu1 %2224 }
 0x695   :  { %v2232_v0 = vsub.f32 %v1988_v27, %v2222_v62  ;;  %v2233_v1 = vsub.f32 %v2064_v38, %v2225_v63 }
 0x697   :  { %v2236_v2 = vmul.f32 1.442695, %v2232_v0  ;;  %v2238_v3 = vmul.f32 1.442695, %v2233_v1 }
 0x698   :  { %v2228_v4 = vpop.xlane.xlu0 %2227 }
 0x699   :  { %3210 = vpow2.f32 %v2236_v2  ;;  %v2234_v5 = vsub.f32 %v2140_v46, %v2228_v4 }
 0x69a   :  { %3212 = vpow2.f32 %v2238_v3 }
 0x69b   :  { %v2240_v6 = vmul.f32 1.442695, %v2234_v5 }
 0x69c   :  { %v2231_v14 = vpop.xlane.xlu0 %2230 }
 0x69d   :  { %3214 = vpow2.f32 %v2240_v6  ;;  %v2235_v17 = vsub.f32 %v2216_v47, %v2231_v14 }
 0x69f   :  { %v2242_v18 = vmul.f32 1.442695, %v2235_v17 }
 0x6a1   :  { %3216 = vpow2.f32 %v2242_v18 }
 0x6a6   :  { %v3734_v7 = vpop.eup %3210 }
 0x6a7   :  { %v3736_v8 = vpop.eup %3212  ;;  %v2244_v9 = vsel %vm680_vm2, %v3734_v7, 0.0 }
 0x6a8   :  { %v2247_v10 = vsel %vm680_vm2, %v3736_v8, 0.0  ;;  %2245 = vadd.xlane.f32.xlu0 %v2244_v9 }
 0x6a9   :  { %2248 = vadd.xlane.f32.xlu1 %v2247_v10 }
 0x6aa   :  { %v3742_v11 = vpop.eup %3214 }
 0x6ab   :  { %v2250_v13 = vsel %vm680_vm2, %v3742_v11, 0.0 }
 0x6ac   :  { %2251 = vadd.xlane.f32.xlu0 %v2250_v13 }
 0x6ae   :  { %v3753_v19 = vpop.eup %3216 }
 0x6af   :  { %v2253_v22 = vsel %vm680_vm2, %v3753_v19, 0.0 }
 0x6ba   :  { %1770 = vrot.lane.b32.xlu1 %v3571_v40, %s3354_s6 }
 0x6be   :  { %1772 = vrot.lane.b32.xlu1 %v3577_v28, %s3354_s6 }
 0x6c2   :  { %1768 = vrot.lane.b32.xlu0 %v3457_v36, %s3354_s6 }
 0x6c6   :  { %1458 = vrot.lane.b32.xlu0 %v1454_v58, %s3343_s23 }
 0x6e2   :  { %2254 = vadd.xlane.f32.xlu1 %v2253_v22 }
 0x6f3   :  { %1774 = vrot.lane.b32.xlu1 %v3575_v42, %s3354_s6 }
 0x6f7   :  { %1462 = vrot.lane.b32.xlu1 %v1455_v59, %s3355_s26 }
 0x6fb   :  { %1466 = vrot.lane.b32.xlu1 %v1456_v60, %s3356_s27 }
 0x731   :  { %v2246_v40 = vpop.xlane.xlu0 %2245 }
 0x732   :  { %v2249_v36 = vpop.xlane.xlu1 %2248  ;;  %3218 = vrcp.f32 %v2246_v40 }
 0x733   :  { %3220 = vrcp.f32 %v2249_v36 }
 0x735   :  { %v2252_v23 = vpop.xlane.xlu0 %2251 }
 0x736   :  { %v1771_v28 = vpop.permute.xlu1 %1770  ;;  %3222 = vrcp.f32 %v2252_v23 }
 0x739   :  { %v1769_v25 = vpop.permute.xlu0 %1768 }
 0x73a   :  { %v1773_v24 = vpop.permute.xlu1 %1772 }
 0x73b   :  { %v1780_v26 = vcombine.low %v1769_v25, %v1773_v24  ;;  %v1781_v27 = vcombine.high %v1769_v25, %v1773_v24 }
 0x73d   :  { %v1788_v42 = vrot.slane %v1780_v26, %v3491_v52  ;;  %v1795_v31 = vrot.slane %v1781_v27, %v3491_v52  ;;  %v1459_v13 = vpop.permute.xlu0 %1458 }
 0x73f   :  { %v3219_v59 = vpop.eup %3218 }
 0x740   :  { %v3221_v60 = vpop.eup %3220  ;;  %v2260_v6 = vmul.f32 %v3219_v59, %v3734_v7  ;;  %v1469_v7 = vsel %vm680_vm2, %v1453_v57, %v1459_v13 }
 0x741   :  { %v2261_v9 = vmul.f32 %v3221_v60, %v3736_v8 }
 0x743   :  { %v3223_v3 = vpop.eup %3222 }
 0x744   :  { %v2262_v8 = vmul.f32 %v3223_v3, %v3742_v11 }
 0x76b   :  { %v2255_v39 = vpop.xlane.xlu1 %2254 }
 0x76c   :  { %3224 = vrcp.f32 %v2255_v39 }
 0x76f   :  { %v1775_v38 = vpop.permute.xlu1 %1774 }
 0x770   :  { %v1796_v29 = vcombine.low %v1771_v28, %v1775_v38  ;;  %v1797_v30 = vcombine.high %v1771_v28, %v1775_v38 }
 0x772   :  { %v1804_v33 = vrot.slane %v1796_v29, %v3491_v52  ;;  %v1811_v34 = vrot.slane %v1797_v30, %v3491_v52 }
 0x773   :  { %v1463_v62 = vpop.permute.xlu1 %1462 }
 0x774   :  { %v1812_v35 = vcombine.low %v1788_v42, %v1804_v33  ;;  %v1813_v12 = vcombine.high %v1788_v42, %v1804_v33  ;;  %v1828_v37 = vcombine.low %v1795_v31, %v1811_v34  ;;  %v1829_v43 = vcombine.high %v1795_v31, %v1811_v34 }
 0x775   :  { %v1471_v36 = vsel %vm1470_vm3, %v1469_v7, %v1463_v62 }
 0x776   :  { %v1820_v44 = vrot.slane %v1812_v35, %v3501_v61  ;;  %v1827_v46 = vrot.slane %v1813_v12, %v3501_v61  ;;  %v1836_v47 = vrot.slane %v1828_v37, %v3501_v61  ;;  %v1843_v48 = vrot.slane %v1829_v43, %v3501_v61  ;;  %v2709_v12 = vld [vmem:[#allocation7 + $0x10] sm:$0xff]  ;;  %v2708_v37 = vld [vmem:[#allocation7 + $0x8] sm:$0xff] }
 0x777   :  { %v1467_v18 = vpop.permute.xlu1 %1466 }
 0x778   :  { %v1848_v15 = vcombine.low %v1820_v44, %v1827_v46  ;;  %v2985_v16 = vcombine.high %v1820_v44, %v1827_v46  ;;  %v1864_v32 = vcombine.low %v1836_v47, %v1843_v48  ;;  %v2986_v20 = vcombine.high %v1836_v47, %v1843_v48 }
 0x779   :  { %v3225_v10 = vpop.eup %3224  ;;  %v1473_v40 = vsel %vm1472_vm4, %v1471_v36, %v1467_v18  ;;  %v3230_v18 = vld [vmem:[#allocation2 + $0x8] sm:$0xff] }
 0x77a   :  { %v1855_v21 = vrot.slane %v1848_v15, %v3491_v52  ;;  %v1863_v45 = vrot.slane %v2985_v16, %v3491_v52  ;;  %v1871_v49 = vrot.slane %v1864_v32, %v3491_v52  ;;  %v1879_v50 = vrot.slane %v2986_v20, %v3491_v52  ;;  %v2707_v20 = vld [vmem:[#allocation7] sm:$0xff] }
 0x77b   :  { %v2263_v22 = vmul.f32 %v3225_v10, %v3753_v19 }
 0x77c   :  { %v1880_v53 = vcombine.low %v1855_v21, %v1863_v45  ;;  %v1896_v55 = vcombine.low %v1871_v49, %v1879_v50  ;;  %v1881_v56 = vcombine.high %v1855_v21, %v1863_v45  ;;  %v1897_v58 = vcombine.high %v1871_v49, %v1879_v50 }
 0x77e   :  { %v1888_v63 = vrot.slane %v1880_v53, %v3501_v61  ;;  %v1904_v0 = vrot.slane %v1896_v55, %v3501_v61  ;;  %v1895_v1 = vrot.slane %v1881_v56, %v3501_v61  ;;  %v1911_v2 = vrot.slane %v1897_v58, %v3501_v61 }
 0x780   :  { %v1912_v4 = vcombine.low %v1888_v63, %v1904_v0  ;;  %v1913_v5 = vcombine.high %v1888_v63, %v1904_v0  ;;  %v1914_v14 = vcombine.low %v1895_v1, %v1911_v2  ;;  %v1915_v17 = vcombine.high %v1895_v1, %v1911_v2 }
 0x782   :  { %3131 = vmatpush3.msra.mxu0 %v1912_v4  ;;  %3136 = vmatpush3.msra.mxu1 %v1913_v5 }
 0x783   :  { %3133 = vmatmul.mubr.msk.f32.vlgmr.msra.gmra.mxu0 %vm680_vm2, %v2260_v6  ;;  %3138 = vmatmul.mubr.msk.f32.vlgmr.msra.gmra.mxu1 %vm680_vm2, %v2261_v9 }
 0x784   :  { %3140 = vmatprep.subr.mxu0 %v3350_v41  ;;  %3145 = vmatprep.subr.mxu1 %v3350_v41 }
 0x785   :  { %3141 = vmatpush3.msra.mxu0 %v1914_v14  ;;  %3146 = vmatpush3.msra.mxu1 %v1915_v17 }
 0x786   :  { %3142 = vmatprep.mubr.msk.f32.mxu0 %vm3351_vm1, %v3350_v41  ;;  %3147 = vmatprep.mubr.msk.f32.mxu1 %vm3351_vm1, %v3350_v41 }
 0x787   :  { %3143 = vmatmul.mubr.msk.f32.vlgmr.msra.gmra.mxu0 %vm680_vm2, %v2262_v8  ;;  %3148 = vmatmul.mubr.msk.f32.vlgmr.msra.gmra.mxu1 %vm680_vm2, %v2263_v22  ;;  %v3231_v22 = vld [vmem:[#allocation2] sm:$0xff] }
 0x788   :  { %3158 = vmatprep.mubr.msk.f32.mxu0 %vm103_vm0, %v1473_v40  ;;  %3150 = vmatprep.subr.mxu0 %v2710_v51 }
 0x789   :  { %3151 = vmatpush3.msra.mxu0 %v2710_v51 }
 0x78a   :  { %3152 = vmatprep.subr.mxu0 %v2709_v12 }
 0x78b   :  { %3153 = vmatpush3.msra.mxu0 %v2709_v12 }
 0x78c   :  { %3154 = vmatprep.subr.mxu0 %v2708_v37 }
 0x78d   :  { %3155 = vmatpush3.msra.mxu0 %v2708_v37  ;;  %v3004_v37 = vld [vmem:[%s3850_s3] ss:$0 sm:$0xff]  ;;  %s3357_s3 = smov [#allocation10]  }
 0x78e   :  { %3156 = vmatprep.subr.mxu0 %v2707_v20  ;;  %s2942_s15 = sshll.u32 %s3357_s3, 4  ;;  %s2943_s15 = int_to_ptr.vmem [resolvable:$true] %s2942_s15 }
 0x78f   :  { %3157 = vmatpush3.msra.mxu0 %v2707_v20  ;;  %v3006_v20 = vld [vmem:[%s3857_s10] ss:$0 sm:$0xff]  ;;  %p3317_p7 = scmp.lt.s32.totalorder %s2943_s15, %s2943_s15 }
 0x843   :  { %v2333_v54 = vpop.f32.mrf.mxu0  ;;  %v2406_v57 = vpop.f32.mrf.mxu1 }
 0x845   :  { %v3134_v11 = vpop.f32.mrf.mxu0  ;;  %v3139_v19 = vpop.f32.mrf.mxu1 }
 0x847   :  { %v2479_v28 = vpop.f32.mrf.mxu0  ;;  %v2552_v23 = vpop.f32.mrf.mxu1 }
 0x848   :  { %v2556_v24 = vcombine.low %v2333_v54, %v2479_v28  ;;  %v2557_v25 = vcombine.high %v2333_v54, %v2479_v28  ;;  %v2572_v41 = vcombine.low %v2406_v57, %v2552_v23  ;;  %v2573_v39 = vcombine.high %v2406_v57, %v2552_v23 }
 0x849   :  { %v3144_v26 = vpop.f32.mrf.mxu0  ;;  %v3149_v27 = vpop.f32.mrf.mxu1 }
 0x84a   :  { %v2564_v38 = vrot.slane %v2556_v24, %v3491_v52  ;;  %v2571_v29 = vrot.slane %v2557_v25, %v3491_v52  ;;  %v2580_v30 = vrot.slane %v2572_v41, %v3491_v52  ;;  %v2587_v42 = vrot.slane %v2573_v39, %v3491_v52  ;;  %v2845_v26 = vld [vmem:[#allocation8 + $0x18] sm:$0xff]  ;;  %v2844_v27 = vld [vmem:[#allocation8 + $0x10] sm:$0xff] }
 0x84b   :  { %3161 = vmatprep.subr.mxu1 %v2845_v26 }
 0x84c   :  { %v2588_v31 = vcombine.low %v2564_v38, %v2580_v30  ;;  %v2589_v33 = vcombine.high %v2564_v38, %v2580_v30  ;;  %v2604_v34 = vcombine.low %v2571_v29, %v2587_v42  ;;  %v2605_v35 = vcombine.high %v2571_v29, %v2587_v42  ;;  %3162 = vmatpush3.msra.mxu1 %v2845_v26  ;;  %v2843_v38 = vld [vmem:[#allocation8 + $0x8] sm:$0xff]  ;;  %v2842_v29 = vld [vmem:[#allocation8] sm:$0xff] }
 0x84d   :  { %3163 = vmatprep.subr.mxu1 %v2844_v27 }
 0x84e   :  { %v2596_v43 = vrot.slane %v2588_v31, %v3501_v61  ;;  %v2603_v44 = vrot.slane %v2589_v33, %v3501_v61  ;;  %v2612_v46 = vrot.slane %v2604_v34, %v3501_v61  ;;  %v2619_v47 = vrot.slane %v2605_v35, %v3501_v61  ;;  %3164 = vmatpush3.msra.mxu1 %v2844_v27 }
 0x84f   :  { %3165 = vmatprep.subr.mxu1 %v2843_v38 }
 0x850   :  { %v2624_v48 = vcombine.low %v2596_v43, %v2603_v44  ;;  %v2999_v15 = vcombine.high %v2596_v43, %v2603_v44  ;;  %v2640_v16 = vcombine.low %v2612_v46, %v2619_v47  ;;  %v3000_v32 = vcombine.high %v2612_v46, %v2619_v47  ;;  %3166 = vmatpush3.msra.mxu1 %v2843_v38  ;;  %v3005_v44 = vld [vmem:[%s3851_s4] ss:$0 sm:$0xff]  ;;  %s3312_s4 = scalar_lea.vmem %s2943_s15, 256 }
 0x851   :  { %3167 = vmatprep.subr.mxu1 %v2842_v29  ;;  %p3313_p6 = scmp.ne.s32.totalorder %s2943_s15, %s3312_s4  ;;  %p3318_p8 = scmp.lt.s32.totalorder %s3312_s4, %s3312_s4 }
 0x852   :  { %v2631_v21 = vrot.slane %v2624_v48, %v3491_v52  ;;  %v2639_v45 = vrot.slane %v2999_v15, %v3491_v52  ;;  %v2647_v49 = vrot.slane %v2640_v16, %v3491_v52  ;;  %v2655_v50 = vrot.slane %v3000_v32, %v3491_v52  ;;  %3168 = vmatpush3.msra.mxu1 %v2842_v29 }
 0x853   :  { %p3319_p9 = por %p3318_p8, %p3317_p7 }
 0x854   :  { %v2657_v53 = vcombine.high %v2631_v21, %v2639_v45  ;;  %v2673_v55 = vcombine.high %v2647_v49, %v2655_v50  ;;  %v2656_v56 = vcombine.low %v2631_v21, %v2639_v45  ;;  %v2672_v58 = vcombine.low %v2647_v49, %v2655_v50 }
 0x855   :  { %p3320_p10 = pnand %p3319_p9, %p3313_p6 }
 0x856   :  { %v2671_v59 = vrot.slane %v2657_v53, %v3501_v61  ;;  %v2687_v60 = vrot.slane %v2673_v55, %v3501_v61  ;;  %v2664_v62 = vrot.slane %v2656_v56, %v3501_v61  ;;  %v2680_v63 = vrot.slane %v2672_v58, %v3501_v61  ;;  %v3001_v61 = vld [vmem:[%s3855_s8] ss:$0 sm:$0xff] }
 0x858   :  { %v2691_v0 = vcombine.high %v2671_v59, %v2687_v60  ;;  %v2689_v1 = vcombine.high %v2664_v62, %v2680_v63  ;;  %v2688_v2 = vcombine.low %v2664_v62, %v2680_v63  ;;  %v2690_v52 = vcombine.low %v2671_v59, %v2687_v60 }
 0x85a   :  { %2701 = vrot.lane.b32.xlu1 %v2691_v0, %s3356_s27  ;;  %2693 = vrot.lane.b32.xlu0 %v2689_v1, %s3343_s23 }
 0x85e   :  { %2697 = vrot.lane.b32.xlu0 %v2690_v52, %s3355_s26 }
 0x8cc   :  { %v2694_v3 = vpop.permute.xlu0 %2693  ;;  %v2702_v6 = vpop.permute.xlu1 %2701 }
 0x8cd   :  { %v2704_v4 = vsel %vm680_vm2, %v2688_v2, %v2694_v3 }
 0x8d0   :  { %v2698_v5 = vpop.permute.xlu0 %2697 }
 0x8d1   :  { %v2705_v9 = vsel %vm1470_vm3, %v2704_v4, %v2698_v5 }
 0x8d2   :  { %v2706_v10 = vsel %vm1472_vm4, %v2705_v9, %v2702_v6 }
 0x8d3   :  { %3159 = vmatmul.mubr.msk.f32.vlgmr.msra.gmra.mxu0 %vm103_vm0, %v2706_v10 }
 0x993   :  { %v3160_v13 = vpop.f32.mrf.mxu0 }
 0x994   :  { %v2795_v14 = vadd.f32 %v3160_v13, %v3001_v61 }
 0x995   :  { %v2789_v17 = vpop.f32.mrf.mxu0 }
 0x996   :  { %v2799_v7 = vadd.f32 %v3230_v18, %v2795_v14  ;;  %v2790_v8 = vadd.f32 %v3001_v61, %v2789_v17 }
 0x998   :  { %v2798_v36 = vadd.f32 %v3231_v22, %v2790_v8  ;;  %v2803_v40 = vsel %vm103_vm0, %v2799_v7, 0.0 }
 0x999   :  { %2804 = vadd.xlane.f32.xlu1 %v2803_v40 }
 0x99a   :  { %v2800_v51 = vsel %vm103_vm0, %v2798_v36, 0.0 }
 0x99b   :  { %2801 = vadd.xlane.f32.xlu0 %v2800_v51 }
 0xa22   :  { %v2805_v54 = vpop.xlane.xlu1 %2804 }
 0xa23   :  { %v2807_v57 = vmul.f32 0.03125, %v2805_v54 }
 0xa24   :  { %v2802_v11 = vpop.xlane.xlu0 %2801 }
 0xa25   :  { %v2806_v19 = vmul.f32 0.03125, %v2802_v11  ;;  %v2809_v28 = vsub.f32 %v2799_v7, %v2807_v57 }
 0xa27   :  { %v2808_v23 = vsub.f32 %v2798_v36, %v2806_v19  ;;  %v2811_v41 = vmul.f32 %v2809_v28, %v2809_v28 }
 0xa29   :  { %v2810_v24 = vmul.f32 %v2808_v23, %v2808_v23  ;;  %v2815_v39 = vsel %vm103_vm0, %v2811_v41, 0.0 }
 0xa2b   :  { %v2812_v25 = vsel %vm103_vm0, %v2810_v24, 0.0 }
 0xa2c   :  { %2813 = vadd.xlane.f32.xlu0 %v2812_v25 }
 0xa30   :  { %2816 = vadd.xlane.f32.xlu0 %v2815_v39 }
 0xab5   :  { %v2814_v30 = vpop.xlane.xlu0 %2813 }
 0xab6   :  { %v2818_v42 = vmul.f32 0.03125, %v2814_v30 }
 0xab8   :  { %v2820_v31 = vadd.f32 1e-05, %v2818_v42 }
 0xab9   :  { %v2817_v33 = vpop.xlane.xlu0 %2816 }
 0xaba   :  { %3226 = vrsqrt.f32 %v2820_v31  ;;  %v2819_v34 = vmul.f32 0.03125, %v2817_v33 }
 0xabc   :  { %v2821_v35 = vadd.f32 1e-05, %v2819_v34 }
 0xabe   :  { %3228 = vrsqrt.f32 %v2821_v35 }
 0xac7   :  { %v3227_v12 = vpop.eup %3226 }
 0xac8   :  { %v2824_v43 = vmul.f32 %v3227_v12, %v2808_v23 }
 0xaca   :  { %v2832_v46 = vmul.f32 %v3004_v37, %v2824_v43 }
 0xacb   :  { %v3229_v47 = vpop.eup %3228 }
 0xacc   :  { %v2825_v48 = vmul.f32 %v3229_v47, %v2809_v28  ;;  %v2840_v15 = vadd.f32 %v3005_v44, %v2832_v46 }
 0xace   :  { %v2833_v16 = vmul.f32 %v3004_v37, %v2825_v48  ;;  %3169 = vmatprep.mubr.msk.f32.mxu1 %vm103_vm0, %v2840_v15 }
 0xad0   :  { %v2841_v32 = vadd.f32 %v3005_v44, %v2833_v16 }
 0xad2   :  { %3170 = vmatmul.mubr.msk.f32.vlgmr.msra.gmra.mxu1 %vm103_vm0, %v2841_v32 }
 0xb92   :  { %v3171_v21 = vpop.f32.mrf.mxu1 }
 0xb93   :  { %v2930_v45 = vadd.f32 %v3171_v21, %v3006_v20 }
 0xb94   :  { %v2924_v49 = vpop.f32.mrf.mxu1 }
 0xb95   :  { %v2934_v50 = vadd.f32 %v2930_v45, %v2799_v7  ;;  %v2925_v53 = vadd.f32 %v3006_v20, %v2924_v49 }
 0xb97   :  { %2936 = vst.msk [vmem:[#allocation10 + $0x8] sm:$0xff] %vm103_vm0, %v2934_v50  ;;  %v2933_v55 = vadd.f32 %v2925_v53, %v2798_v36 }
 0xb99   :  { %2935 = vst.msk [vmem:[#allocation10] sm:$0xff] %vm103_vm0, %v2933_v55 }
 0xb9a   :  { %3323 = shalt.err (!%p3320_p10)
}
 0xb9b   :  { %2948 = dma.vmem_to_hbm [thread:$0]  %s2943_s15, 256, %s3858_s11, [#allocation4], %s3342_s22, %s3342_s22, %s3343_s23  }
 0xb9c   :  { %3338 = dma.done.wait [#allocation4], 256  }
 0xb9d   :  { %3339 = vsyncadd [#allocation4], 4294967040 }
 0xb9e   :  { %2952 = vsyncpa [#allocation3], 1 }
 0xb9f   :  { %2953 = vsyncpa [#allocation6], 1 }
 0xba0   :  { %2954 = vsyncpa [#allocation9], 1 }
 0xba1   :  { %2955 = vsyncpa [#allocation4], 1 }

// kernel: tpu_custom_call.1
= control target key start
LH: loop header
LB: loop body
LE: loop exit
PB: predicated region body
PF: predicated region fallthrough
CT: control target
= control target key end

     0   :  { %16 = vsyncpa [#allocation3], 0  ;;  %s2511_s0 = inlined_call_operand.hbm [shape: f32[16,32], index: 0, kind: input, shape index: {}]   ;;  %s2512_s1 = inlined_call_operand.vmem [shape: f32[1,32], index: 1, kind: input, shape index: {}]   ;;  %s2513_s2 = inlined_call_operand.vmem [shape: f32[1,32], index: 2, kind: input, shape index: {}]   ;;  %s2514_s3 = inlined_call_operand.vmem [shape: f32[1,32], index: 3, kind: input, shape index: {}]   ;;  %s2515_s4 = inlined_call_operand.vmem [shape: f32[1,32], index: 4, kind: input, shape index: {}]   ;;  %s2516_s5 = inlined_call_operand.hbm [shape: f32[32,96], index: 5, kind: input, shape index: {}]   ;;  %s2517_s6 = inlined_call_operand.vmem [shape: f32[1,96], index: 6, kind: input, shape index: {}]   ;;  %s2518_s7 = inlined_call_operand.hbm [shape: f32[32,32], index: 7, kind: input, shape index: {}]   ;;  %s2519_s8 = inlined_call_operand.vmem [shape: f32[1,32], index: 8, kind: input, shape index: {}]   ;;  %s2520_s9 = inlined_call_operand.hbm [shape: f32[32,32], index: 9, kind: input, shape index: {}]   ;;  %s2521_s10 = inlined_call_operand.vmem [shape: f32[1,32], index: 10, kind: input, shape index: {}]   ;;  %s2522_s11 = inlined_call_operand.hbm [shape: f32[16,32], index: 11, kind: output, shape index: {}]  }
   0x1   :  { %17 = vsyncpa [#allocation6], 0 }
   0x2   :  { %18 = vsyncpa [#allocation9], 0 }
   0x3   :  { %19 = vsyncpa [#allocation4], 0  ;;  %s2208_s17 = smov [#allocation5]   ;;  %s2209_s19 = smov [#allocation2]  }
   0x4   :  { %s45_s18 = sshll.u32 %s2208_s17, 4  ;;  %s25_s20 = sshll.u32 %s2209_s19, 4  ;;  %s46_s18 = int_to_ptr.vmem [resolvable:$true] %s45_s18  ;;  %s26_s20 = int_to_ptr.vmem [resolvable:$true] %s25_s20 }
   0x5   :  { %s2108_s21 = scalar_lea.vmem %s46_s18, 512  ;;  %p2113_p1 = scmp.lt.s32.totalorder %s46_s18, %s46_s18 }
   0x6   :  { %p2109_p0 = scmp.ne.s32.totalorder %s46_s18, %s2108_s21  ;;  %p2114_p2 = scmp.lt.s32.totalorder %s2108_s21, %s2108_s21 }
   0x8   :  { %p2115_p3 = por %p2114_p2, %p2113_p1 }
   0xa   :  { %p2116_p4 = pnand %p2115_p3, %p2109_p0 }
   0xc   :  { %2119 = shalt.err (!%p2116_p4)
}
   0xd   :  { %s2210_s22 = smov 128   ;;  %s2211_s23 = smov 8  }
   0xe   :  { %51 = dma.hbm_to_vmem [thread:$0]  %s2516_s5, 512, %s46_s18, [#allocation6], %s2210_s22, %s2210_s22, %s2211_s23  }
   0xf   :  { %s2128_s26 = scalar_lea.vmem %s26_s20, 256  ;;  %p2133_p6 = scmp.lt.s32.totalorder %s26_s20, %s26_s20 }
  0x10   :  { %p2129_p5 = scmp.ne.s32.totalorder %s26_s20, %s2128_s26  ;;  %p2134_p7 = scmp.lt.s32.totalorder %s2128_s26, %s2128_s26 }
  0x12   :  { %p2135_p8 = por %p2134_p7, %p2133_p6 }
  0x14   :  { %p2136_p9 = pnand %p2135_p8, %p2129_p5 }
  0x16   :  { %2139 = shalt.err (!%p2136_p9)
}
  0x17   :  { %31 = dma.hbm_to_vmem [thread:$0]  %s2511_s0, 256, %s26_s20, [#allocation3], %s2210_s22, %s2210_s22, %s2211_s23  }
  0x18   :  { %s2212_s29 = smov [#allocation7]   ;;  %s2213_s12 = smov [#allocation8]  }
  0x19   :  { %s59_s30 = sshll.u32 %s2212_s29, 4  ;;  %s73_s13 = sshll.u32 %s2213_s12, 4  ;;  %s60_s30 = int_to_ptr.vmem [resolvable:$true] %s59_s30  ;;  %s74_s13 = int_to_ptr.vmem [resolvable:$true] %s73_s13 }
  0x1a   :  { %s2148_s5 = scalar_lea.vmem %s60_s30, 512  ;;  %p2153_p11 = scmp.lt.s32.totalorder %s60_s30, %s60_s30 }
  0x1b   :  { %p2149_p10 = scmp.ne.s32.totalorder %s60_s30, %s2148_s5  ;;  %p2154_p12 = scmp.lt.s32.totalorder %s2148_s5, %s2148_s5 }
  0x1d   :  { %p2155_p13 = por %p2154_p12, %p2153_p11 }
  0x1f   :  { %p2156_p0 = pnand %p2155_p13, %p2149_p10 }
  0x21   :  { %2159 = shalt.err (!%p2156_p0)
}
  0x22   :  { %65 = dma.hbm_to_vmem [thread:$0]  %s2518_s7, 512, %s60_s30, [#allocation6], %s2210_s22, %s2210_s22, %s2211_s23  }
  0x23   :  { %s2168_s0 = scalar_lea.vmem %s74_s13, 512  ;;  %p2173_p2 = scmp.lt.s32.totalorder %s74_s13, %s74_s13 }
  0x24   :  { %p2169_p1 = scmp.ne.s32.totalorder %s74_s13, %s2168_s0  ;;  %p2174_p3 = scmp.lt.s32.totalorder %s2168_s0, %s2168_s0 }
  0x26   :  { %p2175_p4 = por %p2174_p3, %p2173_p2 }
  0x28   :  { %p2176_p5 = pnand %p2175_p4, %p2169_p1 }
  0x2a   :  { %2179 = shalt.err (!%p2176_p5)
}
  0x2b   :  { %79 = dma.hbm_to_vmem [thread:$0]  %s2520_s9, 512, %s74_s13, [#allocation9], %s2210_s22, %s2210_s22, %s2211_s23  }
  0x2c   :  { %2200 = dma.done.wait [#allocation3], 256  }
  0x2d   :  { %2201 = vsyncadd [#allocation3], 4294967040 }
  0x2e   :  { %2202 = dma.done.wait [#allocation6], 1024  }
  0x2f   :  { %2203 = vsyncadd [#allocation6], 4294966272 }
  0x30   :  { %2204 = dma.done.wait [#allocation9], 512  }
  0x31   :  { %2205 = vsyncadd [#allocation9], 4294966784  ;;  %vm103_vm0 = vcmask 261120   ;;  %v2314_v0 = vld [vmem:[#allocation2] sm:$0xff]  ;;  %v2316_v1 = vld [vmem:[#allocation2 + $0x8] sm:$0xff]  ;;  %v2214_v34 = vmov 0.0  }
  0x32   :  { %v104_v2 = vsel %vm103_vm0, %v2314_v0, 0.0  ;;  %v107_v3 = vsel %vm103_vm0, %v2316_v1, 0.0  ;;  %v150_v14 = vld [vmem:[#allocation5 + $0x18] sm:$0xff]  ;;  %v149_v15 = vld [vmem:[#allocation5 + $0x10] sm:$0xff]  ;;  %v148_v16 = vld [vmem:[#allocation5 + $0x8] sm:$0xff]  ;;  %1936 = vmatprep.subr.mxu1 %v2214_v34  ;;  %vm2215_vm1 = vmmov 0  }
  0x33   :  { %105 = vadd.xlane.f32.xlu0 %v104_v2  ;;  %1925 = vmatprep.subr.mxu0 %v150_v14  ;;  %v147_v17 = vld [vmem:[#allocation5] sm:$0xff]  ;;  %v1838_v25 = vld [vmem:[%s2512_s1] ss:$0 sm:$0xff]  ;;  %s2216_s20 = smov 88   ;;  %s2217_s21 = smov 96   ;;  %vm241_vm2 = vcmask 64512  }
  0x34   :  { %1926 = vmatpush3.msra.mxu0 %v150_v14  ;;  %v1839_v27 = vld [vmem:[%s2513_s2] ss:$0 sm:$0xff]  ;;  %1938 = vmatprep.mubr.msk.f32.mxu1 %vm2215_vm1, %v2214_v34  ;;  %s2218_s24 = smov 120   ;;  %s2219_s25 = smov 112   ;;  %vm911_vm3 = vcmask 130048   ;;  %vm913_vm4 = vcmask 195584  }
  0x35   :  { %1927 = vmatprep.subr.mxu0 %v149_v15  ;;  %v1840_v36 = vld [vmem:[%s2517_s6] ss:$0 sm:$0xff]  ;;  %s2220_s26 = smov 80   ;;  %s2221_s27 = smov 104  }
  0x36   :  { %1928 = vmatpush3.msra.mxu0 %v149_v15  ;;  %s2222_s6 = smov 72   ;;  %s2223_s28 = smov 64  }
  0x37   :  { %108 = vadd.xlane.f32.xlu0 %v107_v3  ;;  %1929 = vmatprep.subr.mxu0 %v148_v16  ;;  %s2224_s29 = smov 48   ;;  %s2225_s30 = smov 40  }
  0x38   :  { %1930 = vmatpush3.msra.mxu0 %v148_v16  ;;  %s2226_s12 = smov 56   ;;  %s2227_s13 = smov 16  }
  0x39   :  { %1931 = vmatprep.subr.mxu0 %v147_v17  ;;  %s2228_s5 = smov 24  }
  0x3a   :  { %1932 = vmatpush3.msra.mxu0 %v147_v17 }
  0x3b   :  { %1946 = vmatprep.subr.mxu0 %v2214_v34 }
  0xbc   :  { %v106_v4 = vpop.xlane.xlu0 %105 }
  0xbd   :  { %v111_v5 = vmul.f32 0.03125, %v106_v4 }
  0xbf   :  { %v113_v6 = vsub.f32 %v2314_v0, %v111_v5 }
  0xc0   :  { %v109_v7 = vpop.xlane.xlu0 %108 }
  0xc1   :  { %v112_v8 = vmul.f32 0.03125, %v109_v7  ;;  %v115_v9 = vmul.f32 %v113_v6, %v113_v6 }
  0xc3   :  { %v114_v10 = vsub.f32 %v2316_v1, %v112_v8  ;;  %v117_v11 = vsel %vm103_vm0, %v115_v9, 0.0 }
  0xc4   :  { %118 = vadd.xlane.f32.xlu1 %v117_v11 }
  0xc5   :  { %v116_v12 = vmul.f32 %v114_v10, %v114_v10 }
  0xc7   :  { %v120_v13 = vsel %vm103_vm0, %v116_v12, 0.0 }
  0xc8   :  { %121 = vadd.xlane.f32.xlu1 %v120_v13 }
 0x14d   :  { %v119_v18 = vpop.xlane.xlu1 %118 }
 0x14e   :  { %v123_v19 = vmul.f32 0.03125, %v119_v18 }
 0x150   :  { %v125_v20 = vadd.f32 1e-05, %v123_v19 }
 0x151   :  { %v122_v21 = vpop.xlane.xlu1 %121 }
 0x152   :  { %2060 = vrsqrt.f32 %v125_v20  ;;  %v124_v22 = vmul.f32 0.03125, %v122_v21 }
 0x154   :  { %v126_v23 = vadd.f32 1e-05, %v124_v22 }
 0x156   :  { %2062 = vrsqrt.f32 %v126_v23 }
 0x15f   :  { %v2061_v24 = vpop.eup %2060 }
 0x160   :  { %v129_v26 = vmul.f32 %v2061_v24, %v113_v6 }
 0x162   :  { %v137_v28 = vmul.f32 %v1838_v25, %v129_v26 }
 0x163   :  { %v2063_v29 = vpop.eup %2062 }
 0x164   :  { %v130_v30 = vmul.f32 %v2063_v29, %v114_v10  ;;  %v145_v31 = vadd.f32 %v1839_v27, %v137_v28 }
 0x166   :  { %v138_v32 = vmul.f32 %v1838_v25, %v130_v30  ;;  %1933 = vmatprep.mubr.msk.f32.mxu0 %vm103_vm0, %v145_v31 }
 0x168   :  { %v146_v33 = vadd.f32 %v1839_v27, %v138_v32 }
 0x16a   :  { %1934 = vmatmul.mubr.msk.f32.vlgmr.msra.gmra.mxu0 %vm103_vm0, %v146_v33 }
 0x16b   :  { %1948 = vmatprep.mubr.msk.f32.mxu0 %vm2215_vm1, %v2214_v34 }
 0x22a   :  { %v1935_v35 = vpop.f32.mrf.mxu0 }
 0x22b   :  { %v2351_v39 = vadd.f32 %v1935_v35, %v1840_v36 }
 0x22c   :  { %v229_v37 = vpop.f32.mrf.mxu0 }
 0x22d   :  { %v2343_v38 = vadd.f32 %v1840_v36, %v229_v37 }
 0x22f   :  { %405 = vrot.lane.b32.xlu1 %v2343_v38, %s2216_s20  ;;  %239 = vrot.lane.b32.xlu0 %v2343_v38, %s2217_s21 }
 0x233   :  { %403 = vrot.lane.b32.xlu1 %v2343_v38, %s2218_s24  ;;  %568 = vrot.lane.b32.xlu0 %v2343_v38, %s2219_s25 }
 0x237   :  { %570 = vrot.lane.b32.xlu1 %v2343_v38, %s2220_s26  ;;  %733 = vrot.lane.b32.xlu0 %v2343_v38, %s2221_s27 }
 0x23b   :  { %735 = vrot.lane.b32.xlu1 %v2343_v38, %s2222_s6  ;;  %1081 = vrot.lane.b32.xlu0 %v2351_v39, %s2216_s20 }
 0x23f   :  { %916 = vrot.lane.b32.xlu1 %v2351_v39, %s2217_s21  ;;  %1246 = vrot.lane.b32.xlu0 %v2351_v39, %s2220_s26 }
 0x243   :  { %1079 = vrot.lane.b32.xlu1 %v2351_v39, %s2218_s24  ;;  %1411 = vrot.lane.b32.xlu0 %v2351_v39, %s2222_s6 }
 0x247   :  { %1244 = vrot.lane.b32.xlu1 %v2351_v39, %s2219_s25 }
 0x24b   :  { %1409 = vrot.lane.b32.xlu1 %v2351_v39, %s2221_s27 }
 0x2a1   :  { %v406_v40 = vpop.permute.xlu1 %405  ;;  %v240_v41 = vpop.permute.xlu0 %239 }
 0x2a2   :  { %1937 = vmatpush3.xpose.msk.msra.mxu1 %vm241_vm2, %v240_v41  ;;  %1947 = vmatpush3.xpose.msk.msra.mxu0 %vm241_vm2, %v406_v40 }
 0x2a3   :  { %1956 = vmatprep.subr.mxu0 %v2214_v34  ;;  %1941 = vmatprep.subr.mxu1 %v2214_v34 }
 0x2a5   :  { %v404_v42 = vpop.permute.xlu1 %403  ;;  %1939 = vmatmul.mubr.msk.f32.vlgmr.msra.gmra.mxu1 %vm241_vm2, %v2343_v38  ;;  %v569_v43 = vpop.permute.xlu0 %568 }
 0x2a6   :  { %1949 = vmatmul.mubr.msk.f32.vlgmr.msra.gmra.mxu0 %vm241_vm2, %v404_v42  ;;  %1943 = vmatprep.mubr.msk.f32.mxu1 %vm2215_vm1, %v2214_v34 }
 0x2a7   :  { %1958 = vmatprep.mubr.msk.f32.mxu0 %vm2215_vm1, %v2214_v34 }
 0x2a9   :  { %v571_v44 = vpop.permute.xlu1 %570  ;;  %v734_v45 = vpop.permute.xlu0 %733 }
 0x2aa   :  { %1957 = vmatpush3.xpose.msk.msra.mxu0 %vm241_vm2, %v571_v44 }
 0x2ab   :  { %1966 = vmatprep.subr.mxu0 %v2214_v34 }
 0x2ad   :  { %v736_v46 = vpop.permute.xlu1 %735  ;;  %1959 = vmatmul.mubr.msk.f32.vlgmr.msra.gmra.mxu0 %vm241_vm2, %v569_v43  ;;  %v1082_v47 = vpop.permute.xlu0 %1081 }
 0x2ae   :  { %1967 = vmatpush3.xpose.msk.msra.mxu0 %vm241_vm2, %v736_v46  ;;  %1968 = vmatprep.mubr.msk.f32.mxu0 %vm2215_vm1, %v2214_v34 }
 0x2af   :  { %1976 = vmatprep.subr.mxu0 %v2214_v34 }
 0x2b1   :  { %v917_v48 = vpop.permute.xlu1 %916  ;;  %1969 = vmatmul.mubr.msk.f32.vlgmr.msra.gmra.mxu0 %vm241_vm2, %v734_v45  ;;  %v1247_v50 = vpop.permute.xlu0 %1246 }
 0x2b2   :  { %1977 = vmatpush3.xpose.msk.msra.mxu0 %vm241_vm2, %v917_v48  ;;  %1978 = vmatprep.mubr.msk.f32.mxu0 %vm2215_vm1, %v2214_v34 }
 0x2b3   :  { %1986 = vmatprep.subr.mxu0 %v2214_v34 }
 0x2b5   :  { %v1080_v49 = vpop.permute.xlu1 %1079  ;;  %1979 = vmatmul.mubr.msk.f32.vlgmr.msra.gmra.mxu0 %vm241_vm2, %v2351_v39  ;;  %v1412_v52 = vpop.permute.xlu0 %1411 }
 0x2b6   :  { %1987 = vmatpush3.xpose.msk.msra.mxu0 %vm241_vm2, %v1082_v47  ;;  %1988 = vmatprep.mubr.msk.f32.mxu0 %vm2215_vm1, %v2214_v34 }
 0x2b7   :  { %1996 = vmatprep.subr.mxu0 %v2214_v34 }
 0x2b9   :  { %1989 = vmatmul.mubr.msk.f32.vlgmr.msra.gmra.mxu0 %vm241_vm2, %v1080_v49  ;;  %v1245_v51 = vpop.permute.xlu1 %1244 }
 0x2ba   :  { %1997 = vmatpush3.xpose.msk.msra.mxu0 %vm241_vm2, %v1247_v50  ;;  %1998 = vmatprep.mubr.msk.f32.mxu0 %vm2215_vm1, %v2214_v34 }
 0x2bb   :  { %2006 = vmatprep.subr.mxu0 %v2214_v34 }
 0x2bd   :  { %1999 = vmatmul.mubr.msk.f32.vlgmr.msra.gmra.mxu0 %vm241_vm2, %v1245_v51  ;;  %v1410_v53 = vpop.permute.xlu1 %1409 }
 0x2be   :  { %2007 = vmatpush3.xpose.msk.msra.mxu0 %vm241_vm2, %v1412_v52  ;;  %2008 = vmatprep.mubr.msk.f32.mxu0 %vm2215_vm1, %v2214_v34 }
 0x2c1   :  { %2009 = vmatmul.mubr.msk.f32.vlgmr.msra.gmra.mxu0 %vm241_vm2, %v1410_v53 }
 0x365   :  { %v312_v54 = vpop.f32.mrf.mxu1 }
 0x366   :  { %v477_v55 = vpop.f32.mrf.mxu0  ;;  %v316_v56 = vsel %vm241_vm2, %v312_v54, -inf }
 0x367   :  { %317 = vmax.xlane.f32.xlu0 %v316_v56  ;;  %v1940_v57 = vpop.f32.mrf.mxu1  ;;  %v481_v58 = vsel %vm241_vm2, %v477_v55, -inf }
 0x368   :  { %482 = vmax.xlane.f32.xlu1 %v481_v58  ;;  %v1950_v59 = vpop.f32.mrf.mxu0 }
 0x36d   :  { %v642_v60 = vpop.f32.mrf.mxu0 }
 0x36e   :  { %v646_v61 = vsel %vm241_vm2, %v642_v60, -inf }
 0x36f   :  { %647 = vmax.xlane.f32.xlu0 %v646_v61  ;;  %v1960_v62 = vpop.f32.mrf.mxu0 }
 0x371   :  { %v807_v63 = vpop.f32.mrf.mxu0 }
 0x372   :  { %v811_v2 = vsel %vm241_vm2, %v807_v63, -inf }
 0x373   :  { %812 = vmax.xlane.f32.xlu0 %v811_v2  ;;  %v1970_v3 = vpop.f32.mrf.mxu0 }
 0x375   :  { %v988_v4 = vpop.f32.mrf.mxu0 }
 0x376   :  { %v992_v5 = vsel %vm241_vm2, %v988_v4, -inf }
 0x377   :  { %993 = vmax.xlane.f32.xlu0 %v992_v5  ;;  %v1980_v6 = vpop.f32.mrf.mxu0 }
 0x379   :  { %v1153_v7 = vpop.f32.mrf.mxu0 }
 0x37a   :  { %v1157_v8 = vsel %vm241_vm2, %v1153_v7, -inf }
 0x37b   :  { %1158 = vmax.xlane.f32.xlu1 %v1157_v8  ;;  %v1990_v9 = vpop.f32.mrf.mxu0 }
 0x37d   :  { %v1318_v10 = vpop.f32.mrf.mxu0 }
 0x37e   :  { %v1322_v11 = vsel %vm241_vm2, %v1318_v10, -inf }
 0x37f   :  { %1323 = vmax.xlane.f32.xlu0 %v1322_v11  ;;  %v2000_v12 = vpop.f32.mrf.mxu0 }
 0x381   :  { %v1483_v13 = vpop.f32.mrf.mxu0 }
 0x382   :  { %v1487_v15 = vsel %vm241_vm2, %v1483_v13, -inf }
 0x383   :  { %v2010_v14 = vpop.f32.mrf.mxu0 }
 0x38c   :  { %327 = vrot.lane.b32.xlu1 %v2343_v38, %s2223_s28 }
 0x3b0   :  { %1488 = vmax.xlane.f32.xlu1 %v1487_v15 }
 0x3c1   :  { %657 = vrot.lane.b32.xlu1 %v2343_v38, %s2224_s29 }
 0x3c5   :  { %822 = vrot.lane.b32.xlu1 %v2343_v38, %s2225_s30 }
 0x3c9   :  { %1003 = vrot.lane.b32.xlu1 %v2351_v39, %s2223_s28 }
 0x3f0   :  { %v318_v16 = vpop.xlane.xlu0 %317 }
 0x3f1   :  { %v319_v17 = vsub.f32 %v312_v54, %v318_v16  ;;  %v483_v18 = vpop.xlane.xlu1 %482 }
 0x3f2   :  { %v484_v19 = vsub.f32 %v477_v55, %v483_v18 }
 0x3f3   :  { %v320_v20 = vmul.f32 1.442695, %v319_v17 }
 0x3f4   :  { %v485_v21 = vmul.f32 1.442695, %v484_v19 }
 0x3f5   :  { %2064 = vpow2.f32 %v320_v20 }
 0x3f6   :  { %2066 = vpow2.f32 %v485_v21 }
 0x3f8   :  { %v648_v22 = vpop.xlane.xlu0 %647 }
 0x3f9   :  { %v649_v35 = vsub.f32 %v642_v60, %v648_v22 }
 0x3fb   :  { %v650_v37 = vmul.f32 1.442695, %v649_v35 }
 0x3fc   :  { %v813_v23 = vpop.xlane.xlu0 %812 }
 0x3fd   :  { %v814_v24 = vsub.f32 %v807_v63, %v813_v23 }
 0x3ff   :  { %v815_v25 = vmul.f32 1.442695, %v814_v24 }
 0x400   :  { %v994_v36 = vpop.xlane.xlu0 %993 }
 0x401   :  { %2068 = vpow2.f32 %v815_v25  ;;  %v995_v40 = vsub.f32 %v988_v4, %v994_v36  ;;  %v1590_v36 = vld [vmem:[#allocation7 + $0x8] sm:$0xff] }
 0x402   :  { %v2065_v26 = vpop.eup %2064  ;;  %2070 = vpow2.f32 %v650_v37  ;;  %v1589_v37 = vld [vmem:[#allocation7] sm:$0xff] }
 0x403   :  { %v2414_v27 = vpop.eup %2066  ;;  %v322_v28 = vsel %vm241_vm2, %v2065_v26, 0.0  ;;  %v996_v42 = vmul.f32 1.442695, %v995_v40 }
 0x404   :  { %v1159_v29 = vpop.xlane.xlu1 %1158  ;;  %323 = vadd.xlane.f32.xlu0 %v322_v28  ;;  %v487_v30 = vsel %vm241_vm2, %v2414_v27, 0.0 }
 0x405   :  { %488 = vadd.xlane.f32.xlu1 %v487_v30  ;;  %2072 = vpow2.f32 %v996_v42  ;;  %v1160_v44 = vsub.f32 %v1153_v7, %v1159_v29 }
 0x407   :  { %v1161_v46 = vmul.f32 1.442695, %v1160_v44 }
 0x408   :  { %v328_v31 = vpop.permute.xlu1 %327  ;;  %v1324_v41 = vpop.xlane.xlu0 %1323 }
 0x409   :  { %1942 = vmatpush3.msra.mxu1 %v328_v31  ;;  %v1325_v43 = vsub.f32 %v1318_v10, %v1324_v41 }
 0x40a   :  { %1951 = vmatprep.subr.mxu1 %v2214_v34 }
 0x40b   :  { %v1326_v45 = vmul.f32 1.442695, %v1325_v43 }
 0x40d   :  { %2074 = vpow2.f32 %v1326_v45 }
 0x40e   :  { %v2420_v32 = vpop.eup %2068  ;;  %2076 = vpow2.f32 %v1161_v46 }
 0x40f   :  { %v817_v33 = vsel %vm241_vm2, %v2420_v32, 0.0  ;;  %v2071_v47 = vpop.eup %2070 }
 0x410   :  { %818 = vadd.xlane.f32.xlu1 %v817_v33  ;;  %v652_v48 = vsel %vm241_vm2, %v2071_v47, 0.0  ;;  %v1591_v33 = vld [vmem:[#allocation7 + $0x10] sm:$0xff] }
 0x41a   :  { %492 = vrot.lane.b32.xlu0 %v2343_v38, %s2226_s12  ;;  %v2427_v38 = vpop.eup %2072 }
 0x41b   :  { %v998_v52 = vsel %vm241_vm2, %v2427_v38, 0.0  ;;  %v2431_v53 = vpop.eup %2074 }
 0x41c   :  { %v1328_v54 = vsel %vm241_vm2, %v2431_v53, 0.0  ;;  %v2077_v55 = vpop.eup %2076 }
 0x41d   :  { %v1163_v56 = vsel %vm241_vm2, %v2077_v55, 0.0 }
 0x421   :  { %1168 = vrot.lane.b32.xlu1 %v2351_v39, %s2226_s12 }
 0x439   :  { %v1489_v49 = vpop.xlane.xlu1 %1488  ;;  %653 = vadd.xlane.f32.xlu0 %v652_v48 }
 0x43a   :  { %v1490_v50 = vsub.f32 %v1483_v13, %v1489_v49 }
 0x43c   :  { %v1491_v51 = vmul.f32 1.442695, %v1490_v50 }
 0x43d   :  { %999 = vadd.xlane.f32.xlu0 %v998_v52  ;;  %v658_v59 = vpop.permute.xlu1 %657 }
 0x43e   :  { %2078 = vpow2.f32 %v1491_v51 }
 0x441   :  { %1329 = vadd.xlane.f32.xlu0 %v1328_v54  ;;  %v823_v60 = vpop.permute.xlu1 %822 }
 0x445   :  { %1164 = vadd.xlane.f32.xlu1 %v1163_v56  ;;  %v1004_v61 = vpop.permute.xlu1 %1003 }
 0x44b   :  { %v2436_v57 = vpop.eup %2078 }
 0x44c   :  { %v1493_v58 = vsel %vm241_vm2, %v2436_v57, 0.0 }
 0x44d   :  { %1494 = vadd.xlane.f32.xlu0 %v1493_v58 }
 0x456   :  { %1498 = vrot.lane.b32.xlu1 %v2351_v39, %s2225_s30 }
 0x463   :  { %1333 = vrot.lane.b32.xlu0 %v2351_v39, %s2224_s29 }
 0x48d   :  { %v324_v62 = vpop.xlane.xlu0 %323 }
 0x48e   :  { %2080 = vrcp.f32 %v324_v62  ;;  %v489_v63 = vpop.xlane.xlu1 %488 }
 0x48f   :  { %2082 = vrcp.f32 %v489_v63 }
 0x491   :  { %v493_v5 = vpop.permute.xlu0 %492 }
 0x499   :  { %v819_v6 = vpop.xlane.xlu1 %818 }
 0x49b   :  { %v2081_v2 = vpop.eup %2080 }
 0x49c   :  { %v326_v3 = vmul.f32 %v2081_v2, %v2065_v26  ;;  %v2083_v4 = vpop.eup %2082 }
 0x49d   :  { %v491_v39 = vmul.f32 %v2083_v4, %v2414_v27  ;;  %v1169_v9 = vpop.permute.xlu1 %1168 }
 0x49e   :  { %1944 = vmatmul.mubr.msk.f32.vlgmr.msra.gmra.mxu1 %vm241_vm2, %v326_v3 }
 0x49f   :  { %1952 = vmatpush3.msra.mxu1 %v493_v5  ;;  %1953 = vmatprep.mubr.msk.f32.mxu1 %vm2215_vm1, %v2214_v34 }
 0x4a0   :  { %1961 = vmatprep.subr.mxu1 %v2214_v34 }
 0x4a2   :  { %1954 = vmatmul.mubr.msk.f32.vlgmr.msra.gmra.mxu1 %vm241_vm2, %v491_v39 }
 0x4a3   :  { %1962 = vmatpush3.msra.mxu1 %v658_v59  ;;  %1963 = vmatprep.mubr.msk.f32.mxu1 %vm2215_vm1, %v2214_v34 }
 0x4a4   :  { %1971 = vmatprep.subr.mxu1 %v2214_v34 }
 0x4c2   :  { %v654_v7 = vpop.xlane.xlu0 %653 }
 0x4c3   :  { %2084 = vrcp.f32 %v654_v7 }
 0x4c4   :  { %2086 = vrcp.f32 %v819_v6 }
 0x4c6   :  { %v1000_v8 = vpop.xlane.xlu0 %999 }
 0x4c7   :  { %2088 = vrcp.f32 %v1000_v8 }
 0x4ca   :  { %v1330_v10 = vpop.xlane.xlu0 %1329 }
 0x4ce   :  { %v1165_v11 = vpop.xlane.xlu1 %1164 }
 0x4cf   :  { %2090 = vrcp.f32 %v1165_v11 }
 0x4d0   :  { %v2085_v12 = vpop.eup %2084  ;;  %2092 = vrcp.f32 %v1330_v10 }
 0x4d1   :  { %v656_v13 = vmul.f32 %v2085_v12, %v2071_v47  ;;  %v2087_v14 = vpop.eup %2086 }
 0x4d2   :  { %v821_v15 = vmul.f32 %v2087_v14, %v2420_v32  ;;  %v1499_v24 = vpop.permute.xlu1 %1498  ;;  %v1592_v32 = vld [vmem:[#allocation7 + $0x18] sm:$0xff] }
 0x4d3   :  { %1964 = vmatmul.mubr.msk.f32.vlgmr.msra.gmra.mxu1 %vm241_vm2, %v656_v13  ;;  %2016 = vmatprep.subr.mxu0 %v1592_v32 }
 0x4d4   :  { %1972 = vmatpush3.msra.mxu1 %v823_v60  ;;  %1973 = vmatprep.mubr.msk.f32.mxu1 %vm2215_vm1, %v2214_v34  ;;  %v2089_v16 = vpop.eup %2088  ;;  %v1867_v60 = vld [vmem:[%s2519_s8] ss:$0 sm:$0xff] }
 0x4d5   :  { %1981 = vmatprep.subr.mxu1 %v2214_v34  ;;  %v1002_v18 = vmul.f32 %v2089_v16, %v2427_v38  ;;  %2017 = vmatpush3.msra.mxu0 %v1592_v32  ;;  %v1725_v16 = vld [vmem:[#allocation8 + $0x8] sm:$0xff] }
 0x4d6   :  { %v1495_v17 = vpop.xlane.xlu0 %1494  ;;  %2018 = vmatprep.subr.mxu0 %v1591_v33 }
 0x4d7   :  { %2094 = vrcp.f32 %v1495_v17  ;;  %1974 = vmatmul.mubr.msk.f32.vlgmr.msra.gmra.mxu1 %vm241_vm2, %v821_v15  ;;  %2019 = vmatpush3.msra.mxu0 %v1591_v33  ;;  %v1726_v15 = vld [vmem:[#allocation8 + $0x10] sm:$0xff]  ;;  %v1724_v17 = vld [vmem:[#allocation8] sm:$0xff] }
 0x4d8   :  { %1982 = vmatpush3.msra.mxu1 %v1004_v61  ;;  %1983 = vmatprep.mubr.msk.f32.mxu1 %vm2215_vm1, %v2214_v34 }
 0x4d9   :  { %1991 = vmatprep.subr.mxu1 %v2214_v34  ;;  %2020 = vmatprep.subr.mxu0 %v1590_v36 }
 0x4da   :  { %v1334_v22 = vpop.permute.xlu0 %1333  ;;  %2021 = vmatpush3.msra.mxu0 %v1590_v36 }
 0x4db   :  { %1984 = vmatmul.mubr.msk.f32.vlgmr.msra.gmra.mxu1 %vm241_vm2, %v1002_v18  ;;  %2022 = vmatprep.subr.mxu0 %v1589_v37 }
 0x4dc   :  { %v2091_v19 = vpop.eup %2090  ;;  %1992 = vmatpush3.msra.mxu1 %v1169_v9  ;;  %1993 = vmatprep.mubr.msk.f32.mxu1 %vm2215_vm1, %v2214_v34 }
 0x4dd   :  { %2001 = vmatprep.subr.mxu1 %v2214_v34  ;;  %v1167_v20 = vmul.f32 %v2091_v19, %v2077_v55  ;;  %v2093_v21 = vpop.eup %2092  ;;  %2023 = vmatpush3.msra.mxu0 %v1589_v37 }
 0x4de   :  { %v1332_v23 = vmul.f32 %v2093_v21, %v2431_v53 }
 0x4df   :  { %1994 = vmatmul.mubr.msk.f32.vlgmr.msra.gmra.mxu1 %vm241_vm2, %v1167_v20 }
 0x4e0   :  { %2002 = vmatpush3.msra.mxu1 %v1334_v22  ;;  %2003 = vmatprep.mubr.msk.f32.mxu1 %vm2215_vm1, %v2214_v34 }
 0x4e1   :  { %2011 = vmatprep.subr.mxu1 %v2214_v34 }
 0x4e3   :  { %2004 = vmatmul.mubr.msk.f32.vlgmr.msra.gmra.mxu1 %vm241_vm2, %v1332_v23 }
 0x4e4   :  { %v2095_v25 = vpop.eup %2094  ;;  %2012 = vmatpush3.msra.mxu1 %v1499_v24  ;;  %2013 = vmatprep.mubr.msk.f32.mxu1 %vm2215_vm1, %v2214_v34 }
 0x4e5   :  { %v1497_v26 = vmul.f32 %v2095_v25, %v2436_v57  ;;  %v1870_v25 = vld [vmem:[%s2514_s3] ss:$0 sm:$0xff]  ;;  %s2229_s3 = smov [#allocation10]  }
 0x4e6   :  { %s1824_s18 = sshll.u32 %s2229_s3, 4  ;;  %s1825_s18 = int_to_ptr.vmem [resolvable:$true] %s1824_s18 }
 0x4e7   :  { %2014 = vmatmul.mubr.msk.f32.vlgmr.msra.gmra.mxu1 %vm241_vm2, %v1497_v26  ;;  %p2185_p7 = scmp.lt.s32.totalorder %s1825_s18, %s1825_s18 }
 0x55e   :  { %v399_v27 = vpop.f32.mrf.mxu1 }
 0x560   :  { %v1945_v28 = vpop.f32.mrf.mxu1 }
 0x562   :  { %v564_v29 = vpop.f32.mrf.mxu1 }
 0x563   :  { %899 = vrot.lane.b32.xlu0 %v564_v29, %s2211_s23 }
 0x564   :  { %v1955_v30 = vpop.f32.mrf.mxu1 }
 0x593   :  { %v729_v31 = vpop.f32.mrf.mxu1 }
 0x594   :  { %903 = vrot.lane.b32.xlu1 %v729_v31, %s2227_s13 }
 0x595   :  { %v1965_v35 = vpop.f32.mrf.mxu1 }
 0x596   :  { %v1872_v35 = vld [vmem:[%s2521_s10] ss:$0 sm:$0xff] }
 0x597   :  { %v894_v34 = vpop.f32.mrf.mxu1 }
 0x598   :  { %907 = vrot.lane.b32.xlu1 %v894_v34, %s2228_s5 }
 0x599   :  { %v1975_v40 = vpop.f32.mrf.mxu1 }
 0x59b   :  { %v1075_v41 = vpop.f32.mrf.mxu1 }
 0x59d   :  { %v1985_v42 = vpop.f32.mrf.mxu1 }
 0x59f   :  { %v1240_v43 = vpop.f32.mrf.mxu1 }
 0x5a0   :  { %1575 = vrot.lane.b32.xlu0 %v1240_v43, %s2211_s23 }
 0x5a1   :  { %v1995_v44 = vpop.f32.mrf.mxu1 }
 0x5a3   :  { %v1405_v45 = vpop.f32.mrf.mxu1 }
 0x5a4   :  { %1579 = vrot.lane.b32.xlu0 %v1405_v45, %s2227_s13 }
 0x5a5   :  { %v2005_v46 = vpop.f32.mrf.mxu1 }
 0x5a7   :  { %v1570_v47 = vpop.f32.mrf.mxu1 }
 0x5a8   :  { %1583 = vrot.lane.b32.xlu1 %v1570_v47, %s2228_s5 }
 0x5a9   :  { %v2015_v48 = vpop.f32.mrf.mxu1 }
 0x5d5   :  { %v900_v38 = vpop.permute.xlu0 %899 }
 0x5d6   :  { %v910_v50 = vsel %vm241_vm2, %v399_v27, %v900_v38  ;;  %v1871_v27 = vld [vmem:[%s2515_s4] ss:$0 sm:$0xff]  ;;  %s2180_s4 = scalar_lea.vmem %s1825_s18, 256 }
 0x5d7   :  { %p2181_p6 = scmp.ne.s32.totalorder %s1825_s18, %s2180_s4  ;;  %p2186_p8 = scmp.lt.s32.totalorder %s2180_s4, %s2180_s4 }
 0x5d9   :  { %p2187_p9 = por %p2186_p8, %p2185_p7 }
 0x5db   :  { %p2188_p10 = pnand %p2187_p9, %p2181_p6 }
 0x606   :  { %v904_v49 = vpop.permute.xlu1 %903 }
 0x607   :  { %v912_v51 = vsel %vm911_vm3, %v910_v50, %v904_v49 }
 0x60a   :  { %v908_v52 = vpop.permute.xlu1 %907 }
 0x60b   :  { %v914_v53 = vsel %vm913_vm4, %v912_v51, %v908_v52 }
 0x60c   :  { %2024 = vmatprep.mubr.msk.f32.mxu0 %vm103_vm0, %v914_v53 }
 0x612   :  { %v1576_v54 = vpop.permute.xlu0 %1575 }
 0x613   :  { %v1586_v56 = vsel %vm241_vm2, %v1075_v41, %v1576_v54 }
 0x616   :  { %v1580_v55 = vpop.permute.xlu0 %1579 }
 0x617   :  { %v1587_v57 = vsel %vm911_vm3, %v1586_v56, %v1580_v55 }
 0x61a   :  { %v1584_v58 = vpop.permute.xlu1 %1583 }
 0x61b   :  { %v1588_v59 = vsel %vm913_vm4, %v1587_v57, %v1584_v58 }
 0x61c   :  { %2025 = vmatmul.mubr.msk.f32.vlgmr.msra.gmra.mxu0 %vm103_vm0, %v1588_v59 }
 0x6dc   :  { %v2026_v61 = vpop.f32.mrf.mxu0 }
 0x6dd   :  { %v1677_v62 = vadd.f32 %v2026_v61, %v1867_v60 }
 0x6de   :  { %v1671_v63 = vpop.f32.mrf.mxu0 }
 0x6df   :  { %v1681_v2 = vadd.f32 %v1677_v62, %v2316_v1  ;;  %v1672_v3 = vadd.f32 %v1867_v60, %v1671_v63 }
 0x6e1   :  { %v1680_v4 = vadd.f32 %v1672_v3, %v2314_v0  ;;  %v1685_v5 = vsel %vm103_vm0, %v1681_v2, 0.0  ;;  %v1727_v0 = vld [vmem:[#allocation8 + $0x18] sm:$0xff] }
 0x6e2   :  { %1686 = vadd.xlane.f32.xlu1 %v1685_v5  ;;  %2027 = vmatprep.subr.mxu1 %v1727_v0 }
 0x6e3   :  { %v1682_v39 = vsel %vm103_vm0, %v1680_v4, 0.0  ;;  %2028 = vmatpush3.msra.mxu1 %v1727_v0 }
 0x6e4   :  { %1683 = vadd.xlane.f32.xlu0 %v1682_v39  ;;  %2029 = vmatprep.subr.mxu1 %v1726_v15 }
 0x6e5   :  { %2030 = vmatpush3.msra.mxu1 %v1726_v15 }
 0x6e6   :  { %2031 = vmatprep.subr.mxu1 %v1725_v16 }
 0x6e7   :  { %2032 = vmatpush3.msra.mxu1 %v1725_v16 }
 0x6e8   :  { %2033 = vmatprep.subr.mxu1 %v1724_v17 }
 0x6e9   :  { %2034 = vmatpush3.msra.mxu1 %v1724_v17 }
 0x76b   :  { %v1687_v6 = vpop.xlane.xlu1 %1686 }
 0x76c   :  { %v1689_v7 = vmul.f32 0.03125, %v1687_v6 }
 0x76d   :  { %v1684_v8 = vpop.xlane.xlu0 %1683 }
 0x76e   :  { %v1688_v9 = vmul.f32 0.03125, %v1684_v8  ;;  %v1691_v10 = vsub.f32 %v1681_v2, %v1689_v7 }
 0x770   :  { %v1690_v11 = vsub.f32 %v1680_v4, %v1688_v9  ;;  %v1693_v14 = vmul.f32 %v1691_v10, %v1691_v10 }
 0x772   :  { %v1692_v12 = vmul.f32 %v1690_v11, %v1690_v11  ;;  %v1697_v1 = vsel %vm103_vm0, %v1693_v14, 0.0 }
 0x774   :  { %v1694_v13 = vsel %vm103_vm0, %v1692_v12, 0.0 }
 0x775   :  { %1695 = vadd.xlane.f32.xlu0 %v1694_v13 }
 0x779   :  { %1698 = vadd.xlane.f32.xlu0 %v1697_v1 }
 0x7fe   :  { %v1696_v18 = vpop.xlane.xlu0 %1695 }
 0x7ff   :  { %v1700_v19 = vmul.f32 0.03125, %v1696_v18 }
 0x801   :  { %v1702_v20 = vadd.f32 1e-05, %v1700_v19 }
 0x802   :  { %v1699_v21 = vpop.xlane.xlu0 %1698 }
 0x803   :  { %2096 = vrsqrt.f32 %v1702_v20  ;;  %v1701_v22 = vmul.f32 0.03125, %v1699_v21 }
 0x805   :  { %v1703_v23 = vadd.f32 1e-05, %v1701_v22 }
 0x807   :  { %2098 = vrsqrt.f32 %v1703_v23 }
 0x810   :  { %v2097_v24 = vpop.eup %2096 }
 0x811   :  { %v1706_v26 = vmul.f32 %v2097_v24, %v1690_v11 }
 0x813   :  { %v1714_v28 = vmul.f32 %v1870_v25, %v1706_v26 }
 0x814   :  { %v2099_v29 = vpop.eup %2098 }
 0x815   :  { %v1707_v30 = vmul.f32 %v2099_v29, %v1691_v10  ;;  %v1722_v31 = vadd.f32 %v1871_v27, %v1714_v28 }
 0x817   :  { %v1715_v32 = vmul.f32 %v1870_v25, %v1707_v30  ;;  %2035 = vmatprep.mubr.msk.f32.mxu1 %vm103_vm0, %v1722_v31 }
 0x819   :  { %v1723_v33 = vadd.f32 %v1871_v27, %v1715_v32 }
 0x81b   :  { %2036 = vmatmul.mubr.msk.f32.vlgmr.msra.gmra.mxu1 %vm103_vm0, %v1723_v33 }
 0x8db   :  { %v2037_v34 = vpop.f32.mrf.mxu1 }
 0x8dc   :  { %v1812_v36 = vadd.f32 %v2037_v34, %v1872_v35 }
 0x8dd   :  { %v1806_v37 = vpop.f32.mrf.mxu1 }
 0x8de   :  { %v1816_v40 = vadd.f32 %v1812_v36, %v1681_v2  ;;  %v1807_v41 = vadd.f32 %v1872_v35, %v1806_v37 }
 0x8e0   :  { %1818 = vst.msk [vmem:[#allocation10 + $0x8] sm:$0xff] %vm103_vm0, %v1816_v40  ;;  %v1815_v42 = vadd.f32 %v1807_v41, %v1680_v4 }
 0x8e2   :  { %1817 = vst.msk [vmem:[#allocation10] sm:$0xff] %vm103_vm0, %v1815_v42 }
 0x8e3   :  { %2191 = shalt.err (!%p2188_p10)
}
 0x8e4   :  { %1830 = dma.vmem_to_hbm [thread:$0]  %s1825_s18, 256, %s2522_s11, [#allocation4], %s2210_s22, %s2210_s22, %s2211_s23  }
 0x8e5   :  { %2206 = dma.done.wait [#allocation4], 256  }
 0x8e6   :  { %2207 = vsyncadd [#allocation4], 4294967040 }
 0x8e7   :  { %1834 = vsyncpa [#allocation3], 1 }
 0x8e8   :  { %1835 = vsyncpa [#allocation6], 1 }
 0x8e9   :  { %1836 = vsyncpa [#allocation9], 1 }
 0x8ea   :  { %1837 = vsyncpa [#allocation4], 1 }

// kernel: tpu_custom_call.1
= control target key start
LH: loop header
LB: loop body
LE: loop exit
PB: predicated region body
PF: predicated region fallthrough
CT: control target
= control target key end

     0   :  { %16 = vsyncpa [#allocation3], 0  ;;  %s2511_s0 = inlined_call_operand.hbm [shape: f32[16,32], index: 0, kind: input, shape index: {}]   ;;  %s2512_s1 = inlined_call_operand.vmem [shape: f32[1,32], index: 1, kind: input, shape index: {}]   ;;  %s2513_s2 = inlined_call_operand.vmem [shape: f32[1,32], index: 2, kind: input, shape index: {}]   ;;  %s2514_s3 = inlined_call_operand.vmem [shape: f32[1,32], index: 3, kind: input, shape index: {}]   ;;  %s2515_s4 = inlined_call_operand.vmem [shape: f32[1,32], index: 4, kind: input, shape index: {}]   ;;  %s2516_s5 = inlined_call_operand.hbm [shape: f32[32,96], index: 5, kind: input, shape index: {}]   ;;  %s2517_s6 = inlined_call_operand.vmem [shape: f32[1,96], index: 6, kind: input, shape index: {}]   ;;  %s2518_s7 = inlined_call_operand.hbm [shape: f32[32,32], index: 7, kind: input, shape index: {}]   ;;  %s2519_s8 = inlined_call_operand.vmem [shape: f32[1,32], index: 8, kind: input, shape index: {}]   ;;  %s2520_s9 = inlined_call_operand.hbm [shape: f32[32,32], index: 9, kind: input, shape index: {}]   ;;  %s2521_s10 = inlined_call_operand.vmem [shape: f32[1,32], index: 10, kind: input, shape index: {}]   ;;  %s2522_s11 = inlined_call_operand.hbm [shape: f32[16,32], index: 11, kind: output, shape index: {}]  }
   0x1   :  { %17 = vsyncpa [#allocation6], 0 }
   0x2   :  { %18 = vsyncpa [#allocation9], 0 }
   0x3   :  { %19 = vsyncpa [#allocation4], 0  ;;  %s2208_s17 = smov [#allocation5]   ;;  %s2209_s19 = smov [#allocation2]  }
   0x4   :  { %s45_s18 = sshll.u32 %s2208_s17, 4  ;;  %s25_s20 = sshll.u32 %s2209_s19, 4  ;;  %s46_s18 = int_to_ptr.vmem [resolvable:$true] %s45_s18  ;;  %s26_s20 = int_to_ptr.vmem [resolvable:$true] %s25_s20 }
   0x5   :  { %s2108_s21 = scalar_lea.vmem %s46_s18, 512  ;;  %p2113_p1 = scmp.lt.s32.totalorder %s46_s18, %s46_s18 }
   0x6   :  { %p2109_p0 = scmp.ne.s32.totalorder %s46_s18, %s2108_s21  ;;  %p2114_p2 = scmp.lt.s32.totalorder %s2108_s21, %s2108_s21 }
   0x8   :  { %p2115_p3 = por %p2114_p2, %p2113_p1 }
   0xa   :  { %p2116_p4 = pnand %p2115_p3, %p2109_p0 }
   0xc   :  { %2119 = shalt.err (!%p2116_p4)
}
   0xd   :  { %s2210_s22 = smov 128   ;;  %s2211_s23 = smov 8  }
   0xe   :  { %51 = dma.hbm_to_vmem [thread:$0]  %s2516_s5, 512, %s46_s18, [#allocation6], %s2210_s22, %s2210_s22, %s2211_s23  }
   0xf   :  { %s2128_s26 = scalar_lea.vmem %s26_s20, 256  ;;  %p2133_p6 = scmp.lt.s32.totalorder %s26_s20, %s26_s20 }
  0x10   :  { %p2129_p5 = scmp.ne.s32.totalorder %s26_s20, %s2128_s26  ;;  %p2134_p7 = scmp.lt.s32.totalorder %s2128_s26, %s2128_s26 }
  0x12   :  { %p2135_p8 = por %p2134_p7, %p2133_p6 }
  0x14   :  { %p2136_p9 = pnand %p2135_p8, %p2129_p5 }
  0x16   :  { %2139 = shalt.err (!%p2136_p9)
}
  0x17   :  { %31 = dma.hbm_to_vmem [thread:$0]  %s2511_s0, 256, %s26_s20, [#allocation3], %s2210_s22, %s2210_s22, %s2211_s23  }
  0x18   :  { %s2212_s29 = smov [#allocation7]   ;;  %s2213_s12 = smov [#allocation8]  }
  0x19   :  { %s59_s30 = sshll.u32 %s2212_s29, 4  ;;  %s73_s13 = sshll.u32 %s2213_s12, 4  ;;  %s60_s30 = int_to_ptr.vmem [resolvable:$true] %s59_s30  ;;  %s74_s13 = int_to_ptr.vmem [resolvable:$true] %s73_s13 }
  0x1a   :  { %s2148_s5 = scalar_lea.vmem %s60_s30, 512  ;;  %p2153_p11 = scmp.lt.s32.totalorder %s60_s30, %s60_s30 }
  0x1b   :  { %p2149_p10 = scmp.ne.s32.totalorder %s60_s30, %s2148_s5  ;;  %p2154_p12 = scmp.lt.s32.totalorder %s2148_s5, %s2148_s5 }
  0x1d   :  { %p2155_p13 = por %p2154_p12, %p2153_p11 }
  0x1f   :  { %p2156_p0 = pnand %p2155_p13, %p2149_p10 }
  0x21   :  { %2159 = shalt.err (!%p2156_p0)
}
  0x22   :  { %65 = dma.hbm_to_vmem [thread:$0]  %s2518_s7, 512, %s60_s30, [#allocation6], %s2210_s22, %s2210_s22, %s2211_s23  }
  0x23   :  { %s2168_s0 = scalar_lea.vmem %s74_s13, 512  ;;  %p2173_p2 = scmp.lt.s32.totalorder %s74_s13, %s74_s13 }
  0x24   :  { %p2169_p1 = scmp.ne.s32.totalorder %s74_s13, %s2168_s0  ;;  %p2174_p3 = scmp.lt.s32.totalorder %s2168_s0, %s2168_s0 }
  0x26   :  { %p2175_p4 = por %p2174_p3, %p2173_p2 }
  0x28   :  { %p2176_p5 = pnand %p2175_p4, %p2169_p1 }
  0x2a   :  { %2179 = shalt.err (!%p2176_p5)
}
  0x2b   :  { %79 = dma.hbm_to_vmem [thread:$0]  %s2520_s9, 512, %s74_s13, [#allocation9], %s2210_s22, %s2210_s22, %s2211_s23  }
  0x2c   :  { %2200 = dma.done.wait [#allocation3], 256  }
  0x2d   :  { %2201 = vsyncadd [#allocation3], 4294967040 }
  0x2e   :  { %2202 = dma.done.wait [#allocation6], 1024  }
  0x2f   :  { %2203 = vsyncadd [#allocation6], 4294966272 }
  0x30   :  { %2204 = dma.done.wait [#allocation9], 512  }
  0x31   :  { %2205 = vsyncadd [#allocation9], 4294966784  ;;  %vm103_vm0 = vcmask 261120   ;;  %v2314_v0 = vld [vmem:[#allocation2] sm:$0xff]  ;;  %v2316_v1 = vld [vmem:[#allocation2 + $0x8] sm:$0xff]  ;;  %v2214_v34 = vmov 0.0  }
  0x32   :  { %v104_v2 = vsel %vm103_vm0, %v2314_v0, 0.0  ;;  %v107_v3 = vsel %vm103_vm0, %v2316_v1, 0.0  ;;  %v150_v14 = vld [vmem:[#allocation5 + $0x18] sm:$0xff]  ;;  %v149_v15 = vld [vmem:[#allocation5 + $0x10] sm:$0xff]  ;;  %v148_v16 = vld [vmem:[#allocation5 + $0x8] sm:$0xff]  ;;  %1936 = vmatprep.subr.mxu1 %v2214_v34  ;;  %vm2215_vm1 = vmmov 0  }
  0x33   :  { %105 = vadd.xlane.f32.xlu0 %v104_v2  ;;  %1925 = vmatprep.subr.mxu0 %v150_v14  ;;  %v147_v17 = vld [vmem:[#allocation5] sm:$0xff]  ;;  %v1838_v25 = vld [vmem:[%s2512_s1] ss:$0 sm:$0xff]  ;;  %s2216_s20 = smov 88   ;;  %s2217_s21 = smov 96   ;;  %vm241_vm2 = vcmask 64512  }
  0x34   :  { %1926 = vmatpush3.msra.mxu0 %v150_v14  ;;  %v1839_v27 = vld [vmem:[%s2513_s2] ss:$0 sm:$0xff]  ;;  %1938 = vmatprep.mubr.msk.f32.mxu1 %vm2215_vm1, %v2214_v34  ;;  %s2218_s24 = smov 120   ;;  %s2219_s25 = smov 112   ;;  %vm911_vm3 = vcmask 130048   ;;  %vm913_vm4 = vcmask 195584  }
  0x35   :  { %1927 = vmatprep.subr.mxu0 %v149_v15  ;;  %v1840_v36 = vld [vmem:[%s2517_s6] ss:$0 sm:$0xff]  ;;  %s2220_s26 = smov 80   ;;  %s2221_s27 = smov 104  }
  0x36   :  { %1928 = vmatpush3.msra.mxu0 %v149_v15  ;;  %s2222_s6 = smov 72   ;;  %s2223_s28 = smov 64  }
  0x37   :  { %108 = vadd.xlane.f32.xlu0 %v107_v3  ;;  %1929 = vmatprep.subr.mxu0 %v148_v16  ;;  %s2224_s29 = smov 48   ;;  %s2225_s30 = smov 40  }
  0x38   :  { %1930 = vmatpush3.msra.mxu0 %v148_v16  ;;  %s2226_s12 = smov 56   ;;  %s2227_s13 = smov 16  }
  0x39   :  { %1931 = vmatprep.subr.mxu0 %v147_v17  ;;  %s2228_s5 = smov 24  }
  0x3a   :  { %1932 = vmatpush3.msra.mxu0 %v147_v17 }
  0x3b   :  { %1946 = vmatprep.subr.mxu0 %v2214_v34 }
  0xbc   :  { %v106_v4 = vpop.xlane.xlu0 %105 }
  0xbd   :  { %v111_v5 = vmul.f32 0.03125, %v106_v4 }
  0xbf   :  { %v113_v6 = vsub.f32 %v2314_v0, %v111_v5 }
  0xc0   :  { %v109_v7 = vpop.xlane.xlu0 %108 }
  0xc1   :  { %v112_v8 = vmul.f32 0.03125, %v109_v7  ;;  %v115_v9 = vmul.f32 %v113_v6, %v113_v6 }
  0xc3   :  { %v114_v10 = vsub.f32 %v2316_v1, %v112_v8  ;;  %v117_v11 = vsel %vm103_vm0, %v115_v9, 0.0 }
  0xc4   :  { %118 = vadd.xlane.f32.xlu1 %v117_v11 }
  0xc5   :  { %v116_v12 = vmul.f32 %v114_v10, %v114_v10 }
  0xc7   :  { %v120_v13 = vsel %vm103_vm0, %v116_v12, 0.0 }
  0xc8   :  { %121 = vadd.xlane.f32.xlu1 %v120_v13 }
 0x14d   :  { %v119_v18 = vpop.xlane.xlu1 %118 }
 0x14e   :  { %v123_v19 = vmul.f32 0.03125, %v119_v18 }
 0x150   :  { %v125_v20 = vadd.f32 1e-05, %v123_v19 }
 0x151   :  { %v122_v21 = vpop.xlane.xlu1 %121 }
 0x152   :  { %2060 = vrsqrt.f32 %v125_v20  ;;  %v124_v22 = vmul.f32 0.03125, %v122_v21 }
 0x154   :  { %v126_v23 = vadd.f32 1e-05, %v124_v22 }
 0x156   :  { %2062 = vrsqrt.f32 %v126_v23 }
 0x15f   :  { %v2061_v24 = vpop.eup %2060 }
 0x160   :  { %v129_v26 = vmul.f32 %v2061_v24, %v113_v6 }
 0x162   :  { %v137_v28 = vmul.f32 %v1838_v25, %v129_v26 }
 0x163   :  { %v2063_v29 = vpop.eup %2062 }
 0x164   :  { %v130_v30 = vmul.f32 %v2063_v29, %v114_v10  ;;  %v145_v31 = vadd.f32 %v1839_v27, %v137_v28 }
 0x166   :  { %v138_v32 = vmul.f32 %v1838_v25, %v130_v30  ;;  %1933 = vmatprep.mubr.msk.f32.mxu0 %vm103_vm0, %v145_v31 }
 0x168   :  { %v146_v33 = vadd.f32 %v1839_v27, %v138_v32 }
 0x16a   :  { %1934 = vmatmul.mubr.msk.f32.vlgmr.msra.gmra.mxu0 %vm103_vm0, %v146_v33 }
 0x16b   :  { %1948 = vmatprep.mubr.msk.f32.mxu0 %vm2215_vm1, %v2214_v34 }
 0x22a   :  { %v1935_v35 = vpop.f32.mrf.mxu0 }
 0x22b   :  { %v2351_v39 = vadd.f32 %v1935_v35, %v1840_v36 }
 0x22c   :  { %v229_v37 = vpop.f32.mrf.mxu0 }
 0x22d   :  { %v2343_v38 = vadd.f32 %v1840_v36, %v229_v37 }
 0x22f   :  { %405 = vrot.lane.b32.xlu1 %v2343_v38, %s2216_s20  ;;  %239 = vrot.lane.b32.xlu0 %v2343_v38, %s2217_s21 }
 0x233   :  { %403 = vrot.lane.b32.xlu1 %v2343_v38, %s2218_s24  ;;  %568 = vrot.lane.b32.xlu0 %v2343_v38, %s2219_s25 }
 0x237   :  { %570 = vrot.lane.b32.xlu1 %v2343_v38, %s2220_s26  ;;  %733 = vrot.lane.b32.xlu0 %v2343_v38, %s2221_s27 }
 0x23b   :  { %735 = vrot.lane.b32.xlu1 %v2343_v38, %s2222_s6  ;;  %1081 = vrot.lane.b32.xlu0 %v2351_v39, %s2216_s20 }
 0x23f   :  { %916 = vrot.lane.b32.xlu1 %v2351_v39, %s2217_s21  ;;  %1246 = vrot.lane.b32.xlu0 %v2351_v39, %s2220_s26 }
 0x243   :  { %1079 = vrot.lane.b32.xlu1 %v2351_v39, %s2218_s24  ;;  %1411 = vrot.lane.b32.xlu0 %v2351_v39, %s2222_s6 }
 0x247   :  { %1244 = vrot.lane.b32.xlu1 %v2351_v39, %s2219_s25 }
 0x24b   :  { %1409 = vrot.lane.b32.xlu1 %v2351_v39, %s2221_s27 }
 0x2a1   :  { %v406_v40 = vpop.permute.xlu1 %405  ;;  %v240_v41 = vpop.permute.xlu0 %239 }
 0x2a2   :  { %1937 = vmatpush3.xpose.msk.msra.mxu1 %vm241_vm2, %v240_v41  ;;  %1947 = vmatpush3.xpose.msk.msra.mxu0 %vm241_vm2, %v406_v40 }
 0x2a3   :  { %1956 = vmatprep.subr.mxu0 %v2214_v34  ;;  %1941 = vmatprep.subr.mxu1 %v2214_v34 }
 0x2a5   :  { %v404_v42 = vpop.permute.xlu1 %403  ;;  %1939 = vmatmul.mubr.msk.f32.vlgmr.msra.gmra.mxu1 %vm241_vm2, %v2343_v38  ;;  %v569_v43 = vpop.permute.xlu0 %568 }
 0x2a6   :  { %1949 = vmatmul.mubr.msk.f32.vlgmr.msra.gmra.mxu0 %vm241_vm2, %v404_v42  ;;  %1943 = vmatprep.mubr.msk.f32.mxu1 %vm2215_vm1, %v2214_v34 }
 0x2a7   :  { %1958 = vmatprep.mubr.msk.f32.mxu0 %vm2215_vm1, %v2214_v34 }
 0x2a9   :  { %v571_v44 = vpop.permute.xlu1 %570  ;;  %v734_v45 = vpop.permute.xlu0 %733 }
 0x2aa   :  { %1957 = vmatpush3.xpose.msk.msra.mxu0 %vm241_vm2, %v571_v44 }
 0x2ab   :  { %1966 = vmatprep.subr.mxu0 %v2214_v34 }
 0x2ad   :  { %v736_v46 = vpop.permute.xlu1 %735  ;;  %1959 = vmatmul.mubr.msk.f32.vlgmr.msra.gmra.mxu0 %vm241_vm2, %v569_v43  ;;  %v1082_v47 = vpop.permute.xlu0 %1081 }
 0x2ae   :  { %1967 = vmatpush3.xpose.msk.msra.mxu0 %vm241_vm2, %v736_v46  ;;  %1968 = vmatprep.mubr.msk.f32.mxu0 %vm2215_vm1, %v2214_v34 }
 0x2af   :  { %1976 = vmatprep.subr.mxu0 %v2214_v34 }
 0x2b1   :  { %v917_v48 = vpop.permute.xlu1 %916  ;;  %1969 = vmatmul.mubr.msk.f32.vlgmr.msra.gmra.mxu0 %vm241_vm2, %v734_v45  ;;  %v1247_v50 = vpop.permute.xlu0 %1246 }
 0x2b2   :  { %1977 = vmatpush3.xpose.msk.msra.mxu0 %vm241_vm2, %v917_v48  ;;  %1978 = vmatprep.mubr.msk.f32.mxu0 %vm2215_vm1, %v2214_v34 }
 0x2b3   :  { %1986 = vmatprep.subr.mxu0 %v2214_v34 }
 0x2b5   :  { %v1080_v49 = vpop.permute.xlu1 %1079  ;;  %1979 = vmatmul.mubr.msk.f32.vlgmr.msra.gmra.mxu0 %vm241_vm2, %v2351_v39  ;;  %v1412_v52 = vpop.permute.xlu0 %1411 }
 0x2b6   :  { %1987 = vmatpush3.xpose.msk.msra.mxu0 %vm241_vm2, %v1082_v47  ;;  %1988 = vmatprep.mubr.msk.f32.mxu0 %vm2215_vm1, %v2214_v34 }
 0x2b7   :  { %1996 = vmatprep.subr.mxu0 %v2214_v34 }
 0x2b9   :  { %1989 = vmatmul.mubr.msk.f32.vlgmr.msra.gmra.mxu0 %vm241_vm2, %v1080_v49  ;;  %v1245_v51 = vpop.permute.xlu1 %1244 }
 0x2ba   :  { %1997 = vmatpush3.xpose.msk.msra.mxu0 %vm241_vm2, %v1247_v50  ;;  %1998 = vmatprep.mubr.msk.f32.mxu0 %vm2215_vm1, %v2214_v34 }
 0x2bb   :  { %2006 = vmatprep.subr.mxu0 %v2214_v34 }
 0x2bd   :  { %1999 = vmatmul.mubr.msk.f32.vlgmr.msra.gmra.mxu0 %vm241_vm2, %v1245_v51  ;;  %v1410_v53 = vpop.permute.xlu1 %1409 }
 0x2be   :  { %2007 = vmatpush3.xpose.msk.msra.mxu0 %vm241_vm2, %v1412_v52  ;;  %2008 = vmatprep.mubr.msk.f32.mxu0 %vm2215_vm1, %v2214_v34 }
 0x2c1   :  { %2009 = vmatmul.mubr.msk.f32.vlgmr.msra.gmra.mxu0 %vm241_vm2, %v1410_v53 }
 0x365   :  { %v312_v54 = vpop.f32.mrf.mxu1 }
 0x366   :  { %v477_v55 = vpop.f32.mrf.mxu0  ;;  %v316_v56 = vsel %vm241_vm2, %v312_v54, -inf }
 0x367   :  { %317 = vmax.xlane.f32.xlu0 %v316_v56  ;;  %v1940_v57 = vpop.f32.mrf.mxu1  ;;  %v481_v58 = vsel %vm241_vm2, %v477_v55, -inf }
 0x368   :  { %482 = vmax.xlane.f32.xlu1 %v481_v58  ;;  %v1950_v59 = vpop.f32.mrf.mxu0 }
 0x36d   :  { %v642_v60 = vpop.f32.mrf.mxu0 }
 0x36e   :  { %v646_v61 = vsel %vm241_vm2, %v642_v60, -inf }
 0x36f   :  { %647 = vmax.xlane.f32.xlu0 %v646_v61  ;;  %v1960_v62 = vpop.f32.mrf.mxu0 }
 0x371   :  { %v807_v63 = vpop.f32.mrf.mxu0 }
 0x372   :  { %v811_v2 = vsel %vm241_vm2, %v807_v63, -inf }
 0x373   :  { %812 = vmax.xlane.f32.xlu0 %v811_v2  ;;  %v1970_v3 = vpop.f32.mrf.mxu0 }
 0x375   :  { %v988_v4 = vpop.f32.mrf.mxu0 }
 0x376   :  { %v992_v5 = vsel %vm241_vm2, %v988_v4, -inf }
 0x377   :  { %993 = vmax.xlane.f32.xlu0 %v992_v5  ;;  %v1980_v6 = vpop.f32.mrf.mxu0 }
 0x379   :  { %v1153_v7 = vpop.f32.mrf.mxu0 }
 0x37a   :  { %v1157_v8 = vsel %vm241_vm2, %v1153_v7, -inf }
 0x37b   :  { %1158 = vmax.xlane.f32.xlu1 %v1157_v8  ;;  %v1990_v9 = vpop.f32.mrf.mxu0 }
 0x37d   :  { %v1318_v10 = vpop.f32.mrf.mxu0 }
 0x37e   :  { %v1322_v11 = vsel %vm241_vm2, %v1318_v10, -inf }
 0x37f   :  { %1323 = vmax.xlane.f32.xlu0 %v1322_v11  ;;  %v2000_v12 = vpop.f32.mrf.mxu0 }
 0x381   :  { %v1483_v13 = vpop.f32.mrf.mxu0 }
 0x382   :  { %v1487_v15 = vsel %vm241_vm2, %v1483_v13, -inf }
 0x383   :  { %v2010_v14 = vpop.f32.mrf.mxu0 }
 0x38c   :  { %327 = vrot.lane.b32.xlu1 %v2343_v38, %s2223_s28 }
 0x3b0   :  { %1488 = vmax.xlane.f32.xlu1 %v1487_v15 }
 0x3c1   :  { %657 = vrot.lane.b32.xlu1 %v2343_v38, %s2224_s29 }
 0x3c5   :  { %822 = vrot.lane.b32.xlu1 %v2343_v38, %s2225_s30 }
 0x3c9   :  { %1003 = vrot.lane.b32.xlu1 %v2351_v39, %s2223_s28 }
 0x3f0   :  { %v318_v16 = vpop.xlane.xlu0 %317 }
 0x3f1   :  { %v319_v17 = vsub.f32 %v312_v54, %v318_v16  ;;  %v483_v18 = vpop.xlane.xlu1 %482 }
 0x3f2   :  { %v484_v19 = vsub.f32 %v477_v55, %v483_v18 }
 0x3f3   :  { %v320_v20 = vmul.f32 1.442695, %v319_v17 }
 0x3f4   :  { %v485_v21 = vmul.f32 1.442695, %v484_v19 }
 0x3f5   :  { %2064 = vpow2.f32 %v320_v20 }
 0x3f6   :  { %2066 = vpow2.f32 %v485_v21 }
 0x3f8   :  { %v648_v22 = vpop.xlane.xlu0 %647 }
 0x3f9   :  { %v649_v35 = vsub.f32 %v642_v60, %v648_v22 }
 0x3fb   :  { %v650_v37 = vmul.f32 1.442695, %v649_v35 }
 0x3fc   :  { %v813_v23 = vpop.xlane.xlu0 %812 }
 0x3fd   :  { %v814_v24 = vsub.f32 %v807_v63, %v813_v23 }
 0x3ff   :  { %v815_v25 = vmul.f32 1.442695, %v814_v24 }
 0x400   :  { %v994_v36 = vpop.xlane.xlu0 %993 }
 0x401   :  { %2068 = vpow2.f32 %v815_v25  ;;  %v995_v40 = vsub.f32 %v988_v4, %v994_v36  ;;  %v1590_v36 = vld [vmem:[#allocation7 + $0x8] sm:$0xff] }
 0x402   :  { %v2065_v26 = vpop.eup %2064  ;;  %2070 = vpow2.f32 %v650_v37  ;;  %v1589_v37 = vld [vmem:[#allocation7] sm:$0xff] }
 0x403   :  { %v2414_v27 = vpop.eup %2066  ;;  %v322_v28 = vsel %vm241_vm2, %v2065_v26, 0.0  ;;  %v996_v42 = vmul.f32 1.442695, %v995_v40 }
 0x404   :  { %v1159_v29 = vpop.xlane.xlu1 %1158  ;;  %323 = vadd.xlane.f32.xlu0 %v322_v28  ;;  %v487_v30 = vsel %vm241_vm2, %v2414_v27, 0.0 }
 0x405   :  { %488 = vadd.xlane.f32.xlu1 %v487_v30  ;;  %2072 = vpow2.f32 %v996_v42  ;;  %v1160_v44 = vsub.f32 %v1153_v7, %v1159_v29 }
 0x407   :  { %v1161_v46 = vmul.f32 1.442695, %v1160_v44 }
 0x408   :  { %v328_v31 = vpop.permute.xlu1 %327  ;;  %v1324_v41 = vpop.xlane.xlu0 %1323 }
 0x409   :  { %1942 = vmatpush3.msra.mxu1 %v328_v31  ;;  %v1325_v43 = vsub.f32 %v1318_v10, %v1324_v41 }
 0x40a   :  { %1951 = vmatprep.subr.mxu1 %v2214_v34 }
 0x40b   :  { %v1326_v45 = vmul.f32 1.442695, %v1325_v43 }
 0x40d   :  { %2074 = vpow2.f32 %v1326_v45 }
 0x40e   :  { %v2420_v32 = vpop.eup %2068  ;;  %2076 = vpow2.f32 %v1161_v46 }
 0x40f   :  { %v817_v33 = vsel %vm241_vm2, %v2420_v32, 0.0  ;;  %v2071_v47 = vpop.eup %2070 }
 0x410   :  { %818 = vadd.xlane.f32.xlu1 %v817_v33  ;;  %v652_v48 = vsel %vm241_vm2, %v2071_v47, 0.0  ;;  %v1591_v33 = vld [vmem:[#allocation7 + $0x10] sm:$0xff] }
 0x41a   :  { %492 = vrot.lane.b32.xlu0 %v2343_v38, %s2226_s12  ;;  %v2427_v38 = vpop.eup %2072 }
 0x41b   :  { %v998_v52 = vsel %vm241_vm2, %v2427_v38, 0.0  ;;  %v2431_v53 = vpop.eup %2074 }
 0x41c   :  { %v1328_v54 = vsel %vm241_vm2, %v2431_v53, 0.0  ;;  %v2077_v55 = vpop.eup %2076 }
 0x41d   :  { %v1163_v56 = vsel %vm241_vm2, %v2077_v55, 0.0 }
 0x421   :  { %1168 = vrot.lane.b32.xlu1 %v2351_v39, %s2226_s12 }
 0x439   :  { %v1489_v49 = vpop.xlane.xlu1 %1488  ;;  %653 = vadd.xlane.f32.xlu0 %v652_v48 }
 0x43a   :  { %v1490_v50 = vsub.f32 %v1483_v13, %v1489_v49 }
 0x43c   :  { %v1491_v51 = vmul.f32 1.442695, %v1490_v50 }
 0x43d   :  { %999 = vadd.xlane.f32.xlu0 %v998_v52  ;;  %v658_v59 = vpop.permute.xlu1 %657 }
 0x43e   :  { %2078 = vpow2.f32 %v1491_v51 }
 0x441   :  { %1329 = vadd.xlane.f32.xlu0 %v1328_v54  ;;  %v823_v60 = vpop.permute.xlu1 %822 }
 0x445   :  { %1164 = vadd.xlane.f32.xlu1 %v1163_v56  ;;  %v1004_v61 = vpop.permute.xlu1 %1003 }
 0x44b   :  { %v2436_v57 = vpop.eup %2078 }
 0x44c   :  { %v1493_v58 = vsel %vm241_vm2, %v2436_v57, 0.0 }
 0x44d   :  { %1494 = vadd.xlane.f32.xlu0 %v1493_v58 }
 0x456   :  { %1498 = vrot.lane.b32.xlu1 %v2351_v39, %s2225_s30 }
 0x463   :  { %1333 = vrot.lane.b32.xlu0 %v2351_v39, %s2224_s29 }
 0x48d   :  { %v324_v62 = vpop.xlane.xlu0 %323 }
 0x48e   :  { %2080 = vrcp.f32 %v324_v62  ;;  %v489_v63 = vpop.xlane.xlu1 %488 }
 0x48f   :  { %2082 = vrcp.f32 %v489_v63 }
 0x491   :  { %v493_v5 = vpop.permute.xlu0 %492 }
 0x499   :  { %v819_v6 = vpop.xlane.xlu1 %818 }
 0x49b   :  { %v2081_v2 = vpop.eup %2080 }
 0x49c   :  { %v326_v3 = vmul.f32 %v2081_v2, %v2065_v26  ;;  %v2083_v4 = vpop.eup %2082 }
 0x49d   :  { %v491_v39 = vmul.f32 %v2083_v4, %v2414_v27  ;;  %v1169_v9 = vpop.permute.xlu1 %1168 }
 0x49e   :  { %1944 = vmatmul.mubr.msk.f32.vlgmr.msra.gmra.mxu1 %vm241_vm2, %v326_v3 }
 0x49f   :  { %1952 = vmatpush3.msra.mxu1 %v493_v5  ;;  %1953 = vmatprep.mubr.msk.f32.mxu1 %vm2215_vm1, %v2214_v34 }
 0x4a0   :  { %1961 = vmatprep.subr.mxu1 %v2214_v34 }
 0x4a2   :  { %1954 = vmatmul.mubr.msk.f32.vlgmr.msra.gmra.mxu1 %vm241_vm2, %v491_v39 }
 0x4a3   :  { %1962 = vmatpush3.msra.mxu1 %v658_v59  ;;  %1963 = vmatprep.mubr.msk.f32.mxu1 %vm2215_vm1, %v2214_v34 }
 0x4a4   :  { %1971 = vmatprep.subr.mxu1 %v2214_v34 }
 0x4c2   :  { %v654_v7 = vpop.xlane.xlu0 %653 }
 0x4c3   :  { %2084 = vrcp.f32 %v654_v7 }
 0x4c4   :  { %2086 = vrcp.f32 %v819_v6 }
 0x4c6   :  { %v1000_v8 = vpop.xlane.xlu0 %999 }
 0x4c7   :  { %2088 = vrcp.f32 %v1000_v8 }
 0x4ca   :  { %v1330_v10 = vpop.xlane.xlu0 %1329 }
 0x4ce   :  { %v1165_v11 = vpop.xlane.xlu1 %1164 }
 0x4cf   :  { %2090 = vrcp.f32 %v1165_v11 }
 0x4d0   :  { %v2085_v12 = vpop.eup %2084  ;;  %2092 = vrcp.f32 %v1330_v10 }
 0x4d1   :  { %v656_v13 = vmul.f32 %v2085_v12, %v2071_v47  ;;  %v2087_v14 = vpop.eup %2086 }
 0x4d2   :  { %v821_v15 = vmul.f32 %v2087_v14, %v2420_v32  ;;  %v1499_v24 = vpop.permute.xlu1 %1498  ;;  %v1592_v32 = vld [vmem:[#allocation7 + $0x18] sm:$0xff] }
 0x4d3   :  { %1964 = vmatmul.mubr.msk.f32.vlgmr.msra.gmra.mxu1 %vm241_vm2, %v656_v13  ;;  %2016 = vmatprep.subr.mxu0 %v1592_v32 }
 0x4d4   :  { %1972 = vmatpush3.msra.mxu1 %v823_v60  ;;  %1973 = vmatprep.mubr.msk.f32.mxu1 %vm2215_vm1, %v2214_v34  ;;  %v2089_v16 = vpop.eup %2088  ;;  %v1867_v60 = vld [vmem:[%s2519_s8] ss:$0 sm:$0xff] }
 0x4d5   :  { %1981 = vmatprep.subr.mxu1 %v2214_v34  ;;  %v1002_v18 = vmul.f32 %v2089_v16, %v2427_v38  ;;  %2017 = vmatpush3.msra.mxu0 %v1592_v32  ;;  %v1725_v16 = vld [vmem:[#allocation8 + $0x8] sm:$0xff] }
 0x4d6   :  { %v1495_v17 = vpop.xlane.xlu0 %1494  ;;  %2018 = vmatprep.subr.mxu0 %v1591_v33 }
 0x4d7   :  { %2094 = vrcp.f32 %v1495_v17  ;;  %1974 = vmatmul.mubr.msk.f32.vlgmr.msra.gmra.mxu1 %vm241_vm2, %v821_v15  ;;  %2019 = vmatpush3.msra.mxu0 %v1591_v33  ;;  %v1726_v15 = vld [vmem:[#allocation8 + $0x10] sm:$0xff]  ;;  %v1724_v17 = vld [vmem:[#allocation8] sm:$0xff] }
 0x4d8   :  { %1982 = vmatpush3.msra.mxu1 %v1004_v61  ;;  %1983 = vmatprep.mubr.msk.f32.mxu1 %vm2215_vm1, %v2214_v34 }
 0x4d9   :  { %1991 = vmatprep.subr.mxu1 %v2214_v34  ;;  %2020 = vmatprep.subr.mxu0 %v1590_v36 }
 0x4da   :  { %v1334_v22 = vpop.permute.xlu0 %1333  ;;  %2021 = vmatpush3.msra.mxu0 %v1590_v36 }
 0x4db   :  { %1984 = vmatmul.mubr.msk.f32.vlgmr.msra.gmra.mxu1 %vm241_vm2, %v1002_v18  ;;  %2022 = vmatprep.subr.mxu0 %v1589_v37 }
 0x4dc   :  { %v2091_v19 = vpop.eup %2090  ;;  %1992 = vmatpush3.msra.mxu1 %v1169_v9  ;;  %1993 = vmatprep.mubr.msk.f32.mxu1 %vm2215_vm1, %v2214_v34 }
 0x4dd   :  { %2001 = vmatprep.subr.mxu1 %v2214_v34  ;;  %v1167_v20 = vmul.f32 %v2091_v19, %v2077_v55  ;;  %v2093_v21 = vpop.eup %2092  ;;  %2023 = vmatpush3.msra.mxu0 %v1589_v37 }
 0x4de   :  { %v1332_v23 = vmul.f32 %v2093_v21, %v2431_v53 }
 0x4df   :  { %1994 = vmatmul.mubr.msk.f32.vlgmr.msra.gmra.mxu1 %vm241_vm2, %v1167_v20 }
 0x4e0   :  { %2002 = vmatpush3.msra.mxu1 %v1334_v22  ;;  %2003 = vmatprep.mubr.msk.f32.mxu1 %vm2215_vm1, %v2214_v34 }
 0x4e1   :  { %2011 = vmatprep.subr.mxu1 %v2214_v34 }
 0x4e3   :  { %2004 = vmatmul.mubr.msk.f32.vlgmr.msra.gmra.mxu1 %vm241_vm2, %v1332_v23 }
 0x4e4   :  { %v2095_v25 = vpop.eup %2094  ;;  %2012 = vmatpush3.msra.mxu1 %v1499_v24  ;;  %2013 = vmatprep.mubr.msk.f32.mxu1 %vm2215_vm1, %v2214_v34 }
 0x4e5   :  { %v1497_v26 = vmul.f32 %v2095_v25, %v2436_v57  ;;  %v1870_v25 = vld [vmem:[%s2514_s3] ss:$0 sm:$0xff]  ;;  %s2229_s3 = smov [#allocation10]  }
 0x4e6   :  { %s1824_s18 = sshll.u32 %s2229_s3, 4  ;;  %s1825_s18 = int_to_ptr.vmem [resolvable:$true] %s1824_s18 }
 0x4e7   :  { %2014 = vmatmul.mubr.msk.f32.vlgmr.msra.gmra.mxu1 %vm241_vm2, %v1497_v26  ;;  %p2185_p7 = scmp.lt.s32.totalorder %s1825_s18, %s1825_s18 }
 0x55e   :  { %v399_v27 = vpop.f32.mrf.mxu1 }
 0x560   :  { %v1945_v28 = vpop.f32.mrf.mxu1 }
 0x562   :  { %v564_v29 = vpop.f32.mrf.mxu1 }
 0x563   :  { %899 = vrot.lane.b32.xlu0 %v564_v29, %s2211_s23 }
 0x564   :  { %v1955_v30 = vpop.f32.mrf.mxu1 }
 0x593   :  { %v729_v31 = vpop.f32.mrf.mxu1 }
 0x594   :  { %903 = vrot.lane.b32.xlu1 %v729_v31, %s2227_s13 }
 0x595   :  { %v1965_v35 = vpop.f32.mrf.mxu1 }
 0x596   :  { %v1872_v35 = vld [vmem:[%s2521_s10] ss:$0 sm:$0xff] }
 0x597   :  { %v894_v34 = vpop.f32.mrf.mxu1 }
 0x598   :  { %907 = vrot.lane.b32.xlu1 %v894_v34, %s2228_s5 }
 0x599   :  { %v1975_v40 = vpop.f32.mrf.mxu1 }
 0x59b   :  { %v1075_v41 = vpop.f32.mrf.mxu1 }
 0x59d   :  { %v1985_v42 = vpop.f32.mrf.mxu1 }
 0x59f   :  { %v1240_v43 = vpop.f32.mrf.mxu1 }
 0x5a0   :  { %1575 = vrot.lane.b32.xlu0 %v1240_v43, %s2211_s23 }
 0x5a1   :  { %v1995_v44 = vpop.f32.mrf.mxu1 }
 0x5a3   :  { %v1405_v45 = vpop.f32.mrf.mxu1 }
 0x5a4   :  { %1579 = vrot.lane.b32.xlu0 %v1405_v45, %s2227_s13 }
 0x5a5   :  { %v2005_v46 = vpop.f32.mrf.mxu1 }
 0x5a7   :  { %v1570_v47 = vpop.f32.mrf.mxu1 }
 0x5a8   :  { %1583 = vrot.lane.b32.xlu1 %v1570_v47, %s2228_s5 }
 0x5a9   :  { %v2015_v48 = vpop.f32.mrf.mxu1 }
 0x5d5   :  { %v900_v38 = vpop.permute.xlu0 %899 }
 0x5d6   :  { %v910_v50 = vsel %vm241_vm2, %v399_v27, %v900_v38  ;;  %v1871_v27 = vld [vmem:[%s2515_s4] ss:$0 sm:$0xff]  ;;  %s2180_s4 = scalar_lea.vmem %s1825_s18, 256 }
 0x5d7   :  { %p2181_p6 = scmp.ne.s32.totalorder %s1825_s18, %s2180_s4  ;;  %p2186_p8 = scmp.lt.s32.totalorder %s2180_s4, %s2180_s4 }
 0x5d9   :  { %p2187_p9 = por %p2186_p8, %p2185_p7 }
 0x5db   :  { %p2188_p10 = pnand %p2187_p9, %p2181_p6 }
 0x606   :  { %v904_v49 = vpop.permute.xlu1 %903 }
 0x607   :  { %v912_v51 = vsel %vm911_vm3, %v910_v50, %v904_v49 }
 0x60a   :  { %v908_v52 = vpop.permute.xlu1 %907 }
 0x60b   :  { %v914_v53 = vsel %vm913_vm4, %v912_v51, %v908_v52 }
 0x60c   :  { %2024 = vmatprep.mubr.msk.f32.mxu0 %vm103_vm0, %v914_v53 }
 0x612   :  { %v1576_v54 = vpop.permute.xlu0 %1575 }
 0x613   :  { %v1586_v56 = vsel %vm241_vm2, %v1075_v41, %v1576_v54 }
 0x616   :  { %v1580_v55 = vpop.permute.xlu0 %1579 }
 0x617   :  { %v1587_v57 = vsel %vm911_vm3, %v1586_v56, %v1580_v55 }
 0x61a   :  { %v1584_v58 = vpop.permute.xlu1 %1583 }
 0x61b   :  { %v1588_v59 = vsel %vm913_vm4, %v1587_v57, %v1584_v58 }
 0x61c   :  { %2025 = vmatmul.mubr.msk.f32.vlgmr.msra.gmra.mxu0 %vm103_vm0, %v1588_v59 }
 0x6dc   :  { %v2026_v61 = vpop.f32.mrf.mxu0 }
 0x6dd   :  { %v1677_v62 = vadd.f32 %v2026_v61, %v1867_v60 }
 0x6de   :  { %v1671_v63 = vpop.f32.mrf.mxu0 }
 0x6df   :  { %v1681_v2 = vadd.f32 %v1677_v62, %v2316_v1  ;;  %v1672_v3 = vadd.f32 %v1867_v60, %v1671_v63 }
 0x6e1   :  { %v1680_v4 = vadd.f32 %v1672_v3, %v2314_v0  ;;  %v1685_v5 = vsel %vm103_vm0, %v1681_v2, 0.0  ;;  %v1727_v0 = vld [vmem:[#allocation8 + $0x18] sm:$0xff] }
 0x6e2   :  { %1686 = vadd.xlane.f32.xlu1 %v1685_v5  ;;  %2027 = vmatprep.subr.mxu1 %v1727_v0 }
 0x6e3   :  { %v1682_v39 = vsel %vm103_vm0, %v1680_v4, 0.0  ;;  %2028 = vmatpush3.msra.mxu1 %v1727_v0 }
 0x6e4   :  { %1683 = vadd.xlane.f32.xlu0 %v1682_v39  ;;  %2029 = vmatprep.subr.mxu1 %v1726_v15 }
 0x6e5   :  { %2030 = vmatpush3.msra.mxu1 %v1726_v15 }
 0x6e6   :  { %2031 = vmatprep.subr.mxu1 %v1725_v16 }
 0x6e7   :  { %2032 = vmatpush3.msra.mxu1 %v1725_v16 }
 0x6e8   :  { %2033 = vmatprep.subr.mxu1 %v1724_v17 }
 0x6e9   :  { %2034 = vmatpush3.msra.mxu1 %v1724_v17 }
 0x76b   :  { %v1687_v6 = vpop.xlane.xlu1 %1686 }
 0x76c   :  { %v1689_v7 = vmul.f32 0.03125, %v1687_v6 }
 0x76d   :  { %v1684_v8 = vpop.xlane.xlu0 %1683 }
 0x76e   :  { %v1688_v9 = vmul.f32 0.03125, %v1684_v8  ;;  %v1691_v10 = vsub.f32 %v1681_v2, %v1689_v7 }
 0x770   :  { %v1690_v11 = vsub.f32 %v1680_v4, %v1688_v9  ;;  %v1693_v14 = vmul.f32 %v1691_v10, %v1691_v10 }
 0x772   :  { %v1692_v12 = vmul.f32 %v1690_v11, %v1690_v11  ;;  %v1697_v1 = vsel %vm103_vm0, %v1693_v14, 0.0 }
 0x774   :  { %v1694_v13 = vsel %vm103_vm0, %v1692_v12, 0.0 }
 0x775   :  { %1695 = vadd.xlane.f32.xlu0 %v1694_v13 }
 0x779   :  { %1698 = vadd.xlane.f32.xlu0 %v1697_v1 }
 0x7fe   :  { %v1696_v18 = vpop.xlane.xlu0 %1695 }
 0x7ff   :  { %v1700_v19 = vmul.f32 0.03125, %v1696_v18 }
 0x801   :  { %v1702_v20 = vadd.f32 1e-05, %v1700_v19 }
 0x802   :  { %v1699_v21 = vpop.xlane.xlu0 %1698 }
 0x803   :  { %2096 = vrsqrt.f32 %v1702_v20  ;;  %v1701_v22 = vmul.f32 0.03125, %v1699_v21 }
 0x805   :  { %v1703_v23 = vadd.f32 1e-05, %v1701_v22 }
 0x807   :  { %2098 = vrsqrt.f32 %v1703_v23 }
 0x810   :  { %v2097_v24 = vpop.eup %2096 }
 0x811   :  { %v1706_v26 = vmul.f32 %v2097_v24, %v1690_v11 }
 0x813   :  { %v1714_v28 = vmul.f32 %v1870_v25, %v1706_v26 }
 0x814   :  { %v2099_v29 = vpop.eup %2098 }
 0x815   :  { %v1707_v30 = vmul.f32 %v2099_v29, %v1691_v10  ;;  %v1722_v31 = vadd.f32 %v1871_v27, %v1714_v28 }
 0x817   :  { %v1715_v32 = vmul.f32 %v1870_v25, %v1707_v30  ;;  %2035 = vmatprep.mubr.msk.f32.mxu1 %vm103_vm0, %v1722_v31 }
 0x819   :  { %v1723_v33 = vadd.f32 %v1871_v27, %v1715_v32 }
 0x81b   :  { %2036 = vmatmul.mubr.msk.f32.vlgmr.msra.gmra.mxu1 %vm103_vm0, %v1723_v33 }
 0x8db   :  { %v2037_v34 = vpop.f32.mrf.mxu1 }
 0x8dc   :  { %v1812_v36 = vadd.f32 %v2037_v34, %v1872_v35 }
 0x8dd   :  { %v1806_v37 = vpop.f32.mrf.mxu1 }
 0x8de   :  { %v1816_v40 = vadd.f32 %v1812_v36, %v1681_v2  ;;  %v1807_v41 = vadd.f32 %v1872_v35, %v1806_v37 }
 0x8e0   :  { %1818 = vst.msk [vmem:[#allocation10 + $0x8] sm:$0xff] %vm103_vm0, %v1816_v40  ;;  %v1815_v42 = vadd.f32 %v1807_v41, %v1680_v4 }
 0x8e2   :  { %1817 = vst.msk [vmem:[#allocation10] sm:$0xff] %vm103_vm0, %v1815_v42 }
 0x8e3   :  { %2191 = shalt.err (!%p2188_p10)
}
 0x8e4   :  { %1830 = dma.vmem_to_hbm [thread:$0]  %s1825_s18, 256, %s2522_s11, [#allocation4], %s2210_s22, %s2210_s22, %s2211_s23  }
 0x8e5   :  { %2206 = dma.done.wait [#allocation4], 256  }
 0x8e6   :  { %2207 = vsyncadd [#allocation4], 4294967040 }
 0x8e7   :  { %1834 = vsyncpa [#allocation3], 1 }
 0x8e8   :  { %1835 = vsyncpa [#allocation6], 1 }
 0x8e9   :  { %1836 = vsyncpa [#allocation9], 1 }
 0x8ea   :  { %1837 = vsyncpa [#allocation4], 1 }

</bundles_post_ra>
